<compile_context>
chip_gen: v7x
topology: tpu7x:2x2x1
jax: 0.10.0
libtpu: 0.0.40
codegen_flags: <defaults>
</compile_context>

<pallas_src>
import math

import jax
import jax.numpy as jnp
from jax import lax
from jax.experimental import pallas as pl
from jax.experimental.pallas import tpu as pltpu

SQRT2 = math.sqrt(2.0)
RGB_PAD = 128  # lane-dense padded toRGB output width (sliced to img_ch outside)

_COMPILER_PARAMS = pltpu.CompilerParams(dimension_semantics=("parallel",))


# ----------------------------------------------------------------------------
# In-kernel helpers (trace-time; jnp ops on loaded VMEM values only)
# ----------------------------------------------------------------------------
def _pad1(x):
    """Zero-pad a (H, W, C) tile by 1 pixel on each spatial side, in VMEM."""
    H, W, C = x.shape
    zr = jnp.zeros((1, W, C), x.dtype)
    zc = jnp.zeros((H + 2, 1, C), x.dtype)
    xp = jnp.concatenate([zr, x, zr], axis=0)
    return jnp.concatenate([zc, xp, zc], axis=1)


def _im2col3x3(x):
    """(H, W, C) -> (H*W, 9*C) patch matrix (tap-major, channel-minor cols)."""
    H, W, C = x.shape
    xp = _pad1(x)
    cols = [xp[dy:dy + H, dx:dx + W, :].reshape(H * W, C)
            for dy in range(3) for dx in range(3)]
    return jnp.concatenate(cols, axis=-1)


def _upsample2x(x):
    """Nearest-neighbour 2x spatial upsample of (H, W, C), entirely in VMEM."""
    # TODO(synk): StyleGAN2 uses FIR-blurred upsampling; nearest is a stand-in.
    H, W, C = x.shape
    x = jnp.broadcast_to(x[:, None, :, :], (H, 2, W, C)).reshape(2 * H, W, C)
    x = jnp.broadcast_to(x[:, :, None, :], (2 * H, W, 2, C)).reshape(2 * H, 2 * W, C)
    return x


def _affine(mixed_row, style_idx, fp_ref, w_off, b_off, wd):
    """Per-style affine s = w_style @ A + b, as a (1, C) row (f32)."""
    wlat = mixed_row[:, style_idx * wd:(style_idx + 1) * wd]        # (1, wd)
    s = jnp.dot(wlat, fp_ref[w_off:w_off + wd, :],
                preferred_element_type=jnp.float32)
    return s + fp_ref[b_off:b_off + 1, :]                            # (1, C)


def _modconv3x3(x_hwc, s_row, wk32_ref, fp_ref, w_off, w2s_off, b_off,
                noise_col, C):
    """Modulated/demodulated 3x3 conv as one MXU contraction.

    Modulation is applied to the activations (x * s[cin]) which is equivalent to
    weight-space modulation; demodulation uses dcoef = rsqrt(s^2 @ w2sum + eps)
    (a tiny MXU matmul) applied to the conv output per cout."""
    xm = x_hwc * s_row                                               # (H, W, C)
    patches = _im2col3x3(xm)                                         # (H*W, 9C)
    w = wk32_ref[w_off:w_off + 9 * C, :]                             # bf16 (9C, C)
    y = jnp.dot(patches.astype(jnp.bfloat16), w,
                preferred_element_type=jnp.float32)                  # (H*W, C)
    w2s = fp_ref[w2s_off:w2s_off + C, :]                             # f32 (C, C)
    dcoef = lax.rsqrt(jnp.dot(s_row * s_row, w2s,
                              preferred_element_type=jnp.float32) + 1e-8)
    y = y * dcoef + noise_col + fp_ref[b_off:b_off + 1, :]
    return jnp.where(y >= 0.0, y, 0.2 * y) * SQRT2                   # f32 epilogue


def _synthesize(mixed_row, noise_ref, wk32_ref, wkw_ref, fp_ref, p256_ref,
                img_ref, cfg):
    """Two modulated conv blocks (4x4 -> upsample -> 8x8) + 1x1 toRGB, all in VMEM."""
    # TODO(synk): full StyleGAN2 synthesis has log2(res)-1 blocks with skip toRGB
    # accumulation; only this 2-block stack is modeled here.
    C = cfg['csyn']
    wd = cfg['w_dim']
    H0, W0 = cfg['h0'], cfg['w0']
    H1, W1 = 2 * H0, 2 * W0

    const = fp_ref[cfg['fp_const']:cfg['fp_const'] + H0 * W0, :].reshape(H0, W0, C)
    n0 = noise_ref[0, 0:H0 * W0, :]                                  # (H0*W0, 1), pre-scaled
    n1 = noise_ref[0, H0 * W0:H0 * W0 + H1 * W1, :]                  # (H1*W1, 1), pre-scaled

    # --- block 0: 4x4, no upsample ---
    s0 = _affine(mixed_row, 0, fp_ref, cfg['fp_aff0w'], cfg['fp_aff0b'], wd)
    y0 = _modconv3x3(const, s0, wk32_ref, fp_ref,
                     cfg['wk_conv0'], cfg['fp_w2s0'], cfg['fp_b0'], n0, C)

    # --- block 1: nearest 2x upsample (in VMEM) -> 8x8 modulated conv ---
    xu = _upsample2x(y0.reshape(H0, W0, C))
    s1 = _affine(mixed_row, 1, fp_ref, cfg['fp_aff1w'], cfg['fp_aff1b'], wd)
    y1 = _modconv3x3(xu, s1, wk32_ref, fp_ref,
                     cfg['wk_conv1'], cfg['fp_w2s1'], cfg['fp_b1'], n1, C)

    # --- toRGB epilogue: 1x1 modulated conv, no demod, no noise, no act ---
    srgb = _affine(mixed_row, 2, fp_ref, cfg['fp_affrgbw'], cfg['fp_affrgbb'], wd)
    wrgb = wkw_ref[:, cfg['wkw_rgb']:cfg['wkw_rgb'] + RGB_PAD]       # bf16 (C, 128)
    img = jnp.dot((y1 * srgb).astype(jnp.bfloat16), wrgb,
                  preferred_element_type=jnp.float32)
    img = img + p256_ref[cfg['p_rgbb']:cfg['p_rgbb'] + 1, 0:RGB_PAD]
    img_ref[0] = img.reshape(H1, W1, RGB_PAD)                        # lane-dense store


# ----------------------------------------------------------------------------
# Pallas kernels
# ----------------------------------------------------------------------------
def _make_fused_kernel(cfg):
    """Encoder -> latent_avg -> style mix -> synthesis, one sample per grid step."""

    def kernel(x_ref, inj_ref, noise_ref, wk32_ref, wkw_ref, fp_ref, p256_ref,
               codes_ref, img_ref):
        cin, cenc = cfg['cin'], cfg['cenc']
        nSwd = cfg['n_styles'] * cfg['w_dim']

        # --- encoder: conv3x3 + ReLU -> global avg pool -> linear head ---
        # TODO(synk): the real GradualStyleEncoder is a 50-layer IR-SE FPN
        # backbone; a fused conv3x3 + pooled-linear head stands in for it here.
        x = x_ref[0]                                                 # (H, W, Cin)
        patches = _im2col3x3(x)                                      # (H*W, 9*Cin)
        wenc = wk32_ref[cfg['wk_enc']:cfg['wk_enc'] + 9 * cin, :]    # bf16 (9*Cin, Cenc)
        feat = jnp.dot(patches.astype(jnp.bfloat16), wenc,
                       preferred_element_type=jnp.float32)
        feat = jnp.maximum(feat + fp_ref[cfg['fp_encb']:cfg['fp_encb'] + 1, :], 0.0)
        pooled = jnp.sum(feat, axis=0, keepdims=True)                # 1/(H*W) folded into head_w
        headw = wkw_ref[:, cfg['wkw_head']:cfg['wkw_head'] + nSwd]   # bf16 (Cenc, nS*wd)
        codes = jnp.dot(pooled.astype(jnp.bfloat16), headw,
                        preferred_element_type=jnp.float32)
        codes = (codes
                 + p256_ref[cfg['p_headb']:cfg['p_headb'] + 1, :]    # head bias
                 + p256_ref[cfg['p_lat']:cfg['p_lat'] + 1, :])       # latent_avg (or zeros)

        # --- fused latent-mask style mixing (identity when no mask) ---
        mixed = (p256_ref[cfg['p_keep']:cfg['p_keep'] + 1, :] * codes
                 + p256_ref[cfg['p_inj']:cfg['p_inj'] + 1, :] * inj_ref[0])
        codes_ref[0] = mixed                                         # lane-dense (1, 256)

        _synthesize(mixed, noise_ref, wk32_ref, wkw_ref, fp_ref, p256_ref,
                    img_ref, cfg)

    return kernel


def _make_synth_kernel(cfg):
    """input_code path: style mix on provided latents -> synthesis (no encoder)."""

    def kernel(codes_in_ref, inj_ref, noise_ref, wk32_ref, wkw_ref, fp_ref,
               p256_ref, codes_ref, img_ref):
        codes = codes_in_ref[0]                                      # (1, nS*wd)
        mixed = (p256_ref[cfg['p_keep']:cfg['p_keep'] + 1, :] * codes
                 + p256_ref[cfg['p_inj']:cfg['p_inj'] + 1, :] * inj_ref[0])
        codes_ref[0] = mixed
        _synthesize(mixed, noise_ref, wk32_ref, wkw_ref, fp_ref, p256_ref,
                    img_ref, cfg)

    return kernel


# ----------------------------------------------------------------------------
# pallas_call wrappers
# ----------------------------------------------------------------------------
def _full_spec(arr):
    nd = arr.ndim
    return pl.BlockSpec(arr.shape, lambda b, _nd=nd: (0,) * _nd)


def _call_pallas(kernel, per_sample_specs, per_sample_args, p256, q, B):
    cfg = q['cfg']
    nSwd = cfg['n_styles'] * cfg['w_dim']
    H1, W1 = 2 * cfg['h0'], 2 * cfg['w0']
    param_args = (q['wk32'], q['wkw'], q['fp'], p256)
    param_specs = [_full_spec(a) for a in param_args]
    return pl.pallas_call(
        kernel,
        out_shape=(jax.ShapeDtypeStruct((B, 1, nSwd), jnp.float32),
                   jax.ShapeDtypeStruct((B, H1, W1, RGB_PAD), jnp.float32)),
        grid=(B,),
        in_specs=list(per_sample_specs) + param_specs,
        out_specs=(pl.BlockSpec((1, 1, nSwd), lambda b: (b, 0, 0)),
                   pl.BlockSpec((1, H1, W1, RGB_PAD), lambda b: (b, 0, 0, 0))),
        compiler_params=_COMPILER_PARAMS,
    )(*per_sample_args, *param_args)


def pallas_encode_synthesize(x_nhwc, inject_flat, noise, p256, q):
    B, H, W, cin = x_nhwc.shape
    cfg = q['cfg']
    nSwd = cfg['n_styles'] * cfg['w_dim']
    specs = [pl.BlockSpec((1, H, W, cin), lambda b: (b, 0, 0, 0)),
             pl.BlockSpec((1, 1, nSwd), lambda b: (b, 0, 0)),
             pl.BlockSpec((1, cfg['n_noise'], 1), lambda b: (b, 0, 0))]
    return _call_pallas(_make_fused_kernel(cfg), specs,
                        (x_nhwc, inject_flat, noise), p256, q, B)


def pallas_synthesize(codes_flat, inject_flat, noise, p256, q):
    B = codes_flat.shape[0]
    cfg = q['cfg']
    nSwd = cfg['n_styles'] * cfg['w_dim']
    specs = [pl.BlockSpec((1, 1, nSwd), lambda b: (b, 0, 0)),
             pl.BlockSpec((1, 1, nSwd), lambda b: (b, 0, 0)),
             pl.BlockSpec((1, cfg['n_noise'], 1), lambda b: (b, 0, 0))]
    return _call_pallas(_make_synth_kernel(cfg), specs,
                        (codes_flat, inject_flat, noise), p256, q, B)


# ----------------------------------------------------------------------------
# Deterministic parameter initialization (stands in for checkpoint loading)
# ----------------------------------------------------------------------------
def init_params(key, *, cin=4, cenc=32, n_styles=8, w_dim=32, csyn=32, img_ch=3):
    ks = jax.random.split(key, 12)
    p = {}
    # "encoder" (stand-in for the 50-layer IR-SE GradualStyleEncoder)
    p['enc_conv_w'] = jax.random.normal(ks[0], (3, 3, cin, cenc), jnp.float32) * 0.1
    p['enc_conv_b'] = jnp.zeros((1, cenc), jnp.float32)
    p['enc_head_w'] = jax.random.normal(ks[1], (cenc, n_styles * w_dim), jnp.float32) * 0.1
    p['enc_head_b'] = jnp.zeros((1, n_styles * w_dim), jnp.float32)
    # latent_avg buffer (PyTorch: mean of decoder.mapping(randn(10000,512))); synthetic here.
    p['latent_avg'] = jax.random.normal(ks[2], (1, n_styles, w_dim), jnp.float32) * 0.05
    # synthesis
    p['const'] = jax.random.normal(ks[3], (1, 4, 4, csyn), jnp.float32)
    p['aff0_w'] = jax.random.normal(ks[4], (w_dim, csyn), jnp.float32) * 0.1
    p['aff0_b'] = jnp.ones((1, csyn), jnp.float32)
    p['conv0_w'] = jax.random.normal(ks[5], (3, 3, csyn, csyn), jnp.float32) * 0.1
    p['conv0_b'] = jnp.zeros((1, csyn), jnp.float32)
    p['aff1_w'] = jax.random.normal(ks[6], (w_dim, csyn), jnp.float32) * 0.1
    p['aff1_b'] = jnp.ones((1, csyn), jnp.float32)
    p['conv1_w'] = jax.random.normal(ks[7], (3, 3, csyn, csyn), jnp.float32) * 0.1
    p['conv1_b'] = jnp.zeros((1, csyn), jnp.float32)
    p['affrgb_w'] = jax.random.normal(ks[8], (w_dim, csyn), jnp.float32) * 0.1
    p['affrgb_b'] = jnp.ones((1, csyn), jnp.float32)
    p['torgb_w'] = jax.random.normal(ks[9], (1, 1, csyn, img_ch), jnp.float32) * 0.1
    p['torgb_b'] = jnp.zeros((1, img_ch), jnp.float32)
    p['noise_strength0'] = jnp.float32(0.1)
    p['noise_strength1'] = jnp.float32(0.1)
    return p


def prepare_params(p, *, enc_input_hw=(16, 16)):
    """Weight-only precomputation done ONCE outside the kernels:
       * stack 3x3 taps, pack all MXU weight operands into 2 bf16 arrays,
       * pack all f32 params (const, affines, w2sum, biases) into one 32-wide
         array and one 256-wide array,
       * fold 1/(H*W) pooling into the encoder head, lane-pad toRGB,
       * precompute the per-row noise-strength scale column."""
    cin, cenc = p['enc_conv_w'].shape[2], p['enc_conv_w'].shape[3]
    csyn = p['const'].shape[-1]
    img_ch = p['torgb_w'].shape[-1]
    nS, wd = p['latent_avg'].shape[1:]
    h0, w0 = p['const'].shape[1], p['const'].shape[2]
    nSwd = nS * wd
    assert cenc == csyn, "packing scheme assumes encoder/synthesis widths match"
    assert nSwd >= RGB_PAD
    C = csyn

    # --- bf16 pack #1: 32-wide MXU weights (enc conv, conv0, conv1) ---
    rows, off, offs = [], 0, {}

    def add32(name, mat, align=True):
        nonlocal off
        if align and off % 8:
            pad = (-off) % 8
            rows.append(jnp.zeros((pad, C), jnp.float32))
            off += pad
        offs[name] = off
        rows.append(mat.astype(jnp.float32))
        off += mat.shape[0]

    add32('wk_enc', p['enc_conv_w'].reshape(9 * cin, cenc))
    add32('wk_conv0', p['conv0_w'].reshape(9 * C, C))
    add32('wk_conv1', p['conv1_w'].reshape(9 * C, C))
    wk32 = jnp.concatenate(rows, axis=0).astype(jnp.bfloat16)

    # --- bf16 pack #2: wide MXU weights (encoder head with 1/HW folded, toRGB) ---
    inv_hw = 1.0 / float(enc_input_hw[0] * enc_input_hw[1])
    torgb_w = p['torgb_w'].reshape(C, img_ch)
    torgb_w_pad = jnp.pad(torgb_w, ((0, 0), (0, RGB_PAD - img_ch)))
    wkw = jnp.concatenate([p['enc_head_w'] * inv_hw, torgb_w_pad],
                          axis=1).astype(jnp.bfloat16)
    offs['wkw_head'], offs['wkw_rgb'] = 0, nSwd

    # --- f32 pack: 32-wide params ---
    frows, foff = [], 0

    def addf(name, mat):
        nonlocal foff
        offs[name] = foff
        frows.append(mat.astype(jnp.float32))
        foff += mat.shape[0]

    addf('fp_const', p['const'].reshape(h0 * w0, C))
    addf('fp_aff0w', p['aff0_w'])
    addf('fp_aff1w', p['aff1_w'])
    addf('fp_affrgbw', p['affrgb_w'])
    addf('fp_w2s0', jnp.sum(p['conv0_w'] ** 2, axis=(0, 1)))
    addf('fp_w2s1', jnp.sum(p['conv1_w'] ** 2, axis=(0, 1)))
    addf('fp_encb', p['enc_conv_b'])
    addf('fp_b0', p['conv0_b'])
    addf('fp_b1', p['conv1_b'])
    addf('fp_aff0b', p['aff0_b'])
    addf('fp_aff1b', p['aff1_b'])
    addf('fp_affrgbb', p['affrgb_b'])
    fp = jnp.concatenate(frows, axis=0)

    # --- components of the 256-wide f32 pack (rows assembled per call) ---
    head_b_row = p['enc_head_b']                                 # (1, nSwd)
    lat_row = p['latent_avg'].reshape(1, nSwd)
    torgb_b_256 = jnp.pad(p['torgb_b'], ((0, 0), (0, nSwd - img_ch)))

    # --- noise-strength scale, folded into the noise tensor at call time ---
    n0, n1 = h0 * w0, (2 * h0) * (2 * w0)
    noise_scale_col = jnp.concatenate(
        [jnp.broadcast_to(p['noise_strength0'], (n0, 1)),
         jnp.broadcast_to(p['noise_strength1'], (n1, 1))], axis=0).astype(jnp.float32)

    cfg = dict(cin=cin, cenc=cenc, csyn=C, img_ch=img_ch, n_styles=nS, w_dim=wd,
               h0=h0, w0=w0, n_noise=n0 + n1,
               p_headb=0, p_lat=1, p_keep=2, p_inj=3, p_rgbb=4, **offs)

    return dict(wk32=wk32, wkw=wkw, fp=fp, head_b_row=head_b_row, lat_row=lat_row,
                torgb_b_256=torgb_b_256, noise_scale_col=noise_scale_col, cfg=cfg)


def _build_mask(n_styles, latent_mask, inject_latent, alpha):
    keep = jnp.ones((n_styles, 1), jnp.float32)
    inj = jnp.zeros((n_styles, 1), jnp.float32)
    for i in latent_mask:
        if inject_latent is not None:
            if alpha is not None:
                keep = keep.at[i, 0].set(1.0 - float(alpha))
                inj = inj.at[i, 0].set(float(alpha))
            else:
                keep = keep.at[i, 0].set(0.0)
                inj = inj.at[i, 0].set(1.0)
        else:
            keep = keep.at[i, 0].set(0.0)
    return keep, inj


def _build_p256(q, keep_row, inj_row, use_latent_avg):
    lat = q['lat_row'] if use_latent_avg else jnp.zeros_like(q['lat_row'])
    return jnp.concatenate([q['head_b_row'], lat, keep_row, inj_row,
                            q['torgb_b_256']], axis=0)


# ----------------------------------------------------------------------------
# pSp.forward
# ----------------------------------------------------------------------------
def psp_forward(q, x, return_latent, latent_mask=None, input_code=False,
                inject_latent=None, alpha=None, *, noise_key,
                start_from_latent_avg=True):
    cfg = q['cfg']
    nS, wd = cfg['n_styles'], cfg['w_dim']
    nSwd = nS * wd
    B = x.shape[0]

    if latent_mask is not None:
        keep, inj = _build_mask(nS, latent_mask, inject_latent, alpha)
    else:
        keep = jnp.ones((nS, 1), jnp.float32)
        inj = jnp.zeros((nS, 1), jnp.float32)
    keep_row = jnp.broadcast_to(keep, (nS, wd)).reshape(1, nSwd)
    inj_row = jnp.broadcast_to(inj, (nS, wd)).reshape(1, nSwd)
    p256 = _build_p256(q, keep_row, inj_row, start_from_latent_avg)

    inject_flat = (inject_latent.astype(jnp.float32).reshape(B, 1, nSwd)
                   if inject_latent is not None
                   else jnp.zeros((B, 1, nSwd), jnp.float32))
    # noise_mode='random': fresh Gaussian noise per call, pre-scaled by strength.
    # TODO(synk): diverges from torch's RNG stream (jax.random vs torch.randn).
    noise = (jax.random.normal(noise_key, (B, cfg['n_noise'], 1), jnp.float32)
             * q['noise_scale_col'])

    if input_code:
        # TODO(synk): codes.ndim == 2 latent-avg branch (SingleStyleCodeEncoder
        # variant) is not modeled.
        codes_in = x.astype(jnp.float32).reshape(B, 1, nSwd)
        codes_flat, img_pad = pallas_synthesize(codes_in, inject_flat, noise, p256, q)
    else:
        x_nhwc = jnp.transpose(x, (0, 2, 3, 1)).astype(jnp.float32)   # NCHW -> NHWC
        codes_flat, img_pad = pallas_encode_synthesize(x_nhwc, inject_flat, noise,
                                                       p256, q)

    codes = codes_flat.reshape(B, nS, wd)
    images = jnp.transpose(img_pad[..., :cfg['img_ch']], (0, 3, 1, 2))  # NHWC -> NCHW

    if return_latent:
        return images, codes
    return images


if __name__ == "__main__":
    key = jax.random.PRNGKey(0)
    pkey, xkey, ikey, nkey, ckey, n2key = jax.random.split(key, 6)
    raw = init_params(pkey)
    params = prepare_params(raw, enc_input_hw=(16, 16))

    B, Cin, H, W = 2, 4, 16, 16
    n_styles, w_dim = 8, 32
    x = jax.random.normal(xkey, (B, Cin, H, W), jnp.float32)
    inject = jax.random.normal(ikey, (B, n_styles, w_dim), jnp.float32)

    # Encoder path with latent-mask style mixing (alpha blend).
    images, codes = psp_forward(params, x, return_latent=True,
                                latent_mask=[0, 3], inject_latent=inject, alpha=0.6,
                                noise_key=nkey)
    jax.block_until_ready((images, codes))
    assert images.shape == (B, 3, 8, 8) and images.dtype == jnp.float32
    assert codes.shape == (B, n_styles, w_dim) and codes.dtype == jnp.float32
    assert bool(jnp.isfinite(images).all()) and bool(jnp.isfinite(codes).all())

    # input_code path (latents passed in directly, mask zeroes style 1).
    codes_in = jax.random.normal(ckey, (B, n_styles, w_dim), jnp.float32)
    images2 = psp_forward(params, codes_in, return_latent=False, input_code=True,
                          latent_mask=[1], inject_latent=None, alpha=None,
                          noise_key=n2key)
    jax.block_until_ready(images2)
    assert images2.shape == (B, 3, 8, 8)
    assert bool(jnp.isfinite(images2).all())

    print("KERNEL_OK")
</pallas_src>

<mosaic_0001>
module attributes {stable_mosaic.version = 11 : i64} {
  func.func @kernel(%arg0: i32, %arg1: memref<1x16x16x4xf32, #tpu.memory_space<vmem>>, %arg2: memref<1x1x256xf32, #tpu.memory_space<vmem>>, %arg3: memref<1x80x1xf32, #tpu.memory_space<vmem>>, %arg4: memref<616x32xbf16, #tpu.memory_space<vmem>>, %arg5: memref<32x384xbf16, #tpu.memory_space<vmem>>, %arg6: memref<182x32xf32, #tpu.memory_space<vmem>>, %arg7: memref<5x256xf32, #tpu.memory_space<vmem>>, %arg8: memref<1x1x256xf32, #tpu.memory_space<vmem>>, %arg9: memref<1x8x8x128xf32, #tpu.memory_space<vmem>>) attributes {dimension_semantics = [#tpu.dimension_semantics<parallel>], iteration_bounds = array<i64: 2>, scalar_prefetch = 0 : i64, scratch_operands = 0 : i64, tpu.core_type = #tpu.core_type<tc>, window_params = [{transform_indices = @transform_0, window_bounds = array<i64: 1, 16, 16, 4>}, {transform_indices = @transform_1, window_bounds = array<i64: 1, 1, 256>}, {transform_indices = @transform_2, window_bounds = array<i64: 1, 80, 1>}, {pipeline_mode = #tpu.pipeline_mode<synchronous>, transform_indices = @transform_3, window_bounds = array<i64: 616, 32>}, {pipeline_mode = #tpu.pipeline_mode<synchronous>, transform_indices = @transform_4, window_bounds = array<i64: 32, 384>}, {pipeline_mode = #tpu.pipeline_mode<synchronous>, transform_indices = @transform_5, window_bounds = array<i64: 182, 32>}, {pipeline_mode = #tpu.pipeline_mode<synchronous>, transform_indices = @transform_6, window_bounds = array<i64: 5, 256>}, {transform_indices = @transform_7, window_bounds = array<i64: 1, 1, 256>}, {transform_indices = @transform_8, window_bounds = array<i64: 1, 8, 8, 128>}]} {
    %c0 = arith.constant 0 : index
    %c0_0 = arith.constant 0 : index
    %c0_1 = arith.constant 0 : index
    %c0_2 = arith.constant 0 : index
    %0 = vector.load %arg1[%c0, %c0_0, %c0_1, %c0_2] : memref<1x16x16x4xf32, #tpu.memory_space<vmem>>, vector<1x16x16x4xf32>
    %1 = vector.shape_cast %0 : vector<1x16x16x4xf32> to vector<16x16x4xf32>
    %cst = arith.constant 0.000000e+00 : f32
    %2 = vector.broadcast %cst : f32 to vector<1x16x4xf32>
    %cst_3 = arith.constant 0.000000e+00 : f32
    %3 = vector.broadcast %cst_3 : f32 to vector<18x1x4xf32>
    %4 = tpu.concatenate %2, %1, %2 in 0 : vector<1x16x4xf32>, vector<16x16x4xf32>, vector<1x16x4xf32> -> vector<18x16x4xf32>
    %5 = tpu.concatenate %3, %4, %3 in 1 : vector<18x1x4xf32>, vector<18x16x4xf32>, vector<18x1x4xf32> -> vector<18x18x4xf32>
    %6 = vector.extract_strided_slice %5 {offsets = [0, 0, 0], sizes = [16, 16, 4], strides = [1, 1, 1]} : vector<18x18x4xf32> to vector<16x16x4xf32>
    %7 = vector.shape_cast %6 : vector<16x16x4xf32> to vector<256x4xf32>
    %8 = vector.extract_strided_slice %5 {offsets = [0, 1, 0], sizes = [16, 16, 4], strides = [1, 1, 1]} : vector<18x18x4xf32> to vector<16x16x4xf32>
    %9 = vector.shape_cast %8 : vector<16x16x4xf32> to vector<256x4xf32>
    %10 = vector.extract_strided_slice %5 {offsets = [0, 2, 0], sizes = [16, 16, 4], strides = [1, 1, 1]} : vector<18x18x4xf32> to vector<16x16x4xf32>
    %11 = vector.shape_cast %10 : vector<16x16x4xf32> to vector<256x4xf32>
    %12 = vector.extract_strided_slice %5 {offsets = [1, 0, 0], sizes = [16, 16, 4], strides = [1, 1, 1]} : vector<18x18x4xf32> to vector<16x16x4xf32>
    %13 = vector.shape_cast %12 : vector<16x16x4xf32> to vector<256x4xf32>
    %14 = vector.extract_strided_slice %5 {offsets = [1, 1, 0], sizes = [16, 16, 4], strides = [1, 1, 1]} : vector<18x18x4xf32> to vector<16x16x4xf32>
    %15 = vector.shape_cast %14 : vector<16x16x4xf32> to vector<256x4xf32>
    %16 = vector.extract_strided_slice %5 {offsets = [1, 2, 0], sizes = [16, 16, 4], strides = [1, 1, 1]} : vector<18x18x4xf32> to vector<16x16x4xf32>
    %17 = vector.shape_cast %16 : vector<16x16x4xf32> to vector<256x4xf32>
    %18 = vector.extract_strided_slice %5 {offsets = [2, 0, 0], sizes = [16, 16, 4], strides = [1, 1, 1]} : vector<18x18x4xf32> to vector<16x16x4xf32>
    %19 = vector.shape_cast %18 : vector<16x16x4xf32> to vector<256x4xf32>
    %20 = vector.extract_strided_slice %5 {offsets = [2, 1, 0], sizes = [16, 16, 4], strides = [1, 1, 1]} : vector<18x18x4xf32> to vector<16x16x4xf32>
    %21 = vector.shape_cast %20 : vector<16x16x4xf32> to vector<256x4xf32>
    %22 = vector.extract_strided_slice %5 {offsets = [2, 2, 0], sizes = [16, 16, 4], strides = [1, 1, 1]} : vector<18x18x4xf32> to vector<16x16x4xf32>
    %23 = vector.shape_cast %22 : vector<16x16x4xf32> to vector<256x4xf32>
    %24 = tpu.concatenate %7, %9, %11, %13, %15, %17, %19, %21, %23 in 1 : vector<256x4xf32>, vector<256x4xf32>, vector<256x4xf32>, vector<256x4xf32>, vector<256x4xf32>, vector<256x4xf32>, vector<256x4xf32>, vector<256x4xf32>, vector<256x4xf32> -> vector<256x36xf32>
    %c0_4 = arith.constant 0 : index
    %c0_5 = arith.constant 0 : index
    %25 = vector.load %arg4[%c0_4, %c0_5] : memref<616x32xbf16, #tpu.memory_space<vmem>>, vector<36x32xbf16>
    %26 = arith.truncf %24 : vector<256x36xf32> to vector<256x36xbf16>
    %cst_6 = arith.constant dense<0.000000e+00> : vector<256x32xf32>
    %27 = tpu.matmul %26, %25, %cst_6 {dimension_numbers = #tpu.dot_dimension_numbers<[1], [0], [0], [1], [0, 0, 1, 1], [], []>} : vector<256x36xbf16>, vector<36x32xbf16>, vector<256x32xf32> -> vector<256x32xf32>
    %c176 = arith.constant 176 : index
    %c0_7 = arith.constant 0 : index
    %28 = vector.load %arg6[%c176, %c0_7] : memref<182x32xf32, #tpu.memory_space<vmem>>, vector<1x32xf32>
    %29 = vector.broadcast %28 : vector<1x32xf32> to vector<256x32xf32>
    %30 = arith.addf %27, %29 : vector<256x32xf32>
    %cst_8 = arith.constant 0.000000e+00 : f32
    %31 = vector.broadcast %cst_8 : f32 to vector<256x32xf32>
    %32 = arith.maximumf %30, %31 : vector<256x32xf32>
    %cst_9 = arith.constant dense<0.000000e+00> : vector<32xf32>
    %33 = vector.multi_reduction <add>, %32, %cst_9 [0] : vector<256x32xf32> to vector<32xf32>
    %34 = vector.shape_cast %33 : vector<32xf32> to vector<1x32xf32>
    %c0_10 = arith.constant 0 : index
    %c0_11 = arith.constant 0 : index
    %35 = vector.load %arg5[%c0_10, %c0_11] : memref<32x384xbf16, #tpu.memory_space<vmem>>, vector<32x256xbf16>
    %36 = arith.truncf %34 : vector<1x32xf32> to vector<1x32xbf16>
    %cst_12 = arith.constant dense<0.000000e+00> : vector<1x256xf32>
    %37 = tpu.matmul %36, %35, %cst_12 {dimension_numbers = #tpu.dot_dimension_numbers<[1], [0], [0], [1], [0, 0, 1, 1], [], []>} : vector<1x32xbf16>, vector<32x256xbf16>, vector<1x256xf32> -> vector<1x256xf32>
    %c0_13 = arith.constant 0 : index
    %c0_14 = arith.constant 0 : index
    %38 = vector.load %arg7[%c0_13, %c0_14] : memref<5x256xf32, #tpu.memory_space<vmem>>, vector<1x256xf32>
    %39 = arith.addf %37, %38 : vector<1x256xf32>
    %c1 = arith.constant 1 : index
    %c0_15 = arith.constant 0 : index
    %40 = vector.load %arg7[%c1, %c0_15] : memref<5x256xf32, #tpu.memory_space<vmem>>, vector<1x256xf32>
    %41 = arith.addf %39, %40 : vector<1x256xf32>
    %c2 = arith.constant 2 : index
    %c0_16 = arith.constant 0 : index
    %42 = vector.load %arg7[%c2, %c0_16] : memref<5x256xf32, #tpu.memory_space<vmem>>, vector<1x256xf32>
    %43 = arith.mulf %42, %41 : vector<1x256xf32>
    %c3 = arith.constant 3 : index
    %c0_17 = arith.constant 0 : index
    %44 = vector.load %arg7[%c3, %c0_17] : memref<5x256xf32, #tpu.memory_space<vmem>>, vector<1x256xf32>
    %c0_18 = arith.constant 0 : index
    %c0_19 = arith.constant 0 : index
    %c0_20 = arith.constant 0 : index
    %45 = vector.load %arg2[%c0_18, %c0_19, %c0_20] : memref<1x1x256xf32, #tpu.memory_space<vmem>>, vector<1x1x256xf32>
    %46 = vector.shape_cast %45 : vector<1x1x256xf32> to vector<1x256xf32>
    %47 = arith.mulf %44, %46 : vector<1x256xf32>
    %48 = arith.addf %43, %47 : vector<1x256xf32>
    %c0_21 = arith.constant 0 : index
    %c0_22 = arith.constant 0 : index
    %c0_23 = arith.constant 0 : index
    %49 = vector.load %arg8[%c0_21, %c0_22, %c0_23] : memref<1x1x256xf32, #tpu.memory_space<vmem>>, vector<1x1x256xf32>
    %50 = vector.shape_cast %49 : vector<1x1x256xf32> to vector<1x256xf32>
    %51 = vector.shape_cast %48 : vector<1x256xf32> to vector<1x1x256xf32>
    tpu.vector_store %arg8[%c0_21, %c0_22, %c0_23], %51 {strides = array<i32>} : memref<1x1x256xf32, #tpu.memory_space<vmem>>, vector<1x1x256xf32>,
    %c0_24 = arith.constant 0 : index
    %c0_25 = arith.constant 0 : index
    %52 = vector.load %arg6[%c0_24, %c0_25] : memref<182x32xf32, #tpu.memory_space<vmem>>, vector<16x32xf32>
    %53 = vector.shape_cast %52 : vector<16x32xf32> to vector<4x4x32xf32>
    %c0_26 = arith.constant 0 : index
    %c0_27 = arith.constant 0 : index
    %c0_28 = arith.constant 0 : index
    %54 = vector.load %arg3[%c0_26, %c0_27, %c0_28] : memref<1x80x1xf32, #tpu.memory_space<vmem>>, vector<1x16x1xf32>
    %55 = vector.shape_cast %54 : vector<1x16x1xf32> to vector<16x1xf32>
    %c0_29 = arith.constant 0 : index
    %c16 = arith.constant 16 : index
    %c0_30 = arith.constant 0 : index
    %56 = vector.load %arg3[%c0_29, %c16, %c0_30] : memref<1x80x1xf32, #tpu.memory_space<vmem>>, vector<1x64x1xf32>
    %57 = vector.shape_cast %56 : vector<1x64x1xf32> to vector<64x1xf32>
    %58 = vector.extract_strided_slice %48 {offsets = [0, 0], sizes = [1, 32], strides = [1, 1]} : vector<1x256xf32> to vector<1x32xf32>
    %c16_31 = arith.constant 16 : index
    %c0_32 = arith.constant 0 : index
    %59 = vector.load %arg6[%c16_31, %c0_32] : memref<182x32xf32, #tpu.memory_space<vmem>>, vector<32x32xf32>
    %cst_33 = arith.constant dense<0.000000e+00> : vector<1x32xf32>
    %60 = tpu.matmul %58, %59, %cst_33 {dimension_numbers = #tpu.dot_dimension_numbers<[1], [0], [0], [1], [0, 0, 1, 1], [], []>} : vector<1x32xf32>, vector<32x32xf32>, vector<1x32xf32> -> vector<1x32xf32>
    %c179 = arith.constant 179 : index
    %c0_34 = arith.constant 0 : index
    %61 = vector.load %arg6[%c179, %c0_34] : memref<182x32xf32, #tpu.memory_space<vmem>>, vector<1x32xf32>
    %62 = arith.addf %60, %61 : vector<1x32xf32>
    %63 = vector.shape_cast %62 : vector<1x32xf32> to vector<1x1x32xf32>
    %64 = vector.broadcast %63 : vector<1x1x32xf32> to vector<4x4x32xf32>
    %65 = arith.mulf %53, %64 : vector<4x4x32xf32>
    %cst_35 = arith.constant 0.000000e+00 : f32
    %66 = vector.broadcast %cst_35 : f32 to vector<1x4x32xf32>
    %cst_36 = arith.constant 0.000000e+00 : f32
    %67 = vector.broadcast %cst_36 : f32 to vector<6x1x32xf32>
    %68 = tpu.concatenate %66, %65, %66 in 0 : vector<1x4x32xf32>, vector<4x4x32xf32>, vector<1x4x32xf32> -> vector<6x4x32xf32>
    %69 = tpu.concatenate %67, %68, %67 in 1 : vector<6x1x32xf32>, vector<6x4x32xf32>, vector<6x1x32xf32> -> vector<6x6x32xf32>
    %70 = vector.extract_strided_slice %69 {offsets = [0, 0, 0], sizes = [4, 4, 32], strides = [1, 1, 1]} : vector<6x6x32xf32> to vector<4x4x32xf32>
    %71 = vector.shape_cast %70 : vector<4x4x32xf32> to vector<16x32xf32>
    %72 = vector.extract_strided_slice %69 {offsets = [0, 1, 0], sizes = [4, 4, 32], strides = [1, 1, 1]} : vector<6x6x32xf32> to vector<4x4x32xf32>
    %73 = vector.shape_cast %72 : vector<4x4x32xf32> to vector<16x32xf32>
    %74 = vector.extract_strided_slice %69 {offsets = [0, 2, 0], sizes = [4, 4, 32], strides = [1, 1, 1]} : vector<6x6x32xf32> to vector<4x4x32xf32>
    %75 = vector.shape_cast %74 : vector<4x4x32xf32> to vector<16x32xf32>
    %76 = vector.extract_strided_slice %69 {offsets = [1, 0, 0], sizes = [4, 4, 32], strides = [1, 1, 1]} : vector<6x6x32xf32> to vector<4x4x32xf32>
    %77 = vector.shape_cast %76 : vector<4x4x32xf32> to vector<16x32xf32>
    %78 = vector.extract_strided_slice %69 {offsets = [1, 1, 0], sizes = [4, 4, 32], strides = [1, 1, 1]} : vector<6x6x32xf32> to vector<4x4x32xf32>
    %79 = vector.shape_cast %78 : vector<4x4x32xf32> to vector<16x32xf32>
    %80 = vector.extract_strided_slice %69 {offsets = [1, 2, 0], sizes = [4, 4, 32], strides = [1, 1, 1]} : vector<6x6x32xf32> to vector<4x4x32xf32>
    %81 = vector.shape_cast %80 : vector<4x4x32xf32> to vector<16x32xf32>
    %82 = vector.extract_strided_slice %69 {offsets = [2, 0, 0], sizes = [4, 4, 32], strides = [1, 1, 1]} : vector<6x6x32xf32> to vector<4x4x32xf32>
    %83 = vector.shape_cast %82 : vector<4x4x32xf32> to vector<16x32xf32>
    %84 = vector.extract_strided_slice %69 {offsets = [2, 1, 0], sizes = [4, 4, 32], strides = [1, 1, 1]} : vector<6x6x32xf32> to vector<4x4x32xf32>
    %85 = vector.shape_cast %84 : vector<4x4x32xf32> to vector<16x32xf32>
    %86 = vector.extract_strided_slice %69 {offsets = [2, 2, 0], sizes = [4, 4, 32], strides = [1, 1, 1]} : vector<6x6x32xf32> to vector<4x4x32xf32>
    %87 = vector.shape_cast %86 : vector<4x4x32xf32> to vector<16x32xf32>
    %88 = tpu.concatenate %71, %73, %75, %77, %79, %81, %83, %85, %87 in 1 : vector<16x32xf32>, vector<16x32xf32>, vector<16x32xf32>, vector<16x32xf32>, vector<16x32xf32>, vector<16x32xf32>, vector<16x32xf32>, vector<16x32xf32>, vector<16x32xf32> -> vector<16x288xf32>
    %c40 = arith.constant 40 : index
    %c0_37 = arith.constant 0 : index
    %89 = vector.load %arg4[%c40, %c0_37] : memref<616x32xbf16, #tpu.memory_space<vmem>>, vector<288x32xbf16>
    %90 = arith.truncf %88 : vector<16x288xf32> to vector<16x288xbf16>
    %cst_38 = arith.constant dense<0.000000e+00> : vector<16x32xf32>
    %91 = tpu.matmul %90, %89, %cst_38 {dimension_numbers = #tpu.dot_dimension_numbers<[1], [0], [0], [1], [0, 0, 1, 1], [], []>} : vector<16x288xbf16>, vector<288x32xbf16>, vector<16x32xf32> -> vector<16x32xf32>
    %c112 = arith.constant 112 : index
    %c0_39 = arith.constant 0 : index
    %92 = vector.load %arg6[%c112, %c0_39] : memref<182x32xf32, #tpu.memory_space<vmem>>, vector<32x32xf32>
    %93 = arith.mulf %62, %62 : vector<1x32xf32>
    %cst_40 = arith.constant dense<0.000000e+00> : vector<1x32xf32>
    %94 = tpu.matmul %93, %92, %cst_40 {dimension_numbers = #tpu.dot_dimension_numbers<[1], [0], [0], [1], [0, 0, 1, 1], [], []>} : vector<1x32xf32>, vector<32x32xf32>, vector<1x32xf32> -> vector<1x32xf32>
    %cst_41 = arith.constant 9.99999993E-9 : f32
    %95 = vector.broadcast %cst_41 : f32 to vector<1x32xf32>
    %96 = arith.addf %94, %95 : vector<1x32xf32>
    %97 = math.rsqrt %96 : vector<1x32xf32>
    %98 = vector.broadcast %97 : vector<1x32xf32> to vector<16x32xf32>
    %99 = arith.mulf %91, %98 : vector<16x32xf32>
    %100 = vector.broadcast %55 : vector<16x1xf32> to vector<16x32xf32>
    %101 = arith.addf %99, %100 : vector<16x32xf32>
    %c177 = arith.constant 177 : index
    %c0_42 = arith.constant 0 : index
    %102 = vector.load %arg6[%c177, %c0_42] : memref<182x32xf32, #tpu.memory_space<vmem>>, vector<1x32xf32>
    %103 = vector.broadcast %102 : vector<1x32xf32> to vector<16x32xf32>
    %104 = arith.addf %101, %103 : vector<16x32xf32>
    %cst_43 = arith.constant 0.000000e+00 : f32
    %105 = vector.broadcast %cst_43 : f32 to vector<16x32xf32>
    %106 = arith.cmpf oge, %104, %105 : vector<16x32xf32>
    %cst_44 = arith.constant 2.000000e-01 : f32
    %107 = vector.broadcast %cst_44 : f32 to vector<16x32xf32>
    %108 = arith.mulf %107, %104 : vector<16x32xf32>
    %109 = arith.select %106, %104, %108 : vector<16x32xi1>, vector<16x32xf32>
    %cst_45 = arith.constant 1.41421354 : f32
    %110 = vector.broadcast %cst_45 : f32 to vector<16x32xf32>
    %111 = arith.mulf %109, %110 : vector<16x32xf32>
    %112 = vector.shape_cast %111 : vector<16x32xf32> to vector<4x4x32xf32>
    %113 = vector.shape_cast %112 : vector<4x4x32xf32> to vector<4x1x4x32xf32>
    %114 = vector.shape_cast %113 : vector<4x1x4x32xf32> to vector<4x1x4x32xf32>
    %115 = vector.broadcast %114 : vector<4x1x4x32xf32> to vector<4x2x4x32xf32>
    %116 = vector.shape_cast %115 : vector<4x2x4x32xf32> to vector<8x4x32xf32>
    %117 = vector.shape_cast %116 : vector<8x4x32xf32> to vector<8x4x1x32xf32>
    %118 = vector.shape_cast %117 : vector<8x4x1x32xf32> to vector<8x4x1x32xf32>
    %119 = vector.broadcast %118 : vector<8x4x1x32xf32> to vector<8x4x2x32xf32>
    %120 = vector.shape_cast %119 : vector<8x4x2x32xf32> to vector<8x8x32xf32>
    %121 = vector.extract_strided_slice %48 {offsets = [0, 32], sizes = [1, 32], strides = [1, 1]} : vector<1x256xf32> to vector<1x32xf32>
    %c48 = arith.constant 48 : index
    %c0_46 = arith.constant 0 : index
    %122 = vector.load %arg6[%c48, %c0_46] : memref<182x32xf32, #tpu.memory_space<vmem>>, vector<32x32xf32>
    %cst_47 = arith.constant dense<0.000000e+00> : vector<1x32xf32>
    %123 = tpu.matmul %121, %122, %cst_47 {dimension_numbers = #tpu.dot_dimension_numbers<[1], [0], [0], [1], [0, 0, 1, 1], [], []>} : vector<1x32xf32>, vector<32x32xf32>, vector<1x32xf32> -> vector<1x32xf32>
    %c180 = arith.constant 180 : index
    %c0_48 = arith.constant 0 : index
    %124 = vector.load %arg6[%c180, %c0_48] : memref<182x32xf32, #tpu.memory_space<vmem>>, vector<1x32xf32>
    %125 = arith.addf %123, %124 : vector<1x32xf32>
    %126 = vector.shape_cast %125 : vector<1x32xf32> to vector<1x1x32xf32>
    %127 = vector.broadcast %126 : vector<1x1x32xf32> to vector<8x8x32xf32>
    %128 = arith.mulf %120, %127 : vector<8x8x32xf32>
    %cst_49 = arith.constant 0.000000e+00 : f32
    %129 = vector.broadcast %cst_49 : f32 to vector<1x8x32xf32>
    %cst_50 = arith.constant 0.000000e+00 : f32
    %130 = vector.broadcast %cst_50 : f32 to vector<10x1x32xf32>
    %131 = tpu.concatenate %129, %128, %129 in 0 : vector<1x8x32xf32>, vector<8x8x32xf32>, vector<1x8x32xf32> -> vector<10x8x32xf32>
    %132 = tpu.concatenate %130, %131, %130 in 1 : vector<10x1x32xf32>, vector<10x8x32xf32>, vector<10x1x32xf32> -> vector<10x10x32xf32>
    %133 = vector.extract_strided_slice %132 {offsets = [0, 0, 0], sizes = [8, 8, 32], strides = [1, 1, 1]} : vector<10x10x32xf32> to vector<8x8x32xf32>
    %134 = vector.shape_cast %133 : vector<8x8x32xf32> to vector<64x32xf32>
    %135 = vector.extract_strided_slice %132 {offsets = [0, 1, 0], sizes = [8, 8, 32], strides = [1, 1, 1]} : vector<10x10x32xf32> to vector<8x8x32xf32>
    %136 = vector.shape_cast %135 : vector<8x8x32xf32> to vector<64x32xf32>
    %137 = vector.extract_strided_slice %132 {offsets = [0, 2, 0], sizes = [8, 8, 32], strides = [1, 1, 1]} : vector<10x10x32xf32> to vector<8x8x32xf32>
    %138 = vector.shape_cast %137 : vector<8x8x32xf32> to vector<64x32xf32>
    %139 = vector.extract_strided_slice %132 {offsets = [1, 0, 0], sizes = [8, 8, 32], strides = [1, 1, 1]} : vector<10x10x32xf32> to vector<8x8x32xf32>
    %140 = vector.shape_cast %139 : vector<8x8x32xf32> to vector<64x32xf32>
    %141 = vector.extract_strided_slice %132 {offsets = [1, 1, 0], sizes = [8, 8, 32], strides = [1, 1, 1]} : vector<10x10x32xf32> to vector<8x8x32xf32>
    %142 = vector.shape_cast %141 : vector<8x8x32xf32> to vector<64x32xf32>
    %143 = vector.extract_strided_slice %132 {offsets = [1, 2, 0], sizes = [8, 8, 32], strides = [1, 1, 1]} : vector<10x10x32xf32> to vector<8x8x32xf32>
    %144 = vector.shape_cast %143 : vector<8x8x32xf32> to vector<64x32xf32>
    %145 = vector.extract_strided_slice %132 {offsets = [2, 0, 0], sizes = [8, 8, 32], strides = [1, 1, 1]} : vector<10x10x32xf32> to vector<8x8x32xf32>
    %146 = vector.shape_cast %145 : vector<8x8x32xf32> to vector<64x32xf32>
    %147 = vector.extract_strided_slice %132 {offsets = [2, 1, 0], sizes = [8, 8, 32], strides = [1, 1, 1]} : vector<10x10x32xf32> to vector<8x8x32xf32>
    %148 = vector.shape_cast %147 : vector<8x8x32xf32> to vector<64x32xf32>
    %149 = vector.extract_strided_slice %132 {offsets = [2, 2, 0], sizes = [8, 8, 32], strides = [1, 1, 1]} : vector<10x10x32xf32> to vector<8x8x32xf32>
    %150 = vector.shape_cast %149 : vector<8x8x32xf32> to vector<64x32xf32>
    %151 = tpu.concatenate %134, %136, %138, %140, %142, %144, %146, %148, %150 in 1 : vector<64x32xf32>, vector<64x32xf32>, vector<64x32xf32>, vector<64x32xf32>, vector<64x32xf32>, vector<64x32xf32>, vector<64x32xf32>, vector<64x32xf32>, vector<64x32xf32> -> vector<64x288xf32>
    %c328 = arith.constant 328 : index
    %c0_51 = arith.constant 0 : index
    %152 = vector.load %arg4[%c328, %c0_51] : memref<616x32xbf16, #tpu.memory_space<vmem>>, vector<288x32xbf16>
    %153 = arith.truncf %151 : vector<64x288xf32> to vector<64x288xbf16>
    %cst_52 = arith.constant dense<0.000000e+00> : vector<64x32xf32>
    %154 = tpu.matmul %153, %152, %cst_52 {dimension_numbers = #tpu.dot_dimension_numbers<[1], [0], [0], [1], [0, 0, 1, 1], [], []>} : vector<64x288xbf16>, vector<288x32xbf16>, vector<64x32xf32> -> vector<64x32xf32>
    %c144 = arith.constant 144 : index
    %c0_53 = arith.constant 0 : index
    %155 = vector.load %arg6[%c144, %c0_53] : memref<182x32xf32, #tpu.memory_space<vmem>>, vector<32x32xf32>
    %156 = arith.mulf %125, %125 : vector<1x32xf32>
    %cst_54 = arith.constant dense<0.000000e+00> : vector<1x32xf32>
    %157 = tpu.matmul %156, %155, %cst_54 {dimension_numbers = #tpu.dot_dimension_numbers<[1], [0], [0], [1], [0, 0, 1, 1], [], []>} : vector<1x32xf32>, vector<32x32xf32>, vector<1x32xf32> -> vector<1x32xf32>
    %cst_55 = arith.constant 9.99999993E-9 : f32
    %158 = vector.broadcast %cst_55 : f32 to vector<1x32xf32>
    %159 = arith.addf %157, %158 : vector<1x32xf32>
    %160 = math.rsqrt %159 : vector<1x32xf32>
    %161 = vector.broadcast %160 : vector<1x32xf32> to vector<64x32xf32>
    %162 = arith.mulf %154, %161 : vector<64x32xf32>
    %163 = vector.broadcast %57 : vector<64x1xf32> to vector<64x32xf32>
    %164 = arith.addf %162, %163 : vector<64x32xf32>
    %c178 = arith.constant 178 : index
    %c0_56 = arith.constant 0 : index
    %165 = vector.load %arg6[%c178, %c0_56] : memref<182x32xf32, #tpu.memory_space<vmem>>, vector<1x32xf32>
    %166 = vector.broadcast %165 : vector<1x32xf32> to vector<64x32xf32>
    %167 = arith.addf %164, %166 : vector<64x32xf32>
    %cst_57 = arith.constant 0.000000e+00 : f32
    %168 = vector.broadcast %cst_57 : f32 to vector<64x32xf32>
    %169 = arith.cmpf oge, %167, %168 : vector<64x32xf32>
    %cst_58 = arith.constant 2.000000e-01 : f32
    %170 = vector.broadcast %cst_58 : f32 to vector<64x32xf32>
    %171 = arith.mulf %170, %167 : vector<64x32xf32>
    %172 = arith.select %169, %167, %171 : vector<64x32xi1>, vector<64x32xf32>
    %cst_59 = arith.constant 1.41421354 : f32
    %173 = vector.broadcast %cst_59 : f32 to vector<64x32xf32>
    %174 = arith.mulf %172, %173 : vector<64x32xf32>
    %175 = vector.extract_strided_slice %48 {offsets = [0, 64], sizes = [1, 32], strides = [1, 1]} : vector<1x256xf32> to vector<1x32xf32>
    %c80 = arith.constant 80 : index
    %c0_60 = arith.constant 0 : index
    %176 = vector.load %arg6[%c80, %c0_60] : memref<182x32xf32, #tpu.memory_space<vmem>>, vector<32x32xf32>
    %cst_61 = arith.constant dense<0.000000e+00> : vector<1x32xf32>
    %177 = tpu.matmul %175, %176, %cst_61 {dimension_numbers = #tpu.dot_dimension_numbers<[1], [0], [0], [1], [0, 0, 1, 1], [], []>} : vector<1x32xf32>, vector<32x32xf32>, vector<1x32xf32> -> vector<1x32xf32>
    %c181 = arith.constant 181 : index
    %c0_62 = arith.constant 0 : index
    %178 = vector.load %arg6[%c181, %c0_62] : memref<182x32xf32, #tpu.memory_space<vmem>>, vector<1x32xf32>
    %179 = arith.addf %177, %178 : vector<1x32xf32>
    %c0_63 = arith.constant 0 : index
    %c256 = arith.constant 256 : index
    %180 = vector.load %arg5[%c0_63, %c256] : memref<32x384xbf16, #tpu.memory_space<vmem>>, vector<32x128xbf16>
    %181 = vector.broadcast %179 : vector<1x32xf32> to vector<64x32xf32>
    %182 = arith.mulf %174, %181 : vector<64x32xf32>
    %183 = arith.truncf %182 : vector<64x32xf32> to vector<64x32xbf16>
    %cst_64 = arith.constant dense<0.000000e+00> : vector<64x128xf32>
    %184 = tpu.matmul %183, %180, %cst_64 {dimension_numbers = #tpu.dot_dimension_numbers<[1], [0], [0], [1], [0, 0, 1, 1], [], []>} : vector<64x32xbf16>, vector<32x128xbf16>, vector<64x128xf32> -> vector<64x128xf32>
    %c4 = arith.constant 4 : index
    %c0_65 = arith.constant 0 : index
    %185 = vector.load %arg7[%c4, %c0_65] : memref<5x256xf32, #tpu.memory_space<vmem>>, vector<1x128xf32>
    %186 = vector.broadcast %185 : vector<1x128xf32> to vector<64x128xf32>
    %187 = arith.addf %184, %186 : vector<64x128xf32>
    %188 = vector.shape_cast %187 : vector<64x128xf32> to vector<8x8x128xf32>
    %c0_66 = arith.constant 0 : index
    %c0_67 = arith.constant 0 : index
    %c0_68 = arith.constant 0 : index
    %c0_69 = arith.constant 0 : index
    %189 = vector.load %arg9[%c0_66, %c0_67, %c0_68, %c0_69] : memref<1x8x8x128xf32, #tpu.memory_space<vmem>>, vector<1x8x8x128xf32>
    %190 = vector.shape_cast %189 : vector<1x8x8x128xf32> to vector<8x8x128xf32>
    %191 = vector.shape_cast %188 : vector<8x8x128xf32> to vector<1x8x8x128xf32>
    tpu.vector_store %arg9[%c0_66, %c0_67, %c0_68, %c0_69], %191 {strides = array<i32>} : memref<1x8x8x128xf32, #tpu.memory_space<vmem>>, vector<1x8x8x128xf32>,
    return
  }
  func.func @transform_0(%arg0: i32) -> (i32, i32, i32, i32) {
    %c0_i32 = arith.constant 0 : i32
    %c0_i32_0 = arith.constant 0 : i32
    %c0_i32_1 = arith.constant 0 : i32
    %c0_i32_2 = arith.constant 0 : i32
    return %arg0, %c0_i32, %c0_i32_0, %c0_i32_1 : i32, i32, i32, i32
  }
  func.func @transform_1(%arg0: i32) -> (i32, i32, i32) {
    %c0_i32 = arith.constant 0 : i32
    %c0_i32_0 = arith.constant 0 : i32
    %c0_i32_1 = arith.constant 0 : i32
    return %arg0, %c0_i32, %c0_i32_0 : i32, i32, i32
  }
  func.func @transform_2(%arg0: i32) -> (i32, i32, i32) {
    %c0_i32 = arith.constant 0 : i32
    %c0_i32_0 = arith.constant 0 : i32
    %c0_i32_1 = arith.constant 0 : i32
    return %arg0, %c0_i32, %c0_i32_0 : i32, i32, i32
  }
  func.func @transform_3(%arg0: i32) -> (i32, i32) {
    %c0_i32 = arith.constant 0 : i32
    %c0_i32_0 = arith.constant 0 : i32
    %c0_i32_1 = arith.constant 0 : i32
    return %c0_i32, %c0_i32_0 : i32, i32
  }
  func.func @transform_4(%arg0: i32) -> (i32, i32) {
    %c0_i32 = arith.constant 0 : i32
    %c0_i32_0 = arith.constant 0 : i32
    %c0_i32_1 = arith.constant 0 : i32
    return %c0_i32, %c0_i32_0 : i32, i32
  }
  func.func @transform_5(%arg0: i32) -> (i32, i32) {
    %c0_i32 = arith.constant 0 : i32
    %c0_i32_0 = arith.constant 0 : i32
    %c0_i32_1 = arith.constant 0 : i32
    return %c0_i32, %c0_i32_0 : i32, i32
  }
  func.func @transform_6(%arg0: i32) -> (i32, i32) {
    %c0_i32 = arith.constant 0 : i32
    %c0_i32_0 = arith.constant 0 : i32
    %c0_i32_1 = arith.constant 0 : i32
    return %c0_i32, %c0_i32_0 : i32, i32
  }
  func.func @transform_7(%arg0: i32) -> (i32, i32, i32) {
    %c0_i32 = arith.constant 0 : i32
    %c0_i32_0 = arith.constant 0 : i32
    %c0_i32_1 = arith.constant 0 : i32
    return %arg0, %c0_i32, %c0_i32_0 : i32, i32, i32
  }
  func.func @transform_8(%arg0: i32) -> (i32, i32, i32, i32) {
    %c0_i32 = arith.constant 0 : i32
    %c0_i32_0 = arith.constant 0 : i32
    %c0_i32_1 = arith.constant 0 : i32
    %c0_i32_2 = arith.constant 0 : i32
    return %arg0, %c0_i32, %c0_i32_0, %c0_i32_1 : i32, i32, i32, i32
  }
}

</mosaic_0001>

<bundles_post_ra>
// kernel: tpu_custom_call.1
= control target key start
LH: loop header
LB: loop body
LE: loop exit
PB: predicated region body
PF: predicated region fallthrough
CT: control target
= control target key end

     0   :  { %s7655_s0 = inlined_call_operand.vmem [shape: f32[2,16,16,4], index: 0, kind: input, shape index: {}]   ;;  %s7656_s1 = inlined_call_operand.vmem [shape: f32[2,1,256], index: 1, kind: input, shape index: {}]   ;;  %s7657_s2 = inlined_call_operand.vmem [shape: f32[2,80,1], index: 2, kind: input, shape index: {}]   ;;  %s7658_s3 = inlined_call_operand.vmem [shape: bf16[616,32], index: 3, kind: input, shape index: {}]   ;;  %s7659_s4 = inlined_call_operand.vmem [shape: bf16[32,384], index: 4, kind: input, shape index: {}]   ;;  %s7660_s5 = inlined_call_operand.vmem [shape: f32[182,32], index: 5, kind: input, shape index: {}]   ;;  %s7661_s6 = inlined_call_operand.vmem [shape: f32[5,256], index: 6, kind: input, shape index: {}]   ;;  %s7662_s7 = inlined_call_operand.hbm [shape: f32[2,1,256], index: 7, kind: output, shape index: {0}]   ;;  %s7663_s8 = inlined_call_operand.hbm [shape: f32[2,8,8,128], index: 8, kind: output, shape index: {1}]  }
   0x1   :  { %7677 = sst [smem:[#allocation8_spill]] %s7655_s0 }
   0x2   :  { %14 = vsyncpa [#allocation3], 0 }
   0x3   :  { %16 = vsyncpa [#allocation3 + $0x1], 0 }
   0x4   :  { %17 = vsyncpa [#allocation5], 0 }
   0x5   :  { %19 = vsyncpa [#allocation5 + $0x1], 0  ;;  %s5675_s27 = smov 0   ;;  %s5677_s28 = smov 0  }
   0x6   :  { %s5679_s29 = smov 0   ;;  %s5681_s30 = smov 0  }
   0x7 LB: > { %s5696_s9 = sadd.s32 4294967295, %s5609_s30   ;;  %s4269_s10 = sadd.s32 4294967294, %s5609_s30   ;;  %s5609_s30 = sphi %s5681_s30, %s7699_s30   ;;  %s5605_s29 = sphi %s5679_s29, %s7698_s29   ;;  %s5601_s28 = sphi %s5677_s28, %s7697_s28   ;;  %s5597_s27 = sphi %s5675_s27, %s7696_s27  }
   0x8   : > { %s5700_s11 = sadd.s32 1, %s5609_s30   ;;  %s194_s12 = sadd.s32 1, %s5605_s29 }
   0x9   : > { %s191_s13 = ssub.s32 %s5609_s30, %s5700_s11  ;;  %p204_p0 = scmp.ne.s32.totalorder %s5605_s29, %s5601_s28 }
   0xa   : > { %p192_p1 = scmp.eq.s32.totalorder %s191_s13, 0  ;;  %p205_p2 = scmp.eq.s32.totalorder %s5696_s9, 1 }
   0xb   : > { %p210_p3 = scmp.ne.s32.totalorder %s5601_s28, %s5597_s27  ;;  %p211_p4 = scmp.eq.s32.totalorder %s4269_s10, 1 }
   0xc   : > { %s5711_s14 = scalar_select %p192_p1, %s5605_s29, %s194_s12  }
   0xd   : > { %p5713_p5 = por %p205_p2, %p204_p0  ;;  %p5717_p6 = por %p211_p4, %p210_p3 }
   0xe   : > { %p4272_p7 = scmp.ge.s32.totalorder %s5609_s30, 1  ;;  %p290_p8 = scmp.lt.s32.totalorder %s5609_s30, 3 }
  0x10   : > { %p291_p9 = pnand %p4272_p7, %p290_p8 }
  0x11   : > { %vm418_vm0 = vcmask (!%p291_p9), 1040384   ;;  %v7668_v0 = vmov (!%p291_p9), 0.0   ;;  %p338_p10 = scmp.lt.s32.totalorder (!%p291_p9), %s5696_s9, 1  ;;  %vm665_vm1 = vcmask (!%p291_p9), 1045504   ;;  %vm584_vm2 = vcmask (!%p291_p9), 1046528   ;;  %s7680_s0 = sld [smem:[#allocation8_spill]] (!%p291_p9) }
  0x12   : > { %294 = sbr.rel (%p291_p9) target bundleno = 2144 (0x860), region = 48  ;;  %v5724_v1 = vrot.slane (!%p291_p9), %v7668_v0, 7  ;;  %s7670_s22 = smov (!%p291_p9), 8   ;;  %v5462_v62 = vld [vmem:[%s7658_s3] sm:$0xff] (!%p291_p9)   ;;  %vm1880_vm3 = vcmask (!%p291_p9), 1041408   ;;  %vm1526_vm4 = vcmask (!%p291_p9), 31744  }
  0x13   : > { %s5613_s23 = smov (!%p291_p9), 4   ;;  %s5614_s24 = smov (!%p291_p9), 12   ;;  %4503 = vmatprep.subr.bf16.mxu0 (!%p291_p9), %v5462_v62  ;;  %vm1559_vm5 = vcmask (!%p291_p9), 64512   ;;  %vm1592_vm6 = vcmask (!%p291_p9), 97280   ;;  %vm1625_vm7 = vcmask (!%p291_p9), 130048   ;;  %vm1658_vm8 = vcmask (!%p291_p9), 162816  }
  0x14   : > { %v5729_v2 = vsel (!%p291_p9), %vm418_vm0, 0.0, %v5724_v1  ;;  %v5733_v3 = vsel (!%p291_p9), %vm418_vm0, %v5724_v1, 0.0  ;;  %v667_v4 = vrot.slane (!%p291_p9), %v5724_v1, 2  ;;  %v586_v5 = vrot.slane (!%p291_p9), %v5724_v1, 1  ;;  %s5615_s10 = smov (!%p291_p9), 16   ;;  %4504 = vmatpush3.bf16.msra.mxu0 (!%p291_p9), %v5462_v62  ;;  %s5617_s19 = smov (!%p291_p9), 24  }
  0x15   : > { %v7664_v6 = vrot.slane (!%p291_p9), %v5729_v2, 2  ;;  %v7665_v7 = vrot.slane (!%p291_p9), %v5733_v3, 2  ;;  %v7666_v8 = vrot.slane (!%p291_p9), %v5729_v2, 1  ;;  %v7667_v9 = vrot.slane (!%p291_p9), %v5733_v3, 1  ;;  %s5618_s20 = smov (!%p291_p9), 28   ;;  %s7671_s25 = smov (!%p291_p9), 32  }
  0x16   : > { %vm1691_vm9 = vcmask (!%p291_p9), 195584   ;;  %vm1724_vm10 = vcmask (!%p291_p9), 228352   ;;  %vm1757_vm11 = vcmask (!%p291_p9), 261120   ;;  %vm1831_vm12 = vcmask (!%p291_p9), 293888   ;;  %s6952_s26 = sand.u32 (!%p291_p9), 1, %s5601_s28   ;;  %s7688_s12 = smov (!%p291_p9), 32  }
  0x17   : > { %v668_v10 = vsel (!%p291_p9), %vm665_vm1, %v7664_v6, %v667_v4  ;;  %v670_v11 = vsel (!%p291_p9), %vm665_vm1, %v667_v4, %v7665_v7  ;;  %v587_v12 = vsel (!%p291_p9), %vm584_vm2, %v7666_v8, %v586_v5  ;;  %v589_v13 = vsel (!%p291_p9), %vm584_vm2, %v586_v5, %v7667_v9  ;;  %s7673_s13 = smov (!%p291_p9), 96  }
  0x18   : > { %v5762_v14 = vpack.i.bf16 (!%p291_p9), %v670_v11, %v668_v10  ;;  %v5764_v15 = vpack.i.bf16 (!%p291_p9), %v589_v13, %v587_v12  ;;  %v5463_v11 = vld [vmem:[%s7658_s3 + $0x8] sm:$0xff] (!%p291_p9)   ;;  %vm5622_vm13 = vmmov (!%p291_p9), 0   ;;  %vm2393_vm15 = vcmask (!%p291_p9), 1044480  }
  0x19   : > { %s5738_s17 = scalar_select %p338_p10, %s5696_s9, 1  ;;  %4505 = vmatprep.subr.bf16.mxu0 %v5463_v11 }
  0x1a   : > { %4731 = vrot.lane.b32.xlu1 %v5762_v14, %s7670_s22  ;;  %4726 = vrot.lane.b32.xlu0 %v5764_v15, %s5613_s23 }
  0x1b   : > { %s4379_s18 = sshll.u32 %s5738_s17, 8  ;;  %4506 = vmatpush3.bf16.msra.mxu0 %v5463_v11 }
  0x1c   : > { %s5760_s21 = scalar_lea.vmem %s7680_s0, %s4379_s18  ;;  %s5616_s18 = smov 20  }
  0x1d   : > { %v355_v16 = vld [vmem:[%s5760_s21 + $0x10] sm:$0xff]  ;;  %v356_v17 = vld [vmem:[%s5760_s21 + $0x18] sm:$0xff]  ;;  %v353_v18 = vld [vmem:[%s5760_s21] sm:$0xff]  ;;  %s7694_s0 = smov 96  }
  0x1e   : > { %v424_v19 = vrot.slane %v355_v16, 7  ;;  %v425_v20 = vrot.slane %v356_v17, 7  ;;  %v354_v21 = vld [vmem:[%s5760_s21 + $0x8] sm:$0xff]  ;;  %v421_v22 = vrot.slane %v353_v18, 7  ;;  %v357_v23 = vld [vmem:[%s5760_s21 + $0x20] sm:$0xff]  ;;  %v6096_v7 = vld [vmem:[%s5760_s21 + $0xb0] sm:$0xff] }
  0x1f   : > { %v358_v24 = vld [vmem:[%s5760_s21 + $0x28] sm:$0xff]  ;;  %v422_v25 = vrot.slane %v354_v21, 7  ;;  %v427_v26 = vrot.slane %v357_v23, 7  ;;  %v359_v21 = vld [vmem:[%s5760_s21 + $0x30] sm:$0xff] }
  0x20   : > { %v428_v27 = vrot.slane %v358_v24, 7  ;;  %v5777_v28 = vsel %vm418_vm0, %v424_v19, %v425_v20  ;;  %v5780_v29 = vsel %vm418_vm0, 0.0, %v424_v19  ;;  %v5783_v30 = vsel %vm418_vm0, 0.0, %v421_v22 }
  0x21   : > { %v537_v31 = vsel %vm418_vm0, %v425_v20, 0.0  ;;  %v4740_v32 = vpack.i.bf16 %v5777_v28, %v5780_v29  ;;  %v5789_v33 = vsel %vm418_vm0, %v421_v22, %v422_v25  ;;  %v536_v34 = vsel %vm418_vm0, %v422_v25, 0.0  ;;  %v360_v22 = vld [vmem:[%s5760_s21 + $0x38] sm:$0xff] }
  0x22   : > { %v671_v35 = vrot.slane %v5783_v30, 2  ;;  %v4735_v36 = vpack.i.bf16 %v5789_v33, %v5783_v30  ;;  %v672_v37 = vrot.slane %v5789_v33, 2  ;;  %v674_v38 = vrot.slane %v536_v34, 2 }
  0x23   : > { %v590_v39 = vrot.slane %v5783_v30, 1  ;;  %4741 = vrot.lane.b32.xlu1 %v4740_v32, %s5614_s24  ;;  %v591_v40 = vrot.slane %v5789_v33, 1  ;;  %v593_v41 = vrot.slane %v536_v34, 1  ;;  %v595_v42 = vrot.slane %v5780_v29, 1 }
  0x24   : > { %v596_v43 = vrot.slane %v5777_v28, 1  ;;  %4736 = vrot.lane.b32.xlu0 %v4735_v36, %s5614_s24  ;;  %v673_v44 = vsel %vm665_vm1, %v671_v35, %v672_v37  ;;  %v675_v45 = vsel %vm665_vm1, %v672_v37, %v674_v38  ;;  %v598_v46 = vrot.slane %v537_v31, 1  ;;  %v361_v36 = vld [vmem:[%s5760_s21 + $0x40] sm:$0xff] }
  0x25   : > { %v676_v47 = vrot.slane %v5780_v29, 2  ;;  %v4750_v48 = vpack.i.bf16 %v675_v45, %v673_v44  ;;  %v592_v49 = vsel %vm584_vm2, %v590_v39, %v591_v40  ;;  %v594_v50 = vsel %vm584_vm2, %v591_v40, %v593_v41  ;;  %v362_v41 = vld [vmem:[%s5760_s21 + $0x48] sm:$0xff] }
  0x26   : > { %v597_v51 = vsel %vm584_vm2, %v595_v42, %v596_v43  ;;  %v4745_v52 = vpack.i.bf16 %v594_v50, %v592_v49  ;;  %v599_v53 = vsel %vm584_vm2, %v596_v43, %v598_v46  ;;  %v677_v54 = vrot.slane %v5777_v28, 2 }
  0x27   : > { %4751 = vrot.lane.b32.xlu1 %v4750_v48, %s7670_s22  ;;  %v4760_v55 = vpack.i.bf16 %v599_v53, %v597_v51  ;;  %v679_v56 = vrot.slane %v537_v31, 2  ;;  %v5814_v58 = vsel %vm418_vm0, 0.0, %v427_v26  ;;  %v5818_v60 = vsel %vm418_vm0, %v427_v26, %v428_v27 }
  0x28   : > { %4746 = vrot.lane.b32.xlu0 %v4745_v52, %s5613_s23  ;;  %v678_v57 = vsel %vm665_vm1, %v676_v47, %v677_v54  ;;  %v538_v61 = vsel %vm418_vm0, %v428_v27, 0.0  ;;  %v600_v4 = vrot.slane %v5814_v58, 1  ;;  %v601_v5 = vrot.slane %v5818_v60, 1 }
  0x29   : > { %v680_v59 = vsel %vm665_vm1, %v677_v54, %v679_v56  ;;  %v603_v10 = vrot.slane %v538_v61, 1  ;;  %v4780_v12 = vpack.i.bf16 %v5818_v60, %v5814_v58  ;;  %v681_v18 = vrot.slane %v5814_v58, 2 }
  0x2a   : > { %v4770_v63 = vpack.i.bf16 %v680_v59, %v678_v57  ;;  %v602_v13 = vsel %vm584_vm2, %v600_v4, %v601_v5  ;;  %v682_v19 = vrot.slane %v5818_v60, 2  ;;  %v684_v20 = vrot.slane %v538_v61, 2 }
  0x2b   : > { %4761 = vrot.lane.b32.xlu1 %v4760_v55, %s5615_s10  ;;  %v604_v16 = vsel %vm584_vm2, %v601_v5, %v603_v10  ;;  %v430_v23 = vrot.slane %v359_v21, 7  ;;  %v431_v26 = vrot.slane %v360_v22, 7  ;;  %v433_v44 = vrot.slane %v361_v36, 7 }
  0x2c   : > { %4756 = vrot.lane.b32.xlu0 %v4745_v52, %s5615_s10  ;;  %v4790_v17 = vpack.i.bf16 %v604_v16, %v602_v13  ;;  %v683_v24 = vsel %vm665_vm1, %v681_v18, %v682_v19  ;;  %v685_v25 = vsel %vm665_vm1, %v682_v19, %v684_v20  ;;  %v434_v47 = vrot.slane %v362_v41, 7  ;;  %v364_v13 = vld [vmem:[%s5760_s21 + $0x58] sm:$0xff] }
  0x2d   : > { %v4805_v27 = vpack.i.bf16 %v685_v25, %v683_v24  ;;  %v5850_v31 = vsel %vm418_vm0, 0.0, %v430_v23  ;;  %v539_v34 = vsel %vm418_vm0, %v431_v26, 0.0  ;;  %v5875_v51 = vsel %vm418_vm0, 0.0, %v433_v44 }
  0x2e   : > { %v605_v35 = vrot.slane %v5850_v31, 1  ;;  %v608_v38 = vrot.slane %v539_v34, 1  ;;  %v686_v39 = vrot.slane %v5850_v31, 2  ;;  %v689_v43 = vrot.slane %v539_v34, 2  ;;  %v365_v34 = vld [vmem:[%s5760_s21 + $0x60] sm:$0xff] }
  0x2f   : > { %4771 = vrot.lane.b32.xlu1 %v4770_v63, %s5616_s18  ;;  %v5878_v52 = vsel %vm418_vm0, %v433_v44, %v434_v47  ;;  %v540_v53 = vsel %vm418_vm0, %v434_v47, 0.0  ;;  %v691_v5 = vrot.slane %v5875_v51, 2  ;;  %v437_v20 = vrot.slane %v364_v13, 7 }
  0x30   : > { %4766 = vrot.lane.b32.xlu0 %v4750_v48, %s5616_s18  ;;  %v611_v56 = vrot.slane %v5878_v52, 1  ;;  %v613_v57 = vrot.slane %v540_v53, 1  ;;  %v4860_v59 = vpack.i.bf16 %v5878_v52, %v5875_v51  ;;  %v692_v10 = vrot.slane %v5878_v52, 2 }
  0x31   : > { %v694_v11 = vrot.slane %v540_v53, 2  ;;  %v541_v24 = vsel %vm418_vm0, %v437_v20, 0.0 }
  0x32   : > { %v614_v62 = vsel %vm584_vm2, %v611_v56, %v613_v57  ;;  %v699_v41 = vrot.slane %v541_v24, 2 }
  0x33   : > { %4781 = vrot.lane.b32.xlu1 %v4780_v12, %s5617_s19  ;;  %v695_v18 = vsel %vm665_vm1, %v692_v10, %v694_v11 }
  0x34   : > { %4776 = vrot.lane.b32.xlu0 %v4740_v32, %s5617_s19  ;;  %v5853_v32 = vsel %vm418_vm0, %v430_v23, %v431_v26 }
  0x35   : > { %v606_v37 = vrot.slane %v5853_v32, 1  ;;  %v687_v40 = vrot.slane %v5853_v32, 2  ;;  %v4830_v42 = vpack.i.bf16 %v5853_v32, %v5850_v31 }
  0x37   : > { %4791 = vrot.lane.b32.xlu1 %v4790_v17, %s5618_s20  ;;  %v607_v45 = vsel %vm584_vm2, %v605_v35, %v606_v37  ;;  %v609_v46 = vsel %vm584_vm2, %v606_v37, %v608_v38  ;;  %v688_v49 = vsel %vm665_vm1, %v686_v39, %v687_v40  ;;  %v690_v50 = vsel %vm665_vm1, %v687_v40, %v689_v43  ;;  %v366_v35 = vld [vmem:[%s5760_s21 + $0x68] sm:$0xff] }
  0x38   : > { %4786 = vrot.lane.b32.xlu0 %v4760_v55, %s5618_s20  ;;  %v4840_v48 = vpack.i.bf16 %v609_v46, %v607_v45  ;;  %v4850_v54 = vpack.i.bf16 %v690_v50, %v688_v49  ;;  %v440_v43 = vrot.slane %v366_v35, 7 }
  0x3a   : > { %v542_v49 = vsel %vm418_vm0, %v440_v43, 0.0 }
  0x3b   : > { %4801 = vrot.lane.b32.xlu1 %v4760_v55, %s5613_s23  ;;  %v610_v55 = vrot.slane %v5875_v51, 1 }
  0x3c   : > { %4796 = vrot.lane.b32.xlu0 %v4770_v63, %s7671_s25 }
  0x3d   : > { %v612_v61 = vsel %vm584_vm2, %v610_v55, %v611_v56  ;;  %v623_v55 = vrot.slane %v542_v49, 1 }
  0x3e   : > { %v4870_v4 = vpack.i.bf16 %v614_v62, %v612_v61 }
  0x3f   : > { %4811 = vrot.lane.b32.xlu1 %v4790_v17, %s5613_s23 }
  0x40   : > { %4806 = vrot.lane.b32.xlu0 %v4805_v27, %s7671_s25 }
  0x43   : > { %4821 = vrot.lane.b32.xlu1 %v4805_v27, %s7670_s22 }
  0x44   : > { %4816 = vrot.lane.b32.xlu0 %v4770_v63, %s7670_s22  ;;  %v5464_v63 = vld [vmem:[%s7658_s3 + $0x10] ss:$0 sps:$4 sm:$0x33]  }
  0x45   : > { %4662 = vmatprep.subr.msk.bf16.mxu0 %vm1880_vm3, %v5464_v63  ;;  %v1882_v16 = vsel %vm1880_vm3, %v5464_v63, 0 }
  0x46   : > { %4508 = vmatpush3.bf16.msra.mxu0 %v1882_v16 }
  0x47   : > { %4831 = vrot.lane.b32.xlu1 %v4830_v42, %s5614_s24 }
  0x48   : > { %4826 = vrot.lane.b32.xlu0 %v4780_v12, %s5614_s24  ;;  %v363_v12 = vld [vmem:[%s5760_s21 + $0x50] sm:$0xff] }
  0x49   : > { %v436_v19 = vrot.slane %v363_v12, 7 }
  0x4b   : > { %4841 = vrot.lane.b32.xlu1 %v4840_v48, %s5615_s10  ;;  %v5909_v22 = vsel %vm418_vm0, %v436_v19, %v437_v20  ;;  %v5912_v23 = vsel %vm418_vm0, 0.0, %v436_v19 }
  0x4c   : > { %4836 = vrot.lane.b32.xlu0 %v4790_v17, %s5615_s10  ;;  %v693_v17 = vsel %vm665_vm1, %v691_v5, %v692_v10  ;;  %v615_v25 = vrot.slane %v5912_v23, 1  ;;  %v616_v26 = vrot.slane %v5909_v22, 1  ;;  %v4910_v36 = vpack.i.bf16 %v5909_v22, %v5912_v23  ;;  %v367_v5 = vld [vmem:[%s5760_s21 + $0x70] sm:$0xff]  ;;  %v368_v10 = vld [vmem:[%s5760_s21 + $0x78] sm:$0xff] }
  0x4d   : > { %v4885_v21 = vpack.i.bf16 %v695_v18, %v693_v17  ;;  %v696_v37 = vrot.slane %v5912_v23, 2  ;;  %v697_v40 = vrot.slane %v5909_v22, 2  ;;  %v442_v13 = vrot.slane %v367_v5, 7 }
  0x4e   : > { %v617_v38 = vsel %vm584_vm2, %v615_v25, %v616_v26  ;;  %v443_v16 = vrot.slane %v368_v10, 7 }
  0x4f   : > { %4851 = vrot.lane.b32.xlu1 %v4850_v54, %s5616_s18  ;;  %v698_v45 = vsel %vm665_vm1, %v696_v37, %v697_v40  ;;  %v700_v46 = vsel %vm665_vm1, %v697_v40, %v699_v41  ;;  %v5966_v19 = vsel %vm418_vm0, 0.0, %v442_v13 }
  0x50   : > { %4846 = vrot.lane.b32.xlu0 %v4805_v27, %s5616_s18  ;;  %v618_v27 = vrot.slane %v541_v24, 1  ;;  %v4930_v50 = vpack.i.bf16 %v700_v46, %v698_v45  ;;  %v5963_v18 = vsel %vm418_vm0, %v442_v13, %v443_v16  ;;  %v543_v20 = vsel %vm418_vm0, %v443_v16, 0.0 }
  0x51   : > { %v626_v24 = vrot.slane %v5963_v18, 1  ;;  %v628_v25 = vrot.slane %v543_v20, 1  ;;  %v706_v35 = vrot.slane %v5966_v19, 2 }
  0x52   : > { %v619_v39 = vsel %vm584_vm2, %v616_v26, %v618_v27  ;;  %v369_v26 = vld [vmem:[%s5760_s21 + $0x80] sm:$0xff]  ;;  %v370_v27 = vld [vmem:[%s5760_s21 + $0x88] sm:$0xff] }
  0x53   : > { %4861 = vrot.lane.b32.xlu1 %v4860_v59, %s5617_s19  ;;  %v4920_v44 = vpack.i.bf16 %v619_v39, %v617_v38  ;;  %v629_v37 = vsel %vm584_vm2, %v626_v24, %v628_v25  ;;  %v707_v38 = vrot.slane %v5963_v18, 2  ;;  %v709_v39 = vrot.slane %v543_v20, 2 }
  0x54   : > { %4856 = vrot.lane.b32.xlu0 %v4830_v42, %s5617_s19  ;;  %v439_v42 = vrot.slane %v365_v34, 7  ;;  %v4990_v34 = vpack.i.bf16 %v5963_v18, %v5966_v19  ;;  %v445_v40 = vrot.slane %v369_v26, 7  ;;  %v446_v41 = vrot.slane %v370_v27, 7 }
  0x56   : > { %v5934_v47 = vsel %vm418_vm0, %v439_v42, %v440_v43  ;;  %v708_v43 = vsel %vm665_vm1, %v706_v35, %v707_v38  ;;  %v5988_v45 = vsel %vm418_vm0, %v445_v40, %v446_v41  ;;  %v5991_v46 = vsel %vm418_vm0, 0.0, %v445_v40 }
  0x57   : > { %4871 = vrot.lane.b32.xlu1 %v4870_v4, %s5618_s20  ;;  %v702_v63 = vrot.slane %v5934_v47, 2  ;;  %v711_v10 = vrot.slane %v5991_v46, 2 }
  0x58   : > { %4866 = vrot.lane.b32.xlu0 %v4840_v48, %s5618_s20 }
  0x5b   : > { %4881 = vrot.lane.b32.xlu1 %v4840_v48, %s5613_s23  ;;  %v5937_v48 = vsel %vm418_vm0, 0.0, %v439_v42 }
  0x5c   : > { %4876 = vrot.lane.b32.xlu0 %v4850_v54, %s7671_s25  ;;  %v620_v53 = vrot.slane %v5937_v48, 1  ;;  %v4940_v56 = vpack.i.bf16 %v5934_v47, %v5937_v48  ;;  %v701_v62 = vrot.slane %v5937_v48, 2 }
  0x5e   : > { %v703_v11 = vsel %vm665_vm1, %v701_v62, %v702_v63 }
  0x5f   : > { %4891 = vrot.lane.b32.xlu1 %v4870_v4, %s5613_s23 }
  0x60   : > { %4886 = vrot.lane.b32.xlu0 %v4885_v21, %s7671_s25 }
  0x63   : > { %4901 = vrot.lane.b32.xlu1 %v4885_v21, %s7670_s22 }
  0x64   : > { %4896 = vrot.lane.b32.xlu0 %v4850_v54, %s7670_s22  ;;  %v621_v54 = vrot.slane %v5934_v47, 1 }
  0x66   : > { %v622_v57 = vsel %vm584_vm2, %v620_v53, %v621_v54  ;;  %v630_v53 = vrot.slane %v5991_v46, 1 }
  0x67   : > { %4911 = vrot.lane.b32.xlu1 %v4910_v36, %s5614_s24 }
  0x68   : > { %4906 = vrot.lane.b32.xlu0 %v4860_v59, %s5614_s24  ;;  %v624_v59 = vsel %vm584_vm2, %v621_v54, %v623_v55  ;;  %v631_v54 = vrot.slane %v5988_v45, 1 }
  0x69   : > { %v4950_v61 = vpack.i.bf16 %v624_v59, %v622_v57 }
  0x6a   : > { %v632_v57 = vsel %vm584_vm2, %v630_v53, %v631_v54 }
  0x6b   : > { %4921 = vrot.lane.b32.xlu1 %v4920_v44, %s5615_s10 }
  0x6c   : > { %4916 = vrot.lane.b32.xlu0 %v4870_v4, %s5615_s10  ;;  %v704_v4 = vrot.slane %v542_v49, 2  ;;  %v544_v49 = vsel %vm418_vm0, %v446_v41, 0.0 }
  0x6d   : > { %v633_v55 = vrot.slane %v544_v49, 1 }
  0x6e   : > { %v705_v12 = vsel %vm665_vm1, %v702_v63, %v704_v4  ;;  %v371_v63 = vld [vmem:[%s5760_s21 + $0x90] sm:$0xff]  ;;  %v372_v4 = vld [vmem:[%s5760_s21 + $0x98] sm:$0xff] }
  0x6f   : > { %4931 = vrot.lane.b32.xlu1 %v4930_v50, %s5616_s18  ;;  %v4965_v17 = vpack.i.bf16 %v705_v12, %v703_v11  ;;  %v634_v59 = vsel %vm584_vm2, %v631_v54, %v633_v55  ;;  %v712_v11 = vrot.slane %v5988_v45, 2  ;;  %v448_v12 = vrot.slane %v371_v63, 7 }
  0x70   : > { %4926 = vrot.lane.b32.xlu0 %v4885_v21, %s5616_s18  ;;  %v625_v21 = vrot.slane %v5966_v19, 1  ;;  %v6017_v5 = vpack.i.bf16 %v634_v59, %v632_v57  ;;  %v449_v13 = vrot.slane %v372_v4, 7 }
  0x71   : > { %v713_v25 = vsel %vm665_vm1, %v711_v10, %v712_v11  ;;  %v6036_v27 = vsel %vm418_vm0, 0.0, %v448_v12 }
  0x72   : > { %v6033_v26 = vsel %vm418_vm0, %v448_v12, %v449_v13  ;;  %v635_v40 = vrot.slane %v6036_v27, 1  ;;  %v716_v59 = vrot.slane %v6036_v27, 2 }
  0x73   : > { %4941 = vrot.lane.b32.xlu1 %v4940_v56, %s5617_s19  ;;  %v636_v41 = vrot.slane %v6033_v26, 1  ;;  %v717_v63 = vrot.slane %v6033_v26, 2 }
  0x74   : > { %4936 = vrot.lane.b32.xlu0 %v4910_v36, %s5617_s19  ;;  %v627_v36 = vsel %vm584_vm2, %v625_v21, %v626_v24  ;;  %v373_v21 = vld [vmem:[%s5760_s21 + $0xa0] sm:$0xff]  ;;  %v374_v24 = vld [vmem:[%s5760_s21 + $0xa8] sm:$0xff] }
  0x75   : > { %v5000_v42 = vpack.i.bf16 %v629_v37, %v627_v36  ;;  %v545_v36 = vsel %vm418_vm0, %v449_v13, 0.0  ;;  %v451_v37 = vrot.slane %v373_v21, 7  ;;  %v637_v57 = vsel %vm584_vm2, %v635_v40, %v636_v41 }
  0x76   : > { %v719_v4 = vrot.slane %v545_v36, 2 }
  0x77   : > { %4951 = vrot.lane.b32.xlu1 %v4950_v61, %s5618_s20  ;;  %v6055_v54 = vsel %vm418_vm0, 0.0, %v451_v37 }
  0x78   : > { %4946 = vrot.lane.b32.xlu0 %v4920_v44, %s5618_s20  ;;  %v720_v40 = vsel %vm665_vm1, %v717_v63, %v719_v4 }
  0x7b   : > { %4961 = vrot.lane.b32.xlu1 %v4920_v44, %s5613_s23  ;;  %v710_v44 = vsel %vm665_vm1, %v707_v38, %v709_v39  ;;  %v452_v38 = vrot.slane %v374_v24, 7 }
  0x7c   : > { %4956 = vrot.lane.b32.xlu0 %v4930_v50, %s7671_s25 }
  0x7d   : > { %v6052_v53 = vsel %vm418_vm0, %v451_v37, %v452_v38  ;;  %v6081_v37 = vpack.i.bf16 %v6033_v26, %v6036_v27 }
  0x7e   : > { %v641_v12 = vrot.slane %v6052_v53, 1 }
  0x7f   : > { %4971 = vrot.lane.b32.xlu1 %v4950_v61, %s5613_s23 }
  0x80   : > { %4966 = vrot.lane.b32.xlu0 %v4965_v17, %s7671_s25 }
  0x83   : > { %4981 = vrot.lane.b32.xlu1 %v4965_v17, %s7670_s22 }
  0x84   : > { %4976 = vrot.lane.b32.xlu0 %v4930_v50, %s7670_s22  ;;  %v5995_v50 = vpack.i.bf16 %v710_v44, %v708_v43  ;;  %v638_v44 = vrot.slane %v545_v36, 1 }
  0x86   : > { %v639_v10 = vsel %vm584_vm2, %v636_v41, %v638_v44 }
  0x87   : > { %4991 = vrot.lane.b32.xlu1 %v4990_v34, %s5614_s24 }
  0x88   : > { %4986 = vrot.lane.b32.xlu0 %v4940_v56, %s5614_s24  ;;  %v6004_v56 = vpack.i.bf16 %v5988_v45, %v5991_v46 }
  0x8b   : > { %5001 = vrot.lane.b32.xlu1 %v5000_v42, %s5615_s10 }
  0x8c   : > { %4996 = vrot.lane.b32.xlu0 %v4950_v61, %s5615_s10  ;;  %v6009_v61 = vpop.permute.xlu1 %4731  ;;  %v6011_v62 = vpop.permute.xlu0 %4726 }
  0x8d   : > { %v4728_v21 = vunpack.i.l.bf16 %v6011_v62  ;;  %v4734_v41 = vunpack.i.h.bf16 %v6009_v61 }
  0x8f   : > { %5011 = vrot.lane.b32.xlu1 %v5995_v50, %s5616_s18 }
  0x90   : > { %5006 = vrot.lane.b32.xlu0 %v4965_v17, %s5616_s18  ;;  %v714_v17 = vrot.slane %v544_v49, 2 }
  0x92   : > { %v715_v35 = vsel %vm665_vm1, %v712_v11, %v714_v17  ;;  %v640_v11 = vrot.slane %v6055_v54, 1  ;;  %v4729_v17 = vunpack.i.h.bf16 %v6011_v62  ;;  %v718_v62 = vsel %vm665_vm1, %v716_v59, %v717_v63 }
  0x93   : > { %5021 = vrot.lane.b32.xlu1 %v6004_v56, %s5617_s19  ;;  %v6047_v43 = vpack.i.bf16 %v715_v35, %v713_v25  ;;  %v1527_v59 = vsel %vm1526_vm4, %v5729_v2, %v4728_v21 }
  0x94   : > { %5016 = vrot.lane.b32.xlu0 %v4990_v34, %s5617_s19  ;;  %v642_v44 = vsel %vm584_vm2, %v640_v11, %v641_v12 }
  0x95   : > { %v6022_v16 = vpop.permute.xlu1 %4741 }
  0x96   : > { %v6024_v20 = vpop.permute.xlu0 %4736 }
  0x97   : > { %5031 = vrot.lane.b32.xlu1 %v6017_v5, %s5618_s20 }
  0x98   : > { %5026 = vrot.lane.b32.xlu0 %v5000_v42, %s5618_s20 }
  0x99   : > { %v6038_v34 = vpop.permute.xlu1 %4751 }
  0x9a   : > { %v4747_v39 = vpop.permute.xlu0 %4746  ;;  %v4754_v63 = vunpack.i.h.bf16 %v6038_v34 }
  0x9b   : > { %5041 = vrot.lane.b32.xlu1 %v5000_v42, %s5613_s23  ;;  %v6058_v42 = vsel %vm418_vm0, %v452_v38, 0.0  ;;  %v4749_v25 = vunpack.i.h.bf16 %v4747_v39  ;;  %v4748_v35 = vunpack.i.l.bf16 %v4747_v39  ;;  %v6085_v38 = vpack.i.bf16 %v639_v10, %v637_v57 }
  0x9c   : > { %5036 = vrot.lane.b32.xlu0 %v5995_v50, %s7671_s25  ;;  %v643_v13 = vrot.slane %v6058_v42, 1  ;;  %v4733_v39 = vunpack.i.l.bf16 %v6009_v61  ;;  %v1528_v57 = vsel %vm1526_vm4, %v5724_v1, %v4729_v17  ;;  %v4753_v61 = vunpack.i.l.bf16 %v6038_v34 }
  0x9d   : > { %v6049_v49 = vpop.permute.xlu1 %4761  ;;  %v4738_v10 = vunpack.i.l.bf16 %v6024_v20  ;;  %v1530_v11 = vsel %vm1526_vm4, %v5789_v33, %v4749_v25  ;;  %v6114_v17 = vpack.i.bf16 %v720_v40, %v718_v62  ;;  %v6118_v34 = vpack.i.bf16 %v6052_v53, %v6055_v54 }
  0x9e   : > { %v6060_v55 = vpop.permute.xlu0 %4756  ;;  %v644_v6 = vsel %vm584_vm2, %v641_v12, %v643_v13  ;;  %v1529_v12 = vsel %vm1526_vm4, %v5783_v30, %v4748_v35  ;;  %v4744_v33 = vunpack.i.h.bf16 %v6022_v16  ;;  %v4743_v25 = vunpack.i.l.bf16 %v6022_v16 }
  0x9f   : > { %5051 = vrot.lane.b32.xlu1 %v6017_v5, %s5613_s23  ;;  %v6120_v21 = vpack.i.bf16 %v644_v6, %v642_v44  ;;  %v1560_v30 = vsel %vm1559_vm5, %v1527_v59, %v4733_v39  ;;  %v1561_v35 = vsel %vm1559_vm5, %v1528_v57, %v4734_v41  ;;  %v1563_v62 = vsel %vm1559_vm5, %v1530_v11, %v4754_v63 }
  0xa0   : > { %5046 = vrot.lane.b32.xlu0 %v6047_v43, %s7671_s25  ;;  %v1562_v40 = vsel %vm1559_vm5, %v1529_v12, %v4753_v61  ;;  %v4759_v6 = vunpack.i.h.bf16 %v6060_v55  ;;  %v4758_v44 = vunpack.i.l.bf16 %v6060_v55  ;;  %v1593_v16 = vsel %vm1592_vm6, %v1560_v30, %v4738_v10 }
  0xa1   : > { %v6075_v24 = vpop.permute.xlu1 %4771  ;;  %v4763_v59 = vunpack.i.l.bf16 %v6049_v49  ;;  %v1595_v55 = vsel %vm1592_vm6, %v1562_v40, %v4743_v25 }
  0xa2   : > { %v6077_v36 = vpop.permute.xlu0 %4766  ;;  %v1626_v12 = vsel %vm1625_vm7, %v1593_v16, %v4758_v44 }
  0xa3   : > { %5061 = vrot.lane.b32.xlu1 %v6047_v43, %s7670_s22  ;;  %v4769_v39 = vunpack.i.h.bf16 %v6077_v36  ;;  %v4768_v41 = vunpack.i.l.bf16 %v6077_v36 }
  0xa4   : > { %5056 = vrot.lane.b32.xlu0 %v5995_v50, %s7670_s22  ;;  %v4739_v50 = vunpack.i.h.bf16 %v6024_v20  ;;  %v454_v20 = vrot.slane %v6096_v7, 7 }
  0xa5   : > { %v6104_v4 = vpop.permute.xlu1 %4781  ;;  %v1659_v25 = vsel %vm1658_vm8, %v1626_v12, %v4768_v41  ;;  %v1628_v41 = vsel %vm1625_vm7, %v1595_v55, %v4763_v59 }
  0xa6   : > { %v4777_v13 = vpop.permute.xlu0 %4776  ;;  %v1594_v9 = vsel %vm1592_vm6, %v1561_v35, %v4739_v50  ;;  %v1596_v50 = vsel %vm1592_vm6, %v1563_v62, %v4744_v33  ;;  %v4784_v35 = vunpack.i.h.bf16 %v6104_v4  ;;  %v4783_v62 = vunpack.i.l.bf16 %v6104_v4 }
  0xa7   : > { %5071 = vrot.lane.b32.xlu1 %v6081_v37, %s5614_s24  ;;  %v4779_v63 = vunpack.i.h.bf16 %v4777_v13  ;;  %v4778_v61 = vunpack.i.l.bf16 %v4777_v13  ;;  %v1627_v36 = vsel %vm1625_vm7, %v1594_v9, %v4759_v6  ;;  %v4773_v13 = vunpack.i.l.bf16 %v6075_v24  ;;  %v376_v6 = vld [vmem:[%s5760_s21 + $0xb8] sm:$0xff] }
  0xa8   : > { %5066 = vrot.lane.b32.xlu0 %v6004_v56, %s5614_s24  ;;  %v4764_v56 = vunpack.i.h.bf16 %v6049_v49  ;;  %v4774_v49 = vunpack.i.h.bf16 %v6075_v24  ;;  %v1660_v33 = vsel %vm1658_vm8, %v1627_v36, %v4769_v39 }
  0xa9   : > { %v4792_v8 = vpop.permute.xlu1 %4791  ;;  %v1692_v9 = vsel %vm1691_vm9, %v1659_v25, %v4778_v61  ;;  %v1693_v24 = vsel %vm1691_vm9, %v1660_v33, %v4779_v63  ;;  %v1661_v25 = vsel %vm1658_vm8, %v1628_v41, %v4773_v13 }
  0xaa   : > { %v4787_v57 = vpop.permute.xlu0 %4786  ;;  %v4794_v44 = vunpack.i.h.bf16 %v4792_v8  ;;  %v4793_v16 = vunpack.i.l.bf16 %v4792_v8  ;;  %v1629_v36 = vsel %vm1625_vm7, %v1596_v50, %v4764_v56 }
  0xab   : > { %5081 = vrot.lane.b32.xlu1 %v6085_v38, %s5615_s10  ;;  %v4789_v11 = vunpack.i.h.bf16 %v4787_v57  ;;  %v4788_v10 = vunpack.i.l.bf16 %v4787_v57  ;;  %v1662_v8 = vsel %vm1658_vm8, %v1629_v36, %v4774_v49  ;;  %v721_v49 = vrot.slane %v6055_v54, 2 }
  0xac   : > { %5076 = vrot.lane.b32.xlu0 %v6017_v5, %s5615_s10  ;;  %v1695_v59 = vsel %vm1691_vm9, %v1662_v8, %v4784_v35 }
  0xad   : > { %v6149_v30 = vpop.permute.xlu1 %4801  ;;  %v1725_v39 = vsel %vm1724_vm10, %v1692_v9, %v4788_v10  ;;  %v1726_v4 = vsel %vm1724_vm10, %v1693_v24, %v4789_v11  ;;  %v1694_v11 = vsel %vm1691_vm9, %v1661_v25, %v4783_v62  ;;  %v1728_v10 = vsel %vm1724_vm10, %v1695_v59, %v4794_v44  ;;  %v377_v9 = vld [vmem:[%s5760_s21 + $0xc0] sm:$0xff]  ;;  %v378_v24 = vld [vmem:[%s5760_s21 + $0xc8] sm:$0xff] }
  0xae   : > { %v4797_v5 = vpop.permute.xlu0 %4796  ;;  %v1727_v50 = vsel %vm1724_vm10, %v1694_v11, %v4793_v16  ;;  %v6202_v16 = vsel %vm418_vm0, 0.0, %v454_v20 }
  0xaf   : > { %v4799_v40 = vunpack.i.h.bf16 %v4797_v5  ;;  %v4798_v57 = vunpack.i.l.bf16 %v4797_v5  ;;  %5091 = vrot.lane.b32.xlu1 %v6114_v17, %s5616_s18  ;;  %v455_v5 = vrot.slane %v376_v6, 7  ;;  %v645_v7 = vrot.slane %v6202_v16, 1 }
  0xb0   : > { %5086 = vrot.lane.b32.xlu0 %v6047_v43, %s5616_s18 }
  0xb1   : > { %v6166_v12 = vpop.permute.xlu1 %4811  ;;  %v1758_v61 = vsel %vm1757_vm11, %v1725_v39, %v4798_v57  ;;  %v1759_v63 = vsel %vm1757_vm11, %v1726_v4, %v4799_v40  ;;  %v722_v40 = vrot.slane %v6052_v53, 2  ;;  %v724_v57 = vrot.slane %v6058_v42, 2 }
  0xb2   : > { %v4807_v33 = vpop.permute.xlu0 %4806  ;;  %v1795_v43 = vpack.c.bf16 %v1759_v63, %v1758_v61  ;;  %v547_v42 = vsel %vm418_vm0, %v455_v5, 0.0  ;;  %v457_v39 = vrot.slane %v377_v9, 7  ;;  %v458_v4 = vrot.slane %v378_v24, 7 }
  0xb3   : > { %v4809_v56 = vunpack.i.h.bf16 %v4807_v33  ;;  %v4808_v55 = vunpack.i.l.bf16 %v4807_v33  ;;  %5101 = vrot.lane.b32.xlu1 %v6118_v34, %s5617_s19  ;;  %v723_v36 = vsel %vm665_vm1, %v721_v49, %v722_v40  ;;  %v725_v61 = vsel %vm665_vm1, %v722_v40, %v724_v57 }
  0xb4   : > { %5096 = vrot.lane.b32.xlu0 %v6081_v37, %s5617_s19  ;;  %4509 = vmatprep.mubr.msk.bf16.mxu0 %vm1831_vm12, %v1795_v43  ;;  %v6197_v37 = vsel %vm418_vm0, %v454_v20, %v455_v5  ;;  %v648_v25 = vrot.slane %v547_v42, 1  ;;  %v6220_v8 = vpack.i.bf16 %v725_v61, %v723_v36  ;;  %v6223_v33 = vsel %vm418_vm0, %v457_v39, %v458_v4 }
  0xb5   : > { %v1760_v13 = vsel %vm1757_vm11, %v1727_v50, %v4808_v55  ;;  %v1761_v35 = vsel %vm1757_vm11, %v1728_v10, %v4809_v56  ;;  %v6184_v62 = vpop.permute.xlu1 %4821  ;;  %v646_v20 = vrot.slane %v6197_v37, 1  ;;  %v6226_v43 = vsel %vm418_vm0, 0.0, %v457_v39 }
  0xb6   : > { %v6190_v6 = vpop.permute.xlu0 %4816  ;;  %v1796_v44 = vpack.c.bf16 %v1761_v35, %v1760_v13  ;;  %v6229_v5 = vsel %vm418_vm0, %v458_v4, 0.0  ;;  %v726_v56 = vrot.slane %v6202_v16, 2  ;;  %v727_v55 = vrot.slane %v6197_v37, 2 }
  0xb7   : > { %5111 = vrot.lane.b32.xlu1 %v6120_v21, %s5618_s20  ;;  %v729_v50 = vrot.slane %v547_v42, 2  ;;  %v649_v10 = vsel %vm584_vm2, %v646_v20, %v648_v25  ;;  %v650_v49 = vrot.slane %v6226_v43, 1  ;;  %v651_v13 = vrot.slane %v6223_v33, 1 }
  0xb8   : > { %5106 = vrot.lane.b32.xlu0 %v6085_v38, %s5618_s20  ;;  %4510 = vmatmul.mubr.msk.bf16.vlgmr.msra.gmra.mrb[0].mxu0 %vm1831_vm12, %v1796_v44  ;;  %v653_v35 = vrot.slane %v6229_v5, 1  ;;  %v6250_v57 = vpack.i.bf16 %v6197_v37, %v6202_v16  ;;  %v728_v44 = vsel %vm665_vm1, %v726_v56, %v727_v55  ;;  %v4814_v39 = vunpack.i.h.bf16 %v6166_v12 }
  0xb9   : > { %v6208_v41 = vpop.permute.xlu1 %4831  ;;  %v730_v42 = vsel %vm665_vm1, %v727_v55, %v729_v50  ;;  %v4813_v4 = vunpack.i.l.bf16 %v6166_v12  ;;  %v652_v36 = vsel %vm584_vm2, %v650_v49, %v651_v13  ;;  %v4803_v25 = vunpack.i.l.bf16 %v6149_v30 }
  0xba   : > { %v6212_v63 = vpop.permute.xlu0 %4826  ;;  %v654_v61 = vsel %vm584_vm2, %v651_v13, %v653_v35  ;;  %v4823_v56 = vunpack.i.l.bf16 %v6184_v62  ;;  %v4819_v12 = vunpack.i.h.bf16 %v6190_v6  ;;  %v4818_v55 = vunpack.i.l.bf16 %v6190_v6 }
  0xbb   : > { %5121 = vrot.lane.b32.xlu1 %v6085_v38, %s5613_s23  ;;  %v647_v38 = vsel %vm584_vm2, %v645_v7, %v646_v20  ;;  %v6265_v7 = vld [vmem:[%s5760_s21 + $0xd0] sm:$0xff]  ;;  %v4804_v20 = vunpack.i.h.bf16 %v6149_v30  ;;  %v6281_v49 = vpack.i.bf16 %v6223_v33, %v6226_v43  ;;  %v4834_v30 = vunpack.i.h.bf16 %v6208_v41 }
  0xbc   : > { %5116 = vrot.lane.b32.xlu0 %v6114_v17, %s7671_s25  ;;  %v6254_v24 = vpack.i.bf16 %v649_v10, %v647_v38  ;;  %v4824_v38 = vunpack.i.h.bf16 %v6184_v62  ;;  %v6277_v10 = vpack.i.bf16 %v730_v42, %v728_v44  ;;  %v4833_v13 = vunpack.i.l.bf16 %v6208_v41 }
  0xbd   : > { %v6231_v11 = vpop.permute.xlu1 %4841  ;;  %v6285_v35 = vpack.i.bf16 %v654_v61, %v652_v36  ;;  %v1534_v6 = vsel %vm1526_vm4, %v5818_v60, %v4814_v39  ;;  %v1533_v44 = vsel %vm1526_vm4, %v5814_v58, %v4813_v4  ;;  %v4829_v42 = vunpack.i.h.bf16 %v6212_v63 }
  0xbe   : > { %v6233_v59 = vpop.permute.xlu0 %4836  ;;  %v4828_v0 = vunpack.i.l.bf16 %v6212_v63  ;;  %v1532_v41 = vsel %vm1526_vm4, %v5777_v28, %v4804_v20  ;;  %v1531_v36 = vsel %vm1526_vm4, %v5780_v29, %v4803_v25  ;;  %v1566_v61 = vsel %vm1559_vm5, %v1533_v44, %v4823_v56 }
  0xbf   : > { %5131 = vrot.lane.b32.xlu1 %v6120_v21, %s5613_s23  ;;  %v1567_v60 = vsel %vm1559_vm5, %v1534_v6, %v4824_v38  ;;  %v1565_v58 = vsel %vm1559_vm5, %v1532_v41, %v4819_v12  ;;  %v1564_v63 = vsel %vm1559_vm5, %v1531_v36, %v4818_v55  ;;  %v4839_v39 = vunpack.i.h.bf16 %v6233_v59 }
  0xc0   : > { %5126 = vrot.lane.b32.xlu0 %v6220_v8, %s7671_s25  ;;  %v4838_v4 = vunpack.i.l.bf16 %v6233_v59  ;;  %v1599_v28 = vsel %vm1592_vm6, %v1566_v61, %v4833_v13  ;;  %v1600_v29 = vsel %vm1592_vm6, %v1567_v60, %v4834_v30  ;;  %v1598_v56 = vsel %vm1592_vm6, %v1565_v58, %v4829_v42 }
  0xc1   : > { %v6246_v40 = vpop.permute.xlu1 %4851  ;;  %v4844_v59 = vunpack.i.h.bf16 %v6231_v11  ;;  %v4843_v13 = vunpack.i.l.bf16 %v6231_v11 }
  0xc2   : > { %v6252_v9 = vpop.permute.xlu0 %4846  ;;  %v4854_v44 = vunpack.i.h.bf16 %v6246_v40 }
  0xc3   : > { %5141 = vrot.lane.b32.xlu1 %v6220_v8, %s7670_s22  ;;  %v4849_v20 = vunpack.i.h.bf16 %v6252_v9  ;;  %v4848_v25 = vunpack.i.l.bf16 %v6252_v9 }
  0xc4   : > { %5136 = vrot.lane.b32.xlu0 %v6114_v17, %s7670_s22 }
  0xc5   : > { %v6275_v50 = vpop.permute.xlu1 %4861 }
  0xc6   : > { %v4857_v62 = vpop.permute.xlu0 %4856  ;;  %v4864_v36 = vunpack.i.h.bf16 %v6275_v50  ;;  %v4863_v61 = vunpack.i.l.bf16 %v6275_v50  ;;  %v1632_v50 = vsel %vm1625_vm7, %v1599_v28, %v4843_v13 }
  0xc7   : > { %5151 = vrot.lane.b32.xlu1 %v6250_v57, %s5614_s24  ;;  %v4859_v12 = vunpack.i.h.bf16 %v4857_v62  ;;  %v4858_v55 = vunpack.i.l.bf16 %v4857_v62  ;;  %v4853_v62 = vunpack.i.l.bf16 %v6246_v40  ;;  %v380_v40 = vld [vmem:[%s5760_s21 + $0xd8] sm:$0xff] }
  0xc8   : > { %5146 = vrot.lane.b32.xlu0 %v6118_v34, %s5614_s24  ;;  %v1597_v34 = vsel %vm1592_vm6, %v1564_v63, %v4828_v0  ;;  %v1631_v0 = vsel %vm1625_vm7, %v1598_v56, %v4839_v39 }
  0xc9   : > { %v4872_v17 = vpop.permute.xlu1 %4871  ;;  %v1630_v9 = vsel %vm1625_vm7, %v1597_v34, %v4838_v4  ;;  %v1664_v11 = vsel %vm1658_vm8, %v1631_v0, %v4849_v20  ;;  %v1633_v34 = vsel %vm1625_vm7, %v1600_v29, %v4844_v59 }
  0xca   : > { %v4867_v38 = vpop.permute.xlu0 %4866  ;;  %v1663_v41 = vsel %vm1658_vm8, %v1630_v9, %v4848_v25  ;;  %v1697_v58 = vsel %vm1691_vm9, %v1664_v11, %v4859_v12  ;;  %v4874_v4 = vunpack.i.h.bf16 %v4872_v17  ;;  %v1665_v9 = vsel %vm1658_vm8, %v1632_v50, %v4853_v62 }
  0xcb   : > { %5161 = vrot.lane.b32.xlu1 %v6254_v24, %s5615_s10  ;;  %v4869_v6 = vunpack.i.h.bf16 %v4867_v38  ;;  %v4868_v30 = vunpack.i.l.bf16 %v4867_v38  ;;  %v1696_v60 = vsel %vm1691_vm9, %v1663_v41, %v4858_v55  ;;  %v4873_v38 = vunpack.i.l.bf16 %v4872_v17 }
  0xcc   : > { %5156 = vrot.lane.b32.xlu0 %v6120_v21, %s5615_s10  ;;  %v1666_v17 = vsel %vm1658_vm8, %v1633_v34, %v4854_v44  ;;  %v731_v44 = vrot.slane %v6226_v43, 2 }
  0xcd   : > { %v6324_v42 = vpop.permute.xlu1 %4881  ;;  %v1729_v25 = vsel %vm1724_vm10, %v1696_v60, %v4868_v30  ;;  %v1730_v20 = vsel %vm1724_vm10, %v1697_v58, %v4869_v6  ;;  %v461_v6 = vrot.slane %v380_v40, 7  ;;  %v1699_v28 = vsel %vm1691_vm9, %v1666_v17, %v4864_v36  ;;  %v381_v60 = vld [vmem:[%s5760_s21 + $0xe0] sm:$0xff]  ;;  %v382_v58 = vld [vmem:[%s5760_s21 + $0xe8] sm:$0xff] }
  0xce   : > { %v4877_v21 = vpop.permute.xlu0 %4876  ;;  %v1732_v62 = vsel %vm1724_vm10, %v1699_v28, %v4874_v4 }
  0xcf   : > { %v4879_v63 = vunpack.i.h.bf16 %v4877_v21  ;;  %v4878_v39 = vunpack.i.l.bf16 %v4877_v21  ;;  %5171 = vrot.lane.b32.xlu1 %v6277_v10, %s5616_s18  ;;  %v734_v21 = vrot.slane %v6229_v5, 2  ;;  %v549_v5 = vsel %vm418_vm0, %v461_v6, 0.0 }
  0xd0   : > { %5166 = vrot.lane.b32.xlu0 %v6220_v8, %s5616_s18  ;;  %v1698_v8 = vsel %vm1691_vm9, %v1665_v9, %v4863_v61  ;;  %v732_v61 = vrot.slane %v6223_v33, 2  ;;  %v658_v17 = vrot.slane %v549_v5, 1 }
  0xd1   : > { %v1762_v56 = vsel %vm1757_vm11, %v1729_v25, %v4878_v39  ;;  %v1763_v12 = vsel %vm1757_vm11, %v1730_v20, %v4879_v63  ;;  %v6343_v55 = vpop.permute.xlu1 %4891  ;;  %v1731_v13 = vsel %vm1724_vm10, %v1698_v8, %v4873_v38  ;;  %v463_v25 = vrot.slane %v381_v60, 7 }
  0xd2   : > { %v4887_v30 = vpop.permute.xlu0 %4886  ;;  %v1797_v0 = vpack.c.bf16 %v1763_v12, %v1762_v56  ;;  %v464_v20 = vrot.slane %v382_v58, 7  ;;  %v733_v34 = vsel %vm665_vm1, %v731_v44, %v732_v61  ;;  %v735_v56 = vsel %vm665_vm1, %v732_v61, %v734_v21 }
  0xd3   : > { %v4889_v29 = vunpack.i.h.bf16 %v4887_v30  ;;  %v4888_v59 = vunpack.i.l.bf16 %v4887_v30  ;;  %5181 = vrot.lane.b32.xlu1 %v6281_v49, %s5617_s19  ;;  %v6397_v8 = vpack.i.bf16 %v735_v56, %v733_v34 }
  0xd4   : > { %5176 = vrot.lane.b32.xlu0 %v6250_v57, %s5617_s19  ;;  %4513 = vmatprep.mubr.msk.bf16.mxu0 %vm1831_vm12, %v1797_v0  ;;  %v7681_v57 = vrot.slane %v6265_v7, 7  ;;  %v6400_v28 = vsel %vm418_vm0, %v463_v25, %v464_v20 }
  0xd5   : > { %v1765_v41 = vsel %vm1757_vm11, %v1732_v62, %v4889_v29  ;;  %v1764_v11 = vsel %vm1757_vm11, %v1731_v13, %v4888_v59  ;;  %v6359_v36 = vpop.permute.xlu1 %4901  ;;  %v6403_v29 = vsel %vm418_vm0, 0.0, %v463_v25  ;;  %v6406_v59 = vsel %vm418_vm0, %v464_v20, 0.0 }
  0xd6   : > { %v6365_v63 = vpop.permute.xlu0 %4896  ;;  %v1798_v39 = vpack.c.bf16 %v1765_v41, %v1764_v11  ;;  %v6370_v40 = vsel %vm418_vm0, 0.0, %v7681_v57  ;;  %v7682_v4 = vmov %v7681_v57  ;;  %v660_v61 = vrot.slane %v6403_v29, 1 }
  0xd7   : > { %5191 = vrot.lane.b32.xlu1 %v6285_v35, %s5618_s20  ;;  %v6377_v38 = vsel %vm418_vm0, %v7682_v4, %v461_v6  ;;  %v655_v7 = vrot.slane %v6370_v40, 1  ;;  %v736_v30 = vrot.slane %v6370_v40, 2  ;;  %v739_v6 = vrot.slane %v549_v5, 2 }
  0xd8   : > { %5186 = vrot.lane.b32.xlu0 %v6254_v24, %s5618_s20  ;;  %4514 = vmatmul.mubr.msk.bf16.gmra.mrb[4].mxu0 %vm1831_vm12, %v1798_v39  ;;  %v656_v9 = vrot.slane %v6377_v38, 1  ;;  %v737_v0 = vrot.slane %v6377_v38, 2  ;;  %v661_v21 = vrot.slane %v6400_v28, 1  ;;  %v663_v60 = vrot.slane %v6406_v59, 1 }
  0xd9   : > { %v6383_v50 = vpop.permute.xlu1 %4911  ;;  %v6427_v57 = vpack.i.bf16 %v6377_v38, %v6370_v40  ;;  %v4894_v25 = vunpack.i.h.bf16 %v6343_v55  ;;  %v4893_v20 = vunpack.i.l.bf16 %v6343_v55  ;;  %v4899_v55 = vunpack.i.h.bf16 %v6365_v63 }
  0xda   : > { %v6388_v12 = vpop.permute.xlu0 %4906  ;;  %v659_v44 = vsel %vm584_vm2, %v656_v9, %v658_v17  ;;  %v738_v41 = vsel %vm665_vm1, %v736_v30, %v737_v0  ;;  %v740_v11 = vsel %vm665_vm1, %v737_v0, %v739_v6  ;;  %v662_v34 = vsel %vm584_vm2, %v660_v61, %v661_v21 }
  0xdb   : > { %5201 = vrot.lane.b32.xlu1 %v6254_v24, %s5613_s23  ;;  %v657_v24 = vsel %vm584_vm2, %v655_v7, %v656_v9  ;;  %v6431_v5 = vpack.i.bf16 %v740_v11, %v738_v41  ;;  %v664_v56 = vsel %vm584_vm2, %v661_v21, %v663_v60  ;;  %v4884_v7 = vunpack.i.h.bf16 %v6324_v42 }
  0xdc   : > { %5196 = vrot.lane.b32.xlu0 %v6277_v10, %s7671_s25  ;;  %v6429_v4 = vpack.i.bf16 %v659_v44, %v657_v24  ;;  %v4883_v9 = vunpack.i.l.bf16 %v6324_v42  ;;  %v4904_v17 = vunpack.i.h.bf16 %v6359_v36  ;;  %v4903_v30 = vunpack.i.l.bf16 %v6359_v36 }
  0xdd   : > { %v6408_v13 = vpop.permute.xlu1 %4921  ;;  %v4898_v0 = vunpack.i.l.bf16 %v6365_v63  ;;  %v6451_v24 = vpack.i.bf16 %v6400_v28, %v6403_v29  ;;  %v4914_v44 = vunpack.i.h.bf16 %v6383_v50  ;;  %v4913_v42 = vunpack.i.l.bf16 %v6383_v50 }
  0xde   : > { %v6410_v62 = vpop.permute.xlu0 %4916  ;;  %v6455_v11 = vpack.i.bf16 %v664_v56, %v662_v34  ;;  %v1537_v36 = vsel %vm1526_vm4, %v5875_v51, %v4893_v20  ;;  %v4909_v63 = vunpack.i.h.bf16 %v6388_v12  ;;  %v4908_v61 = vunpack.i.l.bf16 %v6388_v12 }
  0xdf   : > { %5211 = vrot.lane.b32.xlu1 %v6285_v35, %s5613_s23  ;;  %v1536_v21 = vsel %vm1526_vm4, %v5853_v32, %v4884_v7  ;;  %v1535_v50 = vsel %vm1526_vm4, %v5850_v31, %v4883_v9  ;;  %v1570_v60 = vsel %vm1559_vm5, %v1537_v36, %v4903_v30  ;;  %v4918_v20 = vunpack.i.l.bf16 %v6410_v62 }
  0xe0   : > { %5206 = vrot.lane.b32.xlu0 %v6397_v8, %s7671_s25  ;;  %v1569_v51 = vsel %vm1559_vm5, %v1536_v21, %v4899_v55  ;;  %v1568_v12 = vsel %vm1559_vm5, %v1535_v50, %v4898_v0  ;;  %v1603_v32 = vsel %vm1592_vm6, %v1570_v60, %v4913_v42  ;;  %v4924_v0 = vunpack.i.h.bf16 %v6408_v13 }
  0xe1   : > { %v6423_v58 = vpop.permute.xlu1 %4931 }
  0xe2   : > { %v4927_v39 = vpop.permute.xlu0 %4926  ;;  %v4934_v36 = vunpack.i.h.bf16 %v6423_v58 }
  0xe3   : > { %5221 = vrot.lane.b32.xlu1 %v6397_v8, %s7670_s22  ;;  %v4929_v56 = vunpack.i.h.bf16 %v4927_v39  ;;  %v4928_v7 = vunpack.i.l.bf16 %v4927_v39 }
  0xe4   : > { %5216 = vrot.lane.b32.xlu0 %v6277_v10, %s7670_s22  ;;  %v1538_v10 = vsel %vm1526_vm4, %v5878_v52, %v4894_v25  ;;  %v4919_v25 = vunpack.i.h.bf16 %v6410_v62  ;;  %v4923_v62 = vunpack.i.l.bf16 %v6408_v13 }
  0xe5   : > { %v6447_v6 = vpop.permute.xlu1 %4941  ;;  %v1571_v52 = vsel %vm1559_vm5, %v1538_v10, %v4904_v17  ;;  %v1601_v17 = vsel %vm1592_vm6, %v1568_v12, %v4908_v61 }
  0xe6   : > { %v4937_v41 = vpop.permute.xlu0 %4936  ;;  %v1604_v31 = vsel %vm1592_vm6, %v1571_v52, %v4914_v44  ;;  %v1634_v39 = vsel %vm1625_vm7, %v1601_v17, %v4918_v20  ;;  %v4944_v13 = vunpack.i.h.bf16 %v6447_v6  ;;  %v4943_v50 = vunpack.i.l.bf16 %v6447_v6 }
  0xe7   : > { %5231 = vrot.lane.b32.xlu1 %v6427_v57, %s5614_s24  ;;  %v4939_v30 = vunpack.i.h.bf16 %v4937_v41  ;;  %v4938_v55 = vunpack.i.l.bf16 %v4937_v41  ;;  %v4933_v41 = vunpack.i.l.bf16 %v6423_v58  ;;  %v1667_v61 = vsel %vm1658_vm8, %v1634_v39, %v4928_v7  ;;  %v383_v39 = vld [vmem:[%s5760_s21 + $0xf0] sm:$0xff] }
  0xe8   : > { %5226 = vrot.lane.b32.xlu0 %v6281_v49, %s5614_s24  ;;  %v1602_v49 = vsel %vm1592_vm6, %v1569_v51, %v4909_v63  ;;  %v1636_v6 = vsel %vm1625_vm7, %v1603_v32, %v4923_v62  ;;  %v1637_v7 = vsel %vm1625_vm7, %v1604_v31, %v4924_v0 }
  0xe9   : > { %v4952_v34 = vpop.permute.xlu1 %4951  ;;  %v1635_v44 = vsel %vm1625_vm7, %v1602_v49, %v4919_v25 }
  0xea   : > { %v4947_v9 = vpop.permute.xlu0 %4946  ;;  %v1668_v21 = vsel %vm1658_vm8, %v1635_v44, %v4929_v56  ;;  %v4954_v58 = vunpack.i.h.bf16 %v4952_v34  ;;  %v4953_v25 = vunpack.i.l.bf16 %v4952_v34  ;;  %v1670_v34 = vsel %vm1658_vm8, %v1637_v7, %v4934_v36 }
  0xeb   : > { %5241 = vrot.lane.b32.xlu1 %v6429_v4, %s5615_s10  ;;  %v4949_v10 = vunpack.i.h.bf16 %v4947_v9  ;;  %v4948_v42 = vunpack.i.l.bf16 %v4947_v9  ;;  %v1701_v52 = vsel %vm1691_vm9, %v1668_v21, %v4939_v30  ;;  %v1669_v30 = vsel %vm1658_vm8, %v1636_v6, %v4933_v41 }
  0xec   : > { %5236 = vrot.lane.b32.xlu0 %v6285_v35, %s5615_s10  ;;  %v1700_v35 = vsel %vm1691_vm9, %v1667_v61, %v4938_v55  ;;  %v1702_v32 = vsel %vm1691_vm9, %v1669_v30, %v4943_v50  ;;  %v1703_v31 = vsel %vm1691_vm9, %v1670_v34, %v4944_v13  ;;  %v742_v36 = vrot.slane %v6400_v28, 2 }
  0xed   : > { %v6491_v63 = vpop.permute.xlu1 %4961  ;;  %v1733_v20 = vsel %vm1724_vm10, %v1700_v35, %v4948_v42  ;;  %v1734_v56 = vsel %vm1724_vm10, %v1701_v52, %v4949_v10  ;;  %v741_v10 = vrot.slane %v6403_v29, 2  ;;  %v1735_v44 = vsel %vm1724_vm10, %v1702_v32, %v4953_v25 }
  0xee   : > { %v4957_v60 = vpop.permute.xlu0 %4956  ;;  %v1736_v41 = vsel %vm1724_vm10, %v1703_v31, %v4954_v58  ;;  %v744_v61 = vrot.slane %v6406_v59, 2 }
  0xef   : > { %v4959_v51 = vunpack.i.h.bf16 %v4957_v60  ;;  %v4958_v12 = vunpack.i.l.bf16 %v4957_v60  ;;  %5251 = vrot.lane.b32.xlu1 %v6431_v5, %s5616_s18  ;;  %v466_v60 = vrot.slane %v383_v39, 7 }
  0xf0   : > { %5246 = vrot.lane.b32.xlu0 %v6397_v8, %s5616_s18  ;;  %v384_v8 = vld [vmem:[%s5760_s21 + $0xf8] sm:$0xff] }
  0xf1   : > { %v1766_v9 = vsel %vm1757_vm11, %v1733_v20, %v4958_v12  ;;  %v1767_v17 = vsel %vm1757_vm11, %v1734_v56, %v4959_v51  ;;  %v6509_v49 = vpop.permute.xlu1 %4971  ;;  %v467_v35 = vrot.slane %v384_v8, 7  ;;  %v745_v12 = vsel %vm665_vm1, %v742_v36, %v744_v61 }
  0xf2   : > { %v4967_v55 = vpop.permute.xlu0 %4966  ;;  %v1799_v42 = vpack.c.bf16 %v1767_v17, %v1766_v9  ;;  %v534_v25 = vsel %vm418_vm0, 0.0, %v466_v60  ;;  %v4964_v61 = vunpack.i.h.bf16 %v6491_v63 }
  0xf3   : > { %v4969_v0 = vunpack.i.h.bf16 %v4967_v55  ;;  %v4968_v62 = vunpack.i.l.bf16 %v4967_v55  ;;  %5261 = vrot.lane.b32.xlu1 %v6451_v24, %s5617_s19  ;;  %v468_v58 = vsel %vm418_vm0, %v466_v60, %v467_v35  ;;  %v551_v20 = vsel %vm418_vm0, %v467_v35, 0.0 }
  0xf4   : > { %5256 = vrot.lane.b32.xlu0 %v6427_v57, %s5617_s19  ;;  %4517 = vmatprep.mubr.msk.bf16.mxu0 %vm1831_vm12, %v1799_v42  ;;  %v743_v57 = vsel %vm665_vm1, %v741_v10, %v742_v36  ;;  %v748_v7 = vrot.slane %v534_v25, 1  ;;  %v749_v9 = vrot.slane %v468_v58, 1  ;;  %v751_v17 = vrot.slane %v551_v20, 1 }
  0xf5   : > { %v1769_v21 = vsel %vm1757_vm11, %v1736_v41, %v4969_v0  ;;  %v1768_v13 = vsel %vm1757_vm11, %v1735_v44, %v4968_v62  ;;  %v4982_v50 = vpop.permute.xlu1 %4981  ;;  %v6543_v6 = vpack.i.bf16 %v745_v12, %v743_v57  ;;  %v753_v55 = vrot.slane %v534_v25, 2 }
  0xf6   : > { %v4977_v52 = vpop.permute.xlu0 %4976  ;;  %v1800_v51 = vpack.c.bf16 %v1769_v21, %v1768_v13  ;;  %v754_v42 = vrot.slane %v468_v58, 2  ;;  %v756_v10 = vrot.slane %v551_v20, 2  ;;  %v752_v39 = vsel %vm584_vm2, %v749_v9, %v751_v17 }
  0xf7   : > { %5271 = vrot.lane.b32.xlu1 %v6455_v11, %s5618_s20  ;;  %v6557_v31 = vpack.i.bf16 %v468_v58, %v534_v25  ;;  %v4974_v44 = vunpack.i.h.bf16 %v6509_v49  ;;  %v4973_v41 = vunpack.i.l.bf16 %v6509_v49  ;;  %v4963_v21 = vunpack.i.l.bf16 %v6491_v63 }
  0xf8   : > { %5266 = vrot.lane.b32.xlu0 %v6429_v4, %s5618_s20  ;;  %4518 = vmatmul.mubr.msk.bf16.gmra.mrb[8].mxu0 %vm1831_vm12, %v1800_v51  ;;  %v755_v0 = vsel %vm665_vm1, %v753_v55, %v754_v42  ;;  %v757_v62 = vsel %vm665_vm1, %v754_v42, %v756_v10  ;;  %v4984_v13 = vunpack.i.h.bf16 %v4982_v50  ;;  %v4983_v60 = vunpack.i.l.bf16 %v4982_v50 }
  0xf9   : > { %v4992_v59 = vpop.permute.xlu1 %4991  ;;  %v4979_v35 = vunpack.i.h.bf16 %v4977_v52  ;;  %v4978_v51 = vunpack.i.l.bf16 %v4977_v52  ;;  %v6573_v12 = vpack.i.bf16 %v757_v62, %v755_v0  ;;  %v5340_v20 = vpack.i.bf16 %v5724_v1, %v5729_v2 }
  0xfa   : > { %v4987_v56 = vpop.permute.xlu0 %4986  ;;  %v4994_v49 = vunpack.i.h.bf16 %v4992_v59  ;;  %v4993_v58 = vunpack.i.l.bf16 %v4992_v59  ;;  %v1542_v63 = vsel %vm1526_vm4, %v5934_v47, %v4974_v44  ;;  %v1541_v50 = vsel %vm1526_vm4, %v5937_v48, %v4973_v41 }
  0xfb   : > { %5281 = vrot.lane.b32.xlu1 %v6429_v4, %s5613_s23  ;;  %v750_v4 = vsel %vm584_vm2, %v748_v7, %v749_v9  ;;  %v4989_v7 = vunpack.i.h.bf16 %v4987_v56  ;;  %v1540_v52 = vsel %vm1526_vm4, %v5909_v22, %v4964_v61  ;;  %v1539_v59 = vsel %vm1526_vm4, %v5912_v23, %v4963_v21 }
  0xfc   : > { %5276 = vrot.lane.b32.xlu0 %v6431_v5, %s7671_s25  ;;  %v6565_v36 = vpack.i.bf16 %v752_v39, %v750_v4  ;;  %v1574_v9 = vsel %vm1559_vm5, %v1541_v50, %v4983_v60  ;;  %v1575_v17 = vsel %vm1559_vm5, %v1542_v63, %v4984_v13  ;;  %v1573_v47 = vsel %vm1559_vm5, %v1540_v52, %v4979_v35 }
  0xfd   : > { %v6545_v30 = vpop.permute.xlu1 %5001  ;;  %v1572_v48 = vsel %vm1559_vm5, %v1539_v59, %v4978_v51  ;;  %v1607_v22 = vsel %vm1592_vm6, %v1574_v9, %v4993_v58  ;;  %v1608_v23 = vsel %vm1592_vm6, %v1575_v17, %v4994_v49 }
  0xfe   : > { %v6547_v34 = vpop.permute.xlu0 %4996  ;;  %v5004_v41 = vunpack.i.h.bf16 %v6545_v30 }
  0xff   : > { %5291 = vrot.lane.b32.xlu1 %v6455_v11, %s5613_s23  ;;  %v4998_v55 = vunpack.i.l.bf16 %v6547_v34  ;;  %s4273_s23 = sshll.u32 %s6952_s26, 1 }
 0x100   : > { %5286 = vrot.lane.b32.xlu0 %v6543_v6, %s7671_s25  ;;  %v1641_v17 = vsel %vm1625_vm7, %v1608_v23, %v5004_v41 }
 0x101   : > { %v6555_v8 = vpop.permute.xlu1 %5011 }
 0x102   : > { %v5007_v32 = vpop.permute.xlu0 %5006  ;;  %v5014_v60 = vunpack.i.h.bf16 %v6555_v8  ;;  %v5013_v35 = vunpack.i.l.bf16 %v6555_v8 }
 0x103   : > { %5301 = vrot.lane.b32.xlu1 %v6543_v6, %s7670_s22  ;;  %v5009_v10 = vunpack.i.h.bf16 %v5007_v32  ;;  %v5008_v4 = vunpack.i.l.bf16 %v5007_v32 }
 0x104   : > { %5296 = vrot.lane.b32.xlu0 %v6431_v5, %s7670_s22  ;;  %v4988_v5 = vunpack.i.l.bf16 %v4987_v56  ;;  %v4999_v56 = vunpack.i.h.bf16 %v6547_v34  ;;  %v5003_v34 = vunpack.i.l.bf16 %v6545_v30 }
 0x105   : > { %v6571_v57 = vpop.permute.xlu1 %5021 }
 0x106   : > { %v5017_v25 = vpop.permute.xlu0 %5016  ;;  %v1605_v0 = vsel %vm1592_vm6, %v1572_v48, %v4988_v5  ;;  %v5024_v30 = vunpack.i.h.bf16 %v6571_v57 }
 0x107   : > { %5311 = vrot.lane.b32.xlu1 %v6557_v31, %s5614_s24  ;;  %v5019_v62 = vunpack.i.h.bf16 %v5017_v25  ;;  %v5018_v44 = vunpack.i.l.bf16 %v5017_v25  ;;  %v1638_v32 = vsel %vm1625_vm7, %v1605_v0, %v4998_v55  ;;  %v5023_v25 = vunpack.i.l.bf16 %v6571_v57 }
 0x108   : > { %5306 = vrot.lane.b32.xlu0 %v6451_v24, %s5614_s24  ;;  %v1606_v24 = vsel %vm1592_vm6, %v1573_v47, %v4989_v7  ;;  %v1671_v49 = vsel %vm1658_vm8, %v1638_v32, %v5008_v4  ;;  %v1640_v57 = vsel %vm1625_vm7, %v1607_v22, %v5003_v34  ;;  %s4277_s24 = sshll.u32 %s5738_s17, 1 }
 0x109   : > { %v5032_v42 = vpop.permute.xlu1 %5031  ;;  %v1639_v13 = vsel %vm1625_vm7, %v1606_v24, %v4999_v56  ;;  %v1673_v55 = vsel %vm1658_vm8, %v1640_v57, %v5013_v35 }
 0x10a   : > { %v5027_v39 = vpop.permute.xlu0 %5026  ;;  %v1672_v58 = vsel %vm1658_vm8, %v1639_v13, %v5009_v10  ;;  %v5034_v8 = vunpack.i.h.bf16 %v5032_v42  ;;  %v5033_v52 = vunpack.i.l.bf16 %v5032_v42  ;;  %v1674_v42 = vsel %vm1658_vm8, %v1641_v17, %v5014_v60 }
 0x10b   : > { %5321 = vrot.lane.b32.xlu1 %v6565_v36, %s5615_s10  ;;  %v5029_v61 = vunpack.i.h.bf16 %v5027_v39  ;;  %v5028_v21 = vunpack.i.l.bf16 %v5027_v39  ;;  %v1705_v50 = vsel %vm1691_vm9, %v1672_v58, %v5019_v62  ;;  %v1706_v39 = vsel %vm1691_vm9, %v1673_v55, %v5023_v25 }
 0x10c   : > { %5316 = vrot.lane.b32.xlu0 %v6455_v11, %s5615_s10  ;;  %v1704_v11 = vsel %vm1691_vm9, %v1671_v49, %v5018_v44  ;;  %v1707_v0 = vsel %vm1691_vm9, %v1674_v42, %v5024_v30  ;;  %v1739_v22 = vsel %vm1724_vm10, %v1706_v39, %v5033_v52  ;;  %s7675_s10 = smov 64  }
 0x10d   : > { %v6609_v51 = vpop.permute.xlu1 %5041  ;;  %v1737_v59 = vsel %vm1724_vm10, %v1704_v11, %v5028_v21  ;;  %v1738_v9 = vsel %vm1724_vm10, %v1705_v50, %v5029_v61  ;;  %v1740_v23 = vsel %vm1724_vm10, %v1707_v0, %v5034_v8 }
 0x10e   : > { %v5037_v63 = vpop.permute.xlu0 %5036  ;;  %v5043_v35 = vunpack.i.l.bf16 %v6609_v51 }
 0x10f   : > { %v5039_v7 = vunpack.i.h.bf16 %v5037_v63  ;;  %v5038_v5 = vunpack.i.l.bf16 %v5037_v63  ;;  %5331 = vrot.lane.b32.xlu1 %v6573_v12, %s5616_s18 }
 0x110   : > { %5326 = vrot.lane.b32.xlu0 %v6543_v6, %s5616_s18  ;;  %s346_s18 = scalar_lea.vmem %s7656_s1, %s4277_s24  ;;  %s6964_s24 = scalar_lea.vmem [#allocation2], %s4273_s23 }
 0x111   : > { %v1770_v47 = vsel %vm1757_vm11, %v1737_v59, %v5038_v5  ;;  %v1771_v48 = vsel %vm1757_vm11, %v1738_v9, %v5039_v7  ;;  %v5052_v56 = vpop.permute.xlu1 %5051 }
 0x112   : > { %v1801_v10 = vpack.c.bf16 %v1771_v48, %v1770_v47  ;;  %v5047_v4 = vpop.permute.xlu0 %5046  ;;  %v5053_v60 = vunpack.i.l.bf16 %v5052_v56 }
 0x113   : > { %v5049_v6 = vunpack.i.h.bf16 %v5047_v4  ;;  %v5048_v24 = vunpack.i.l.bf16 %v5047_v4  ;;  %5341 = vrot.lane.b32.xlu1 %v5340_v20, %s5617_s19 }
 0x114   : > { %5336 = vrot.lane.b32.xlu0 %v6557_v31, %s5617_s19  ;;  %4521 = vmatprep.mubr.msk.bf16.mxu0 %vm1831_vm12, %v1801_v10  ;;  %v1545_v7 = vsel %vm1526_vm4, %v5991_v46, %v5053_v60 }
 0x115   : > { %v1773_v62 = vsel %vm1757_vm11, %v1740_v23, %v5049_v6  ;;  %v1772_v44 = vsel %vm1757_vm11, %v1739_v22, %v5048_v24  ;;  %v5062_v41 = vpop.permute.xlu1 %5061 }
 0x116   : > { %v1802_v34 = vpack.c.bf16 %v1773_v62, %v1772_v44  ;;  %v5057_v61 = vpop.permute.xlu0 %5056  ;;  %v5064_v49 = vunpack.i.h.bf16 %v5062_v41  ;;  %v5063_v58 = vunpack.i.l.bf16 %v5062_v41 }
 0x117   : > { %5351 = vrot.lane.b32.xlu1 %v5764_v15, %s5618_s20  ;;  %v5054_v15 = vunpack.i.h.bf16 %v5052_v56  ;;  %v5059_v30 = vunpack.i.h.bf16 %v5057_v61  ;;  %v5058_v25 = vunpack.i.l.bf16 %v5057_v61 }
 0x118   : > { %5346 = vrot.lane.b32.xlu0 %v6565_v36, %s5618_s20  ;;  %4522 = vmatmul.mubr.msk.bf16.gmra.mrb[12].mxu0 %vm1831_vm12, %v1802_v34  ;;  %v5044_v36 = vunpack.i.h.bf16 %v6609_v51  ;;  %v1543_v51 = vsel %vm1526_vm4, %v5966_v19, %v5043_v35  ;;  %v1578_v59 = vsel %vm1559_vm5, %v1545_v7, %v5063_v58 }
 0x119   : > { %v5072_v1 = vpop.permute.xlu1 %5071  ;;  %v1546_v50 = vsel %vm1526_vm4, %v5988_v45, %v5054_v15  ;;  %v1576_v17 = vsel %vm1559_vm5, %v1543_v51, %v5058_v25 }
 0x11a   : > { %v5067_v20 = vpop.permute.xlu0 %5066  ;;  %v5074_v63 = vunpack.i.h.bf16 %v5072_v1  ;;  %v5073_v11 = vunpack.i.l.bf16 %v5072_v1  ;;  %v1544_v52 = vsel %vm1526_vm4, %v5963_v18, %v5044_v36  ;;  %v1579_v9 = vsel %vm1559_vm5, %v1546_v50, %v5064_v49 }
 0x11b   : > { %5361 = vrot.lane.b32.xlu1 %v5762_v14, %s7671_s25  ;;  %v5069_v5 = vunpack.i.h.bf16 %v5067_v20  ;;  %v5068_v8 = vunpack.i.l.bf16 %v5067_v20  ;;  %v1577_v57 = vsel %vm1559_vm5, %v1544_v52, %v5059_v30 }
 0x11c   : > { %5356 = vrot.lane.b32.xlu0 %v6573_v12, %s7671_s25  ;;  %v1611_v46 = vsel %vm1592_vm6, %v1578_v59, %v5073_v11  ;;  %v1612_v56 = vsel %vm1592_vm6, %v1579_v9, %v5074_v63  ;;  %s4380_s25 = sshll.u32 %s5696_s9, 5 }
 0x11d   : > { %v6651_v31 = vpop.permute.xlu1 %5081  ;;  %v1609_v19 = vsel %vm1592_vm6, %v1576_v17, %v5068_v8  ;;  %v1610_v10 = vsel %vm1592_vm6, %v1577_v57, %v5069_v5 }
 0x11e   : > { %v5077_v21 = vpop.permute.xlu0 %5076  ;;  %v5084_v0 = vunpack.i.h.bf16 %v6651_v31  ;;  %v5083_v6 = vunpack.i.l.bf16 %v6651_v31 }
 0x11f   : > { %v5079_v45 = vunpack.i.h.bf16 %v5077_v21  ;;  %v5078_v47 = vunpack.i.l.bf16 %v5077_v21 }
 0x120   : > { %v1644_v30 = vsel %vm1625_vm7, %v1611_v46, %v5083_v6  ;;  %v1645_v25 = vsel %vm1625_vm7, %v1612_v56, %v5084_v0 }
 0x121   : > { %v6653_v32 = vpop.permute.xlu1 %5091  ;;  %v1642_v23 = vsel %vm1625_vm7, %v1609_v19, %v5078_v47  ;;  %v1643_v62 = vsel %vm1625_vm7, %v1610_v10, %v5079_v45 }
 0x122   : > { %v5087_v13 = vpop.permute.xlu0 %5086  ;;  %v5094_v44 = vunpack.i.h.bf16 %v6653_v32  ;;  %v5093_v41 = vunpack.i.l.bf16 %v6653_v32 }
 0x123   : > { %v5089_v55 = vunpack.i.h.bf16 %v5087_v13  ;;  %v5088_v18 = vunpack.i.l.bf16 %v5087_v13 }
 0x124   : > { %v1678_v50 = vsel %vm1658_vm8, %v1645_v25, %v5094_v44 }
 0x125   : > { %v5102_v14 = vpop.permute.xlu1 %5101  ;;  %v1675_v61 = vsel %vm1658_vm8, %v1642_v23, %v5088_v18  ;;  %v1676_v1 = vsel %vm1658_vm8, %v1643_v62, %v5089_v55 }
 0x126   : > { %v5097_v12 = vpop.permute.xlu0 %5096  ;;  %v5104_v20 = vunpack.i.h.bf16 %v5102_v14  ;;  %v5103_v21 = vunpack.i.l.bf16 %v5102_v14 }
 0x127   : > { %v5099_v4 = vunpack.i.h.bf16 %v5097_v12  ;;  %v5098_v39 = vunpack.i.l.bf16 %v5097_v12  ;;  %v1677_v12 = vsel %vm1658_vm8, %v1644_v30, %v5093_v41 }
 0x128   : > { %v1710_v8 = vsel %vm1691_vm9, %v1677_v12, %v5103_v21  ;;  %v1711_v52 = vsel %vm1691_vm9, %v1678_v50, %v5104_v20 }
 0x129   : > { %v5112_v48 = vpop.permute.xlu1 %5111  ;;  %v1708_v31 = vsel %vm1691_vm9, %v1675_v61, %v5098_v39  ;;  %v1709_v15 = vsel %vm1691_vm9, %v1676_v1, %v5099_v4 }
 0x12a   : > { %v5107_v42 = vpop.permute.xlu0 %5106  ;;  %v5114_v35 = vunpack.i.h.bf16 %v5112_v48  ;;  %v5113_v49 = vunpack.i.l.bf16 %v5112_v48 }
 0x12b   : > { %v5109_v24 = vunpack.i.h.bf16 %v5107_v42  ;;  %v5108_v22 = vunpack.i.l.bf16 %v5107_v42 }
 0x12c   : > { %v1743_v9 = vsel %vm1724_vm10, %v1710_v8, %v5113_v49  ;;  %v1744_v57 = vsel %vm1724_vm10, %v1711_v52, %v5114_v35 }
 0x12d   : > { %v5122_v34 = vpop.permute.xlu1 %5121  ;;  %v1741_v58 = vsel %vm1724_vm10, %v1708_v31, %v5108_v22  ;;  %v1742_v32 = vsel %vm1724_vm10, %v1709_v15, %v5109_v24 }
 0x12e   : > { %v5117_v13 = vpop.permute.xlu0 %5116  ;;  %v5124_v0 = vunpack.i.h.bf16 %v5122_v34  ;;  %v5123_v6 = vunpack.i.l.bf16 %v5122_v34 }
 0x12f   : > { %v5119_v60 = vunpack.i.h.bf16 %v5117_v13  ;;  %v5118_v36 = vunpack.i.l.bf16 %v5117_v13 }
 0x130   : > { %v1548_v15 = vsel %vm1526_vm4, %v6033_v26, %v5124_v0  ;;  %v1547_v34 = vsel %vm1526_vm4, %v6036_v27, %v5123_v6 }
 0x131   : > { %v1774_v63 = vsel %vm1757_vm11, %v1741_v58, %v5118_v36  ;;  %v1775_v14 = vsel %vm1757_vm11, %v1742_v32, %v5119_v60  ;;  %v5132_v11 = vpop.permute.xlu1 %5131 }
 0x132   : > { %v1803_v7 = vpack.c.bf16 %v1775_v14, %v1774_v63  ;;  %v5127_v5 = vpop.permute.xlu0 %5126  ;;  %v5134_v4 = vunpack.i.h.bf16 %v5132_v11  ;;  %v5133_v39 = vunpack.i.l.bf16 %v5132_v11 }
 0x133   : > { %v5129_v51 = vunpack.i.h.bf16 %v5127_v5  ;;  %v5128_v59 = vunpack.i.l.bf16 %v5127_v5 }
 0x134   : > { %4525 = vmatprep.mubr.msk.bf16.mxu0 %vm1831_vm12, %v1803_v7  ;;  %v1550_v20 = vsel %vm1526_vm4, %v6052_v53, %v5134_v4  ;;  %v1549_v21 = vsel %vm1526_vm4, %v6055_v54, %v5133_v39 }
 0x135   : > { %v1777_v17 = vsel %vm1757_vm11, %v1744_v57, %v5129_v51  ;;  %v1776_v45 = vsel %vm1757_vm11, %v1743_v9, %v5128_v59  ;;  %v5142_v47 = vpop.permute.xlu1 %5141 }
 0x136   : > { %v1804_v48 = vpack.c.bf16 %v1777_v17, %v1776_v45  ;;  %v5137_v46 = vpop.permute.xlu0 %5136  ;;  %v5144_v24 = vunpack.i.h.bf16 %v5142_v47  ;;  %v5143_v22 = vunpack.i.l.bf16 %v5142_v47 }
 0x137   : > { %v5139_v23 = vunpack.i.h.bf16 %v5137_v46  ;;  %v5138_v62 = vunpack.i.l.bf16 %v5137_v46 }
 0x138   : > { %4526 = vmatmul.mubr.msk.bf16.gmra.mrb[16].mxu0 %vm1831_vm12, %v1804_v48  ;;  %v1582_v60 = vsel %vm1559_vm5, %v1549_v21, %v5143_v22  ;;  %v1583_v36 = vsel %vm1559_vm5, %v1550_v20, %v5144_v24 }
 0x139   : > { %v5152_v56 = vpop.permute.xlu1 %5151  ;;  %v1581_v35 = vsel %vm1559_vm5, %v1548_v15, %v5139_v23  ;;  %v1580_v49 = vsel %vm1559_vm5, %v1547_v34, %v5138_v62 }
 0x13a   : > { %v5147_v55 = vpop.permute.xlu0 %5146  ;;  %v5154_v41 = vunpack.i.h.bf16 %v5152_v56  ;;  %v5153_v61 = vunpack.i.l.bf16 %v5152_v56 }
 0x13b   : > { %v5149_v13 = vunpack.i.h.bf16 %v5147_v55  ;;  %v5148_v31 = vunpack.i.l.bf16 %v5147_v55 }
 0x13c   : > { %v1615_v54 = vsel %vm1592_vm6, %v1582_v60, %v5153_v61  ;;  %v1616_v30 = vsel %vm1592_vm6, %v1583_v36, %v5154_v41 }
 0x13d   : > { %v6699_v18 = vpop.permute.xlu1 %5161  ;;  %v1613_v27 = vsel %vm1592_vm6, %v1580_v49, %v5148_v31  ;;  %v1614_v14 = vsel %vm1592_vm6, %v1581_v35, %v5149_v13 }
 0x13e   : > { %v5157_v42 = vpop.permute.xlu0 %5156  ;;  %v5164_v50 = vunpack.i.h.bf16 %v6699_v18  ;;  %v5163_v7 = vunpack.i.l.bf16 %v6699_v18 }
 0x13f   : > { %v5159_v53 = vunpack.i.h.bf16 %v5157_v42  ;;  %v5158_v58 = vunpack.i.l.bf16 %v5157_v42 }
 0x140   : > { %v1648_v0 = vsel %vm1625_vm7, %v1615_v54, %v5163_v7  ;;  %v1649_v6 = vsel %vm1625_vm7, %v1616_v30, %v5164_v50 }
 0x141   : > { %v6701_v19 = vpop.permute.xlu1 %5171  ;;  %v1646_v52 = vsel %vm1625_vm7, %v1613_v27, %v5158_v58  ;;  %v1647_v51 = vsel %vm1625_vm7, %v1614_v14, %v5159_v53 }
 0x142   : > { %v5167_v10 = vpop.permute.xlu0 %5166  ;;  %v5174_v59 = vunpack.i.h.bf16 %v6701_v19  ;;  %v5173_v9 = vunpack.i.l.bf16 %v6701_v19 }
 0x143   : > { %v5169_v25 = vunpack.i.h.bf16 %v5167_v10  ;;  %v5168_v26 = vunpack.i.l.bf16 %v5167_v10 }
 0x144   : > { %v1681_v62 = vsel %vm1658_vm8, %v1648_v0, %v5173_v9 }
 0x145   : > { %v5182_v44 = vpop.permute.xlu1 %5181  ;;  %v1679_v17 = vsel %vm1658_vm8, %v1646_v52, %v5168_v26  ;;  %v1680_v45 = vsel %vm1658_vm8, %v1647_v51, %v5169_v25 }
 0x146   : > { %v5177_v1 = vpop.permute.xlu0 %5176  ;;  %v5184_v47 = vunpack.i.h.bf16 %v5182_v44  ;;  %v5183_v48 = vunpack.i.l.bf16 %v5182_v44  ;;  %v1682_v44 = vsel %vm1658_vm8, %v1649_v6, %v5174_v59 }
 0x147   : > { %v5179_v11 = vunpack.i.h.bf16 %v5177_v1  ;;  %v5178_v12 = vunpack.i.l.bf16 %v5177_v1 }
 0x148   : > { %v1714_v1 = vsel %vm1691_vm9, %v1681_v62, %v5183_v48  ;;  %v1715_v20 = vsel %vm1691_vm9, %v1682_v44, %v5184_v47 }
 0x149   : > { %v5192_v32 = vpop.permute.xlu1 %5191  ;;  %v1712_v56 = vsel %vm1691_vm9, %v1679_v17, %v5178_v12  ;;  %v1713_v55 = vsel %vm1691_vm9, %v1680_v45, %v5179_v11 }
 0x14a   : > { %v5187_v63 = vpop.permute.xlu0 %5186  ;;  %v5194_v10 = vunpack.i.h.bf16 %v5192_v32  ;;  %v5193_v4 = vunpack.i.l.bf16 %v5192_v32 }
 0x14b   : > { %v5189_v5 = vunpack.i.h.bf16 %v5187_v63  ;;  %v5188_v8 = vunpack.i.l.bf16 %v5187_v63 }
 0x14c   : > { %v1747_v31 = vsel %vm1724_vm10, %v1714_v1, %v5193_v4  ;;  %v1748_v15 = vsel %vm1724_vm10, %v1715_v20, %v5194_v10 }
 0x14d   : > { %v5202_v57 = vpop.permute.xlu1 %5201  ;;  %v1745_v39 = vsel %vm1724_vm10, %v1712_v56, %v5188_v8  ;;  %v1746_v19 = vsel %vm1724_vm10, %v1713_v55, %v5189_v5 }
 0x14e   : > { %v5197_v46 = vpop.permute.xlu0 %5196  ;;  %v5204_v27 = vunpack.i.h.bf16 %v5202_v57  ;;  %v5203_v14 = vunpack.i.l.bf16 %v5202_v57 }
 0x14f   : > { %v5199_v18 = vunpack.i.h.bf16 %v5197_v46  ;;  %v5198_v42 = vunpack.i.l.bf16 %v5197_v46 }
 0x150   : > { %v1552_v47 = vsel %vm1526_vm4, %v6197_v37, %v5204_v27  ;;  %v1551_v57 = vsel %vm1526_vm4, %v6202_v16, %v5203_v14 }
 0x151   : > { %v1778_v24 = vsel %vm1757_vm11, %v1745_v39, %v5198_v42  ;;  %v1779_v22 = vsel %vm1757_vm11, %v1746_v19, %v5199_v18  ;;  %v5212_v23 = vpop.permute.xlu1 %5211 }
 0x152   : > { %v1805_v41 = vpack.c.bf16 %v1779_v22, %v1778_v24  ;;  %v5207_v61 = vpop.permute.xlu0 %5206  ;;  %v5214_v26 = vunpack.i.h.bf16 %v5212_v23  ;;  %v5213_v63 = vunpack.i.l.bf16 %v5212_v23 }
 0x153   : > { %v5209_v21 = vunpack.i.h.bf16 %v5207_v61  ;;  %v5208_v13 = vunpack.i.l.bf16 %v5207_v61 }
 0x154   : > { %4529 = vmatprep.mubr.msk.bf16.mxu0 %vm1831_vm12, %v1805_v41  ;;  %v1554_v59 = vsel %vm1526_vm4, %v6223_v33, %v5214_v26  ;;  %v1553_v9 = vsel %vm1526_vm4, %v6226_v43, %v5213_v63 }
 0x155   : > { %v1781_v34 = vsel %vm1757_vm11, %v1748_v15, %v5209_v21  ;;  %v1780_v60 = vsel %vm1757_vm11, %v1747_v31, %v5208_v13  ;;  %v5222_v36 = vpop.permute.xlu1 %5221 }
 0x156   : > { %v1806_v35 = vpack.c.bf16 %v1781_v34, %v1780_v60  ;;  %v5217_v49 = vpop.permute.xlu0 %5216  ;;  %v5224_v11 = vunpack.i.h.bf16 %v5222_v36  ;;  %v5223_v12 = vunpack.i.l.bf16 %v5222_v36 }
 0x157   : > { %v5219_v50 = vunpack.i.h.bf16 %v5217_v49  ;;  %v5218_v7 = vunpack.i.l.bf16 %v5217_v49 }
 0x158   : > { %4530 = vmatmul.mubr.msk.bf16.gmra.mrb[20].mxu0 %vm1831_vm12, %v1806_v35  ;;  %v1586_v48 = vsel %vm1559_vm5, %v1553_v9, %v5223_v12  ;;  %v1587_v46 = vsel %vm1559_vm5, %v1554_v59, %v5224_v11 }
 0x159   : > { %v5232_v53 = vpop.permute.xlu1 %5231  ;;  %v1585_v56 = vsel %vm1559_vm5, %v1552_v47, %v5219_v50  ;;  %v1584_v55 = vsel %vm1559_vm5, %v1551_v57, %v5218_v7 }
 0x15a   : > { %v5227_v58 = vpop.permute.xlu0 %5226  ;;  %v5234_v8 = vunpack.i.h.bf16 %v5232_v53  ;;  %v5233_v52 = vunpack.i.l.bf16 %v5232_v53 }
 0x15b   : > { %v5229_v17 = vunpack.i.h.bf16 %v5227_v58  ;;  %v5228_v45 = vunpack.i.l.bf16 %v5227_v58 }
 0x15c   : > { %v1619_v43 = vsel %vm1592_vm6, %v1586_v48, %v5233_v52  ;;  %v1620_v10 = vsel %vm1592_vm6, %v1587_v46, %v5234_v8 }
 0x15d   : > { %v6745_v32 = vpop.permute.xlu1 %5241  ;;  %v1617_v16 = vsel %vm1592_vm6, %v1584_v55, %v5228_v45  ;;  %v1618_v19 = vsel %vm1592_vm6, %v1585_v56, %v5229_v17 }
 0x15e   : > { %v5237_v54 = vpop.permute.xlu0 %5236  ;;  %v5244_v24 = vunpack.i.h.bf16 %v6745_v32  ;;  %v5243_v22 = vunpack.i.l.bf16 %v6745_v32 }
 0x15f   : > { %v5239_v33 = vunpack.i.h.bf16 %v5237_v54  ;;  %v5238_v18 = vunpack.i.l.bf16 %v5237_v54 }
 0x161   : > { %v6747_v30 = vpop.permute.xlu1 %5251  ;;  %v1650_v44 = vsel %vm1625_vm7, %v1617_v16, %v5238_v18  ;;  %v1651_v41 = vsel %vm1625_vm7, %v1618_v19, %v5239_v33 }
 0x162   : > { %v5247_v25 = vpop.permute.xlu0 %5246  ;;  %v5254_v61 = vunpack.i.h.bf16 %v6747_v30  ;;  %v5253_v1 = vunpack.i.l.bf16 %v6747_v30  ;;  %v1652_v30 = vsel %vm1625_vm7, %v1619_v43, %v5243_v22 }
 0x163   : > { %v5249_v4 = vunpack.i.h.bf16 %v5247_v25  ;;  %v5248_v37 = vunpack.i.l.bf16 %v5247_v25  ;;  %v1653_v25 = vsel %vm1625_vm7, %v1620_v10, %v5244_v24 }
 0x164   : > { %v1685_v14 = vsel %vm1658_vm8, %v1652_v30, %v5253_v1  ;;  %v1686_v11 = vsel %vm1658_vm8, %v1653_v25, %v5254_v61 }
 0x165   : > { %v5262_v5 = vpop.permute.xlu1 %5261  ;;  %v1683_v21 = vsel %vm1658_vm8, %v1650_v44, %v5248_v37  ;;  %v1684_v13 = vsel %vm1658_vm8, %v1651_v41, %v5249_v4 }
 0x166   : > { %v5257_v51 = vpop.permute.xlu0 %5256  ;;  %v5264_v31 = vunpack.i.h.bf16 %v5262_v5  ;;  %v5263_v15 = vunpack.i.l.bf16 %v5262_v5 }
 0x167   : > { %v5259_v0 = vunpack.i.h.bf16 %v5257_v51  ;;  %v5258_v6 = vunpack.i.l.bf16 %v5257_v51 }
 0x168   : > { %v1718_v7 = vsel %vm1691_vm9, %v1685_v14, %v5263_v15  ;;  %v1719_v5 = vsel %vm1691_vm9, %v1686_v11, %v5264_v31 }
 0x169   : > { %v5272_v42 = vpop.permute.xlu1 %5271  ;;  %v1716_v60 = vsel %vm1691_vm9, %v1683_v21, %v5258_v6  ;;  %v1717_v36 = vsel %vm1691_vm9, %v1684_v13, %v5259_v0 }
 0x16a   : > { %v5267_v39 = vpop.permute.xlu0 %5266  ;;  %v5274_v53 = vunpack.i.h.bf16 %v5272_v42  ;;  %v5273_v58 = vunpack.i.l.bf16 %v5272_v42 }
 0x16b   : > { %v5269_v23 = vunpack.i.h.bf16 %v5267_v39  ;;  %v5268_v62 = vunpack.i.l.bf16 %v5267_v39 }
 0x16c   : > { %v1751_v51 = vsel %vm1724_vm10, %v1718_v7, %v5273_v58  ;;  %v1752_v59 = vsel %vm1724_vm10, %v1719_v5, %v5274_v53 }
 0x16d   : > { %v5282_v20 = vpop.permute.xlu1 %5281  ;;  %v1749_v32 = vsel %vm1724_vm10, %v1716_v60, %v5268_v62  ;;  %v1750_v54 = vsel %vm1724_vm10, %v1717_v36, %v5269_v23 }
 0x16e   : > { %v5277_v34 = vpop.permute.xlu0 %5276  ;;  %v5284_v55 = vunpack.i.h.bf16 %v5282_v20  ;;  %v5283_v43 = vunpack.i.l.bf16 %v5282_v20 }
 0x16f   : > { %v5279_v35 = vunpack.i.h.bf16 %v5277_v34  ;;  %v5278_v49 = vunpack.i.l.bf16 %v5277_v34 }
 0x170   : > { %v1556_v19 = vsel %vm1526_vm4, %v6377_v38, %v5284_v55  ;;  %v1555_v41 = vsel %vm1526_vm4, %v6370_v40, %v5283_v43 }
 0x171   : > { %v1782_v26 = vsel %vm1757_vm11, %v1749_v32, %v5278_v49  ;;  %v1783_v63 = vsel %vm1757_vm11, %v1750_v54, %v5279_v35  ;;  %v5292_v27 = vpop.permute.xlu1 %5291 }
 0x172   : > { %v1807_v12 = vpack.c.bf16 %v1783_v63, %v1782_v26  ;;  %v5287_v50 = vpop.permute.xlu0 %5286  ;;  %v5294_v18 = vunpack.i.h.bf16 %v5292_v27  ;;  %v5293_v42 = vunpack.i.l.bf16 %v5292_v27 }
 0x173   : > { %v5289_v8 = vunpack.i.h.bf16 %v5287_v50  ;;  %v5288_v52 = vunpack.i.l.bf16 %v5287_v50 }
 0x174   : > { %4533 = vmatprep.mubr.msk.bf16.mxu0 %vm1831_vm12, %v1807_v12  ;;  %v1558_v22 = vsel %vm1526_vm4, %v6400_v28, %v5294_v18  ;;  %v1557_v23 = vsel %vm1526_vm4, %v6403_v29, %v5293_v42  ;;  %vm2426_vm4 = vcmask 1045508  }
 0x175   : > { %v1785_v9 = vsel %vm1757_vm11, %v1752_v59, %v5289_v8  ;;  %v1784_v17 = vsel %vm1757_vm11, %v1751_v51, %v5288_v52  ;;  %v5302_v45 = vpop.permute.xlu1 %5301  ;;  %v6815_v8 = vld [vmem:[%s7660_s5 + $0xb0] ss:$0 sm:$0xff] }
 0x176   : > { %v1808_v47 = vpack.c.bf16 %v1785_v9, %v1784_v17  ;;  %v5297_v57 = vpop.permute.xlu0 %5296  ;;  %v5304_v10 = vunpack.i.h.bf16 %v5302_v45  ;;  %v5303_v4 = vunpack.i.l.bf16 %v5302_v45 }
 0x177   : > { %v5299_v37 = vunpack.i.h.bf16 %v5297_v57  ;;  %v5298_v39 = vunpack.i.l.bf16 %v5297_v57 }
 0x178   : > { %4534 = vmatmul.mubr.msk.bf16.gmra.mrb[24].mxu0 %vm1831_vm12, %v1808_v47  ;;  %v1590_v61 = vsel %vm1559_vm5, %v1557_v23, %v5303_v4  ;;  %v1591_v1 = vsel %vm1559_vm5, %v1558_v22, %v5304_v10 }
 0x179   : > { %v5312_v48 = vpop.permute.xlu1 %5311  ;;  %v1589_v38 = vsel %vm1559_vm5, %v1556_v19, %v5299_v37  ;;  %v1588_v20 = vsel %vm1559_vm5, %v1555_v41, %v5298_v39  ;;  %vm2407_vm5 = vcmask 1042432  }
 0x17a   : > { %v5307_v46 = vpop.permute.xlu0 %5306  ;;  %v5314_v0 = vunpack.i.h.bf16 %v5312_v48  ;;  %v5313_v6 = vunpack.i.l.bf16 %v5312_v48 }
 0x17b   : > { %v5309_v62 = vunpack.i.h.bf16 %v5307_v46  ;;  %v5308_v44 = vunpack.i.l.bf16 %v5307_v46 }
 0x17c   : > { %v1623_v15 = vsel %vm1592_vm6, %v1590_v61, %v5313_v6  ;;  %v1624_v29 = vsel %vm1592_vm6, %v1591_v1, %v5314_v0 }
 0x17d   : > { %v5322_v56 = vpop.permute.xlu1 %5321  ;;  %v1621_v40 = vsel %vm1592_vm6, %v1588_v20, %v5308_v44  ;;  %v1622_v35 = vsel %vm1592_vm6, %v1589_v38, %v5309_v62  ;;  %vm2408_vm6 = vcmask 1046532  }
 0x17e   : > { %v5317_v33 = vpop.permute.xlu0 %5316  ;;  %v5324_v21 = vunpack.i.h.bf16 %v5322_v56  ;;  %v5323_v13 = vunpack.i.l.bf16 %v5322_v56 }
 0x17f   : > { %v5318_v31 = vunpack.i.l.bf16 %v5317_v33  ;;  %v5319_v34 = vunpack.i.h.bf16 %v5317_v33 }
 0x180   : > { %v1656_v25 = vsel %vm1625_vm7, %v1623_v15, %v5323_v13  ;;  %v1657_v26 = vsel %vm1625_vm7, %v1624_v29, %v5324_v21 }
 0x181   : > { %v5332_v16 = vpop.permute.xlu1 %5331  ;;  %v1654_v63 = vsel %vm1625_vm7, %v1621_v40, %v5318_v31  ;;  %v1655_v11 = vsel %vm1625_vm7, %v1622_v35, %v5319_v34  ;;  %vm7018_vm7 = vmor %vm1880_vm3, %vm2426_vm4  ;;  %vm2513_vm3 = vcmask 523264  }
 0x182   : > { %v5327_v24 = vpop.permute.xlu0 %5326  ;;  %v5333_v60 = vunpack.i.l.bf16 %v5332_v16  ;;  %v5334_v49 = vunpack.i.h.bf16 %v5332_v16 }
 0x183   : > { %v5328_v53 = vunpack.i.l.bf16 %v5327_v24  ;;  %v5329_v58 = vunpack.i.h.bf16 %v5327_v24 }
 0x184   : > { %v1689_v12 = vsel %vm1658_vm8, %v1656_v25, %v5333_v60  ;;  %v1690_v52 = vsel %vm1658_vm8, %v1657_v26, %v5334_v49 }
 0x185   : > { %v5342_v28 = vpop.permute.xlu1 %5341  ;;  %v1687_v51 = vsel %vm1658_vm8, %v1654_v63, %v5328_v53  ;;  %v1688_v45 = vsel %vm1658_vm8, %v1655_v11, %v5329_v58  ;;  %vm7025_vm8 = vmor %vm2407_vm5, %vm2408_vm6 }
 0x186   : > { %v5337_v36 = vpop.permute.xlu0 %5336  ;;  %v5344_v32 = vunpack.i.h.bf16 %v5342_v28  ;;  %v5343_v54 = vunpack.i.l.bf16 %v5342_v28 }
 0x187   : > { %v5338_v30 = vunpack.i.l.bf16 %v5337_v36  ;;  %v5339_v27 = vunpack.i.h.bf16 %v5337_v36 }
 0x188   : > { %v1722_v47 = vsel %vm1691_vm9, %v1689_v12, %v5343_v54  ;;  %v1723_v57 = vsel %vm1691_vm9, %v1690_v52, %v5344_v32 }
 0x189   : > { %v5352_v14 = vpop.permute.xlu1 %5351  ;;  %v1720_v48 = vsel %vm1691_vm9, %v1687_v51, %v5338_v30  ;;  %v1721_v56 = vsel %vm1691_vm9, %v1688_v45, %v5339_v27  ;;  %vm2516_vm9 = vcmask 785408  }
 0x18a   : > { %v5354_v50 = vunpack.i.h.bf16 %v5352_v14  ;;  %v5353_v7 = vunpack.i.l.bf16 %v5352_v14  ;;  %v5347_v5 = vpop.permute.xlu0 %5346 }
 0x18b   : > { %v5349_v59 = vunpack.i.h.bf16 %v5347_v5  ;;  %v5348_v9 = vunpack.i.l.bf16 %v5347_v5  ;;  %v4511_v17 = vpop.f32.mrb[0].mxu0 }
 0x18c   : > { %v1918_v46 = vpop.f32.mrb[1].mxu0  ;;  %v1755_v55 = vsel %vm1724_vm10, %v1722_v47, %v5353_v7  ;;  %v1756_v33 = vsel %vm1724_vm10, %v1723_v57, %v5354_v50  ;;  %v1927_v4 = vadd.f32 %v4511_v17, %v6815_v8 }
 0x18d   : > { %v1919_v18 = vadd.f32 %v6815_v8, %v1918_v46  ;;  %v4512_v42 = vpop.f32.mrb[2].mxu0  ;;  %v5362_v43 = vpop.permute.xlu1 %5361  ;;  %v1753_v10 = vsel %vm1724_vm10, %v1720_v48, %v5348_v9  ;;  %v1754_v0 = vsel %vm1724_vm10, %v1721_v56, %v5349_v59 }
 0x18e   : > { %v5364_v37 = vunpack.i.h.bf16 %v5362_v43  ;;  %v5363_v39 = vunpack.i.l.bf16 %v5362_v43  ;;  %v5357_v16 = vpop.permute.xlu0 %5356  ;;  %v1921_v19 = vpop.f32.mrb[3].mxu0  ;;  %v1930_v62 = vadd.f32 %v4512_v42, %v6815_v8  ;;  %v2047_v20 = vmax.f32 %v1927_v4, 0.0 }
 0x18f   : > { %v5359_v6 = vunpack.i.h.bf16 %v5357_v16  ;;  %v5358_v24 = vunpack.i.l.bf16 %v5357_v16  ;;  %v1922_v22 = vadd.f32 %v6815_v8, %v1921_v19  ;;  %v2045_v23 = vmax.f32 %v1919_v18, 0.0 }
 0x190   : > { %v1788_v44 = vsel %vm1757_vm11, %v1755_v55, %v5363_v39  ;;  %v1789_v41 = vsel %vm1757_vm11, %v1756_v33, %v5364_v37  ;;  %v2048_v28 = vmax.f32 %v1930_v62, 0.0  ;;  %v2080_v34 = vsel %vm1757_vm11, %v2047_v20, 0.0 }
 0x191   : > { %v1810_v61 = vpack.c.bf16 %v1789_v41, %v1788_v44  ;;  %v1786_v1 = vsel %vm1757_vm11, %v1753_v10, %v5358_v24  ;;  %v1787_v38 = vsel %vm1757_vm11, %v1754_v0, %v5359_v6  ;;  %v2046_v13 = vmax.f32 %v1922_v22, 0.0 }
 0x192   : > { %v1809_v21 = vpack.c.bf16 %v1787_v38, %v1786_v1  ;;  %v2077_v31 = vsel %vm1757_vm11, %v2045_v23, 0.0  ;;  %v2082_v36 = vsel %vm1757_vm11, %v2048_v28, 0.0 }
 0x193   : > { %v2078_v15 = vsel %vm1757_vm11, %v2046_v13, 0.0 }
 0x194   : > { %4537 = vmatprep.mubr.msk.bf16.mxu0 %vm1831_vm12, %v1809_v21  ;;  %v2079_v29 = vadd.f32 %v2078_v15, %v2077_v31 }
 0x195   : > { %4538 = vmatmul.mubr.msk.bf16.gmra.mrb[28].mxu0 %vm1831_vm12, %v1810_v61 }
 0x196   : > { %v2081_v60 = vadd.f32 %v2080_v34, %v2079_v29 }
 0x198   : > { %v2083_v40 = vadd.f32 %v2082_v36, %v2081_v60 }
 0x1ab   : > { %v4515_v35 = vpop.f32.mrb[4].mxu0 }
 0x1ac   : > { %v1934_v49 = vpop.f32.mrb[5].mxu0  ;;  %v1943_v53 = vadd.f32 %v4515_v35, %v6815_v8  ;;  %v5467_v35 = vld [vmem:[%s7659_s4] ss:$12 sps:$4 sm:$0xff]  }
 0x1ad   : > { %v1935_v58 = vadd.f32 %v6815_v8, %v1934_v49  ;;  %v4516_v32 = vpop.f32.mrb[6].mxu0  ;;  %v5468_v49 = vld [vmem:[%s7659_s4 + $0x1c] ss:$12 sps:$4 sm:$0xff]  }
 0x1ae   : > { %v1937_v54 = vpop.f32.mrb[7].mxu0  ;;  %v1946_v25 = vadd.f32 %v4516_v32, %v6815_v8  ;;  %v2051_v63 = vmax.f32 %v1943_v53, 0.0  ;;  %v5620_v53 = vmov 0  }
 0x1af   : > { %v2049_v30 = vmax.f32 %v1935_v58, 0.0  ;;  %v1938_v26 = vadd.f32 %v6815_v8, %v1937_v54  ;;  %2218 = vmatprep.mubr.bf16.mxu1 %v5620_v53  ;;  %v5470_v58 = vld [vmem:[%s7659_s4 + $0x18] ss:$12 sps:$4 sm:$0xff]   ;;  %5396 = vset.pattern.permute.xlu0 %v5620_v53 }
 0x1b0   : > { %v2052_v12 = vmax.f32 %v1946_v25, 0.0  ;;  %v2088_v5 = vsel %vm1757_vm11, %v2051_v63, 0.0  ;;  %5395 = vset.pattern.permute.xlu1 %v5620_v53 }
 0x1b1   : > { %v2084_v27 = vsel %vm1757_vm11, %v2049_v30, 0.0  ;;  %v2050_v14 = vmax.f32 %v1938_v26, 0.0 }
 0x1b2   : > { %v2085_v11 = vadd.f32 %v2084_v27, %v2083_v40  ;;  %v2090_v51 = vsel %vm1757_vm11, %v2052_v12, 0.0  ;;  %v5465_v40 = vld [vmem:[%s7659_s4 + $0x4] ss:$12 sps:$4 sm:$0xff]  }
 0x1b3   : > { %v2086_v50 = vsel %vm1757_vm11, %v2050_v14, 0.0  ;;  %2186 = vmatprep.subr.bf16.mxu1 %v5465_v40 }
 0x1b4   : > { %v2087_v7 = vadd.f32 %v2086_v50, %v2085_v11  ;;  %2187 = vmatpush1.bf16.msra.mxu1 %v5467_v35 }
 0x1b5   : > { %2188 = vmatprep.subr.bf16.mxu1 %v5468_v49 }
 0x1b6   : > { %v2089_v52 = vadd.f32 %v2088_v5, %v2087_v7 }
 0x1b8   : > { %v2091_v59 = vadd.f32 %v2090_v51, %v2089_v52  ;;  %2189 = vmatpush1.bf16.msra.mxu1 %v5470_v58 }
 0x1cb   : > { %v4519_v9 = vpop.f32.mrb[8].mxu0 }
 0x1cc   : > { %v1950_v17 = vpop.f32.mrb[9].mxu0  ;;  %v1959_v45 = vadd.f32 %v4519_v9, %v6815_v8 }
 0x1cd   : > { %v1951_v47 = vadd.f32 %v6815_v8, %v1950_v17  ;;  %v4520_v57 = vpop.f32.mrb[10].mxu0 }
 0x1ce   : > { %v1953_v48 = vpop.f32.mrb[11].mxu0  ;;  %v1962_v56 = vadd.f32 %v4520_v57, %v6815_v8  ;;  %v2055_v33 = vmax.f32 %v1959_v45, 0.0 }
 0x1cf   : > { %v2053_v46 = vmax.f32 %v1951_v47, 0.0  ;;  %v1954_v55 = vadd.f32 %v6815_v8, %v1953_v48 }
 0x1d0   : > { %v2056_v10 = vmax.f32 %v1962_v56, 0.0  ;;  %v2096_v39 = vsel %vm1757_vm11, %v2055_v33, 0.0 }
 0x1d1   : > { %v2092_v18 = vsel %vm1757_vm11, %v2053_v46, 0.0  ;;  %v2054_v42 = vmax.f32 %v1954_v55, 0.0 }
 0x1d2   : > { %v2093_v43 = vadd.f32 %v2092_v18, %v2091_v59  ;;  %v2098_v19 = vsel %vm1757_vm11, %v2056_v10, 0.0 }
 0x1d3   : > { %v2094_v4 = vsel %vm1757_vm11, %v2054_v42, 0.0 }
 0x1d4   : > { %v2095_v37 = vadd.f32 %v2094_v4, %v2093_v43 }
 0x1d6   : > { %v2097_v16 = vadd.f32 %v2096_v39, %v2095_v37 }
 0x1d8   : > { %v2099_v0 = vadd.f32 %v2098_v19, %v2097_v16 }
 0x1eb   : > { %v4523_v6 = vpop.f32.mrb[12].mxu0 }
 0x1ec   : > { %v1966_v24 = vpop.f32.mrb[13].mxu0  ;;  %v1975_v22 = vadd.f32 %v4523_v6, %v6815_v8 }
 0x1ed   : > { %v1967_v23 = vadd.f32 %v6815_v8, %v1966_v24  ;;  %v4524_v62 = vpop.f32.mrb[14].mxu0 }
 0x1ee   : > { %v1969_v44 = vpop.f32.mrb[15].mxu0  ;;  %v1978_v61 = vadd.f32 %v4524_v62, %v6815_v8  ;;  %v2059_v38 = vmax.f32 %v1975_v22, 0.0 }
 0x1ef   : > { %v2057_v41 = vmax.f32 %v1967_v23, 0.0  ;;  %v1970_v1 = vadd.f32 %v6815_v8, %v1969_v44 }
 0x1f0   : > { %v2060_v31 = vmax.f32 %v1978_v61, 0.0  ;;  %v2104_v29 = vsel %vm1757_vm11, %v2059_v38, 0.0 }
 0x1f1   : > { %v2100_v20 = vsel %vm1757_vm11, %v2057_v41, 0.0  ;;  %v2058_v21 = vmax.f32 %v1970_v1, 0.0 }
 0x1f2   : > { %v2101_v13 = vadd.f32 %v2100_v20, %v2099_v0  ;;  %v2106_v60 = vsel %vm1757_vm11, %v2060_v31, 0.0 }
 0x1f3   : > { %v2102_v28 = vsel %vm1757_vm11, %v2058_v21, 0.0 }
 0x1f4   : > { %v2103_v15 = vadd.f32 %v2102_v28, %v2101_v13 }
 0x1f6   : > { %v2105_v34 = vadd.f32 %v2104_v29, %v2103_v15 }
 0x1f8   : > { %v2107_v36 = vadd.f32 %v2106_v60, %v2105_v34 }
 0x20b   : > { %v4527_v32 = vpop.f32.mrb[16].mxu0 }
 0x20c   : > { %v1982_v54 = vpop.f32.mrb[17].mxu0  ;;  %v1991_v30 = vadd.f32 %v4527_v32, %v6815_v8 }
 0x20d   : > { %v1983_v25 = vadd.f32 %v6815_v8, %v1982_v54  ;;  %v4528_v26 = vpop.f32.mrb[18].mxu0 }
 0x20e   : > { %v1985_v63 = vpop.f32.mrb[19].mxu0  ;;  %v1994_v14 = vadd.f32 %v4528_v26, %v6815_v8  ;;  %v2063_v12 = vmax.f32 %v1991_v30, 0.0 }
 0x20f   : > { %v2061_v27 = vmax.f32 %v1983_v25, 0.0  ;;  %v1986_v11 = vadd.f32 %v6815_v8, %v1985_v63 }
 0x210   : > { %v2064_v52 = vmax.f32 %v1994_v14, 0.0  ;;  %v2112_v9 = vsel %vm1757_vm11, %v2063_v12, 0.0 }
 0x211   : > { %v2108_v50 = vsel %vm1757_vm11, %v2061_v27, 0.0  ;;  %v2062_v7 = vmax.f32 %v1986_v11, 0.0 }
 0x212   : > { %v2109_v5 = vadd.f32 %v2108_v50, %v2107_v36  ;;  %v2114_v45 = vsel %vm1757_vm11, %v2064_v52, 0.0 }
 0x213   : > { %v2110_v51 = vsel %vm1757_vm11, %v2062_v7, 0.0 }
 0x214   : > { %v2111_v59 = vadd.f32 %v2110_v51, %v2109_v5 }
 0x216   : > { %v2113_v17 = vadd.f32 %v2112_v9, %v2111_v59 }
 0x218   : > { %v2115_v47 = vadd.f32 %v2114_v45, %v2113_v17 }
 0x22b   : > { %v4531_v57 = vpop.f32.mrb[20].mxu0 }
 0x22c   : > { %v1998_v48 = vpop.f32.mrb[21].mxu0  ;;  %v2007_v46 = vadd.f32 %v4531_v57, %v6815_v8 }
 0x22d   : > { %v1999_v56 = vadd.f32 %v6815_v8, %v1998_v48  ;;  %v4532_v55 = vpop.f32.mrb[22].mxu0 }
 0x22e   : > { %v2001_v33 = vpop.f32.mrb[23].mxu0  ;;  %v2010_v42 = vadd.f32 %v4532_v55, %v6815_v8  ;;  %v2067_v10 = vmax.f32 %v2007_v46, 0.0 }
 0x22f   : > { %v2065_v18 = vmax.f32 %v1999_v56, 0.0  ;;  %v2002_v43 = vadd.f32 %v6815_v8, %v2001_v33  ;;  %v2291_v33 = vld [vmem:[%s7660_s5 + $0x10] sm:$0xff] }
 0x230   : > { %v2068_v16 = vmax.f32 %v2010_v42, 0.0  ;;  %v2120_v6 = vsel %vm1757_vm11, %v2067_v10, 0.0  ;;  %v2293_v10 = vld [vmem:[%s7660_s5 + $0x20] sm:$0xff] }
 0x231   : > { %v2116_v4 = vsel %vm1757_vm11, %v2065_v18, 0.0  ;;  %v2066_v37 = vmax.f32 %v2002_v43, 0.0  ;;  %v2292_v18 = vld [vmem:[%s7660_s5 + $0x18] sm:$0xff]  ;;  %v5621_v43 = vmov 0.0|0.0  }
 0x232   : > { %v2117_v39 = vadd.f32 %v2116_v4, %v2115_v47  ;;  %v2122_v22 = vsel %vm1757_vm11, %v2068_v16, 0.0  ;;  %v4629_v42 = vpack.c.bf16 %v2292_v18, %v2291_v33  ;;  %4628 = vmatprep.subr.bf16.mxu1 %v5621_v43  ;;  %v2294_v4 = vld [vmem:[%s7660_s5 + $0x28] sm:$0xff]  ;;  %v2173_v16 = vlaneseq }
 0x233   : > { %v2118_v19 = vsel %vm1757_vm11, %v2066_v37, 0.0  ;;  %v4632_v37 = vpack.c.bf16 %v2294_v4, %v2293_v10 }
 0x234   : > { %v2119_v0 = vadd.f32 %v2118_v19, %v2117_v39  ;;  %v7683_v39 = vmov 0.0   ;;  %v6927_v19 = vshrl.u32 %v2173_v16, 7  ;;  %vm2270_vm14 = vcmp.lt.s32.totalorder %v2173_v16, 256 }
 0x236   : > { %v2121_v24 = vadd.f32 %v2120_v6, %v2119_v0  ;;  %v6930_v0 = vsub.s32 0, %v6927_v19  ;;  %v2151_v6 = vld [vmem:[%s7661_s6] ss:$8 sm:$0x3] }
 0x238   : > { %v2123_v23 = vadd.f32 %v2122_v22, %v2121_v24  ;;  %v2179_v24 = vsub.s32 1, %v6927_v19  ;;  %v4304_v22 = vld [vmem:[%s7661_s6 + $0x1] ss:$8 sm:$0x3] }
 0x24b   : > { %v4535_v62 = vpop.f32.mrb[24].mxu0 }
 0x24c   : > { %v2014_v44 = vpop.f32.mrb[25].mxu0  ;;  %v2023_v41 = vadd.f32 %v4535_v62, %v6815_v8 }
 0x24d   : > { %v2015_v61 = vadd.f32 %v6815_v8, %v2014_v44  ;;  %v4536_v1 = vpop.f32.mrb[26].mxu0  ;;  %v2176_v44 = vrot.slane %v2151_v6, %v6930_v0 }
 0x24e   : > { %v2017_v38 = vpop.f32.mrb[27].mxu0  ;;  %v2026_v21 = vadd.f32 %v4536_v1, %v6815_v8  ;;  %v2071_v31 = vmax.f32 %v2023_v41, 0.0  ;;  %v2180_v41 = vrot.slane %v2151_v6, %v2179_v24  ;;  %v5488_v6 = vld [vmem:[%s7658_s3 + $0x4c] sm:$0xff]  }
 0x24f   : > { %v2069_v20 = vmax.f32 %v2015_v61, 0.0  ;;  %v2018_v13 = vadd.f32 %v6815_v8, %v2017_v38  ;;  %v2233_v61 = vrot.slane %v4304_v22, %v6930_v0  ;;  %v2237_v38 = vrot.slane %v4304_v22, %v2179_v24 }
 0x250   : > { %v2072_v34 = vmax.f32 %v2026_v21, 0.0  ;;  %v2128_v40 = vsel %vm1757_vm11, %v2071_v31, 0.0 }
 0x251   : > { %v2124_v28 = vsel %vm1757_vm11, %v2069_v20, 0.0  ;;  %v2070_v15 = vmax.f32 %v2018_v13, 0.0 }
 0x252   : > { %v2125_v29 = vadd.f32 %v2124_v28, %v2123_v23  ;;  %v2130_v49 = vsel %vm1757_vm11, %v2072_v34, 0.0  ;;  %v5623_v23 = vmov 1966171168  }
 0x253   : > { %v2126_v60 = vsel %vm1757_vm11, %v2070_v15, 0.0  ;;  %v2248_v62 = vunpack.c.l.s4 %v5623_v23 }
 0x254   : > { %v2127_v36 = vadd.f32 %v2126_v60, %v2125_v29 }
 0x255   : > { %v2249_v20 = vunpack.c.0.s8 %v2248_v62 }
 0x256   : > { %v2129_v35 = vadd.f32 %v2128_v40, %v2127_v36  ;;  %v4306_v40 = vld [vmem:[%s7661_s6 + $0x3] ss:$8 sm:$0x3] }
 0x257   : > { %v6943_v60 = vsub.s32 %v2249_v20, %v6927_v19 }
 0x258   : > { %v2131_v53 = vadd.f32 %v2130_v49, %v2129_v35  ;;  %v2265_v35 = vld [vmem:[%s346_s18] sm:$0x3]  ;;  %s4663_s18 = smul.u32 80, %s5738_s17  ;;  %s7693_s17 = smov 64  }
 0x25a   : > { %s7133_s22 = scalar_lea.vmem %s7657_s2, %s4663_s18 }
 0x268   : > { %v4539_v58 = vpop.f32.mrb[28].mxu0 }
 0x269   : > { %v2030_v32 = vpop.f32.mrb[29].mxu0  ;;  %v2039_v54 = vadd.f32 %v4539_v58, %v6815_v8 }
 0x26a   : > { %v2031_v30 = vadd.f32 %v6815_v8, %v2030_v32  ;;  %v4540_v25 = vpop.f32.mrb[30].mxu0  ;;  %v2266_v32 = vmul.f32 %v4306_v40, %v2265_v35 }
 0x26b   : > { %v2033_v26 = vpop.f32.mrb[31].mxu0  ;;  %v2042_v27 = vadd.f32 %v4540_v25, %v6815_v8  ;;  %v2075_v11 = vmax.f32 %v2039_v54, 0.0  ;;  %v5473_v25 = vld [vmem:[%s7658_s3 + $0x54] sm:$0xff]  }
 0x26c   : > { %v2073_v63 = vmax.f32 %v2031_v30, 0.0  ;;  %v2034_v14 = vadd.f32 %v6815_v8, %v2033_v26  ;;  %v5474_v26 = vld [vmem:[%s7658_s3 + $0x14] sm:$0xff]  }
 0x26d   : > { %v2076_v5 = vmax.f32 %v2042_v27, 0.0  ;;  %v2136_v59 = vsel %vm1757_vm11, %v2075_v11, 0.0  ;;  %v5476_v27 = vld [vmem:[%s7658_s3 + $0x1c] sm:$0xff]   ;;  %v5478_v11 = vld [vmem:[%s7658_s3 + $0x24] sm:$0xff]  }
 0x26e   : > { %v2132_v12 = vsel %vm1757_vm11, %v2073_v63, 0.0  ;;  %v2074_v50 = vmax.f32 %v2034_v14, 0.0  ;;  %v5475_v63 = vld [vmem:[%s7658_s3 + $0x5c] sm:$0xff]   ;;  %v5477_v14 = vld [vmem:[%s7658_s3 + $0x64] sm:$0xff]  }
 0x26f   : > { %v2133_v7 = vadd.f32 %v2132_v12, %v2131_v53  ;;  %v2138_v17 = vsel %vm1757_vm11, %v2076_v5, 0.0  ;;  %v4305_v53 = vld [vmem:[%s7661_s6 + $0x2] ss:$8 sm:$0x3]  ;;  %v5479_v12 = vld [vmem:[%s7658_s3 + $0x6c] sm:$0xff]  }
 0x270   : > { %v2134_v52 = vsel %vm1757_vm11, %v2074_v50, 0.0  ;;  %v5480_v50 = vld [vmem:[%s7658_s3 + $0x2c] sm:$0xff]   ;;  %v2273_v5 = vld [vmem:[%s7660_s5] sm:$0xff] }
 0x271   : > { %v2135_v51 = vadd.f32 %v2134_v52, %v2133_v7  ;;  %v6994_v7 = vsel %vm2393_vm15, %v5729_v2, 0.0  ;;  %v2274_v52 = vld [vmem:[%s7660_s5 + $0x8] sm:$0xff] }
 0x272   : > { %v4312_v18 = vrot.slane %v6994_v7, 10 }
 0x273   : > { %v2137_v9 = vadd.f32 %v2136_v59, %v2135_v51  ;;  %v2295_v51 = vld [vmem:[%s7660_s5 + $0xb3] sm:$0x1] }
 0x275   : > { %v2139_v45 = vadd.f32 %v2138_v17, %v2137_v9  ;;  %v2403_v9 = vcombine.high %v6994_v7, %v6994_v7  ;;  %v2277_v17 = vcombine.high %v2273_v5, %v2273_v5 }
 0x277   : > { %v2140_v47 = vrot.slane %v2139_v45, 4  ;;  %v2412_v33 = vrot.slane %v2403_v9, 5 }
 0x279   : > { %v2141_v57 = vadd.f32 %v2140_v47, %v2139_v45  ;;  %v2278_v45 = vcombine.high %v2274_v52, %v2274_v52 }
 0x27b   : > { %v2142_v48 = vrot.slane %v2141_v57, 2 }
 0x27d   : > { %v2143_v46 = vadd.f32 %v2142_v48, %v2141_v57  ;;  %v5481_v48 = vld [vmem:[%s7658_s3 + $0x74] sm:$0xff]  }
 0x27f   : > { %v2144_v8 = vrot.slane %v2143_v46, 1 }
 0x281   : > { %v2145_v56 = vadd.f32 %v2144_v8, %v2143_v46  ;;  %v5482_v46 = vld [vmem:[%s7658_s3 + $0x34] sm:$0xff]  }
 0x283   : > { %v2150_v55 = vpack.c.bf16 %v2145_v56, %v2145_v56 }
 0x285   : > { %4303 = vmatmul.mubr.msk.bf16.vlgmr.msra.gmra.mrb[0].mxu1 %vm1757_vm11, %v2150_v55  ;;  %v4308_v55 = vrot.slane %v6994_v7, 9 }
 0x286   : > { %4630 = vmatpush3.bf16.msra.mxu1 %v4629_v42  ;;  %4549 = vmatprep.mubr.msk.f32.mxu1 %vm5622_vm13, %v7683_v39  ;;  %v2430_v42 = vrot.slane %v2403_v9, 6 }
 0x287   : > { %4631 = vmatprep.subr.bf16.mxu1 %v5621_v43 }
 0x28a   : > { %4633 = vmatpush3.bf16.msra.mxu1 %v4632_v37 }
 0x28b   : > { %4406 = vmatprep.subr.bf16.mxu1 %v5473_v25 }
 0x358   : > { %v2220_v1 = vpop.f32.mrb[0].mxu1 }
 0x359   : > { %v2221_v21 = vadd.f32 %v2220_v1, %v2176_v44  ;;  %v2222_v13 = vpop.f32.mrb[1].mxu1  ;;  %v7031_v44 = vsel %vm7025_vm8, %v4308_v55, %v2412_v33  ;;  %v5485_v55 = vld [vmem:[%s7658_s3 + $0x84] sm:$0xff]  }
 0x35a   : > { %v2223_v31 = vadd.f32 %v2222_v13, %v2180_v41  ;;  %v2224_v28 = vpop.f32.mrb[2].mxu1  ;;  %v2431_v41 = vsel %vm7018_vm7, %v4312_v18, %v2430_v42  ;;  %v5486_v33 = vld [vmem:[%s7658_s3 + $0x44] sm:$0xff]  }
 0x35b   : > { %v2240_v15 = vadd.f32 %v2233_v61, %v2221_v21  ;;  %v2225_v29 = vpop.f32.mrb[3].mxu1 }
 0x35c   : > { %v2241_v34 = vadd.f32 %v2237_v38, %v2223_v31 }
 0x35e   : > { %v2246_v36 = vcombine.low %v2240_v15, %v2241_v34 }
 0x360   : > { %v2253_v49 = vrot.slane %v2246_v36, %v6943_v60 }
 0x362   : > { %v2260_v58 = vrot.slane %v2253_v49, %v6943_v60 }
 0x364   : > { %v2262_v54 = vmul.f32 %v4305_v53, %v2260_v58 }
 0x366   : > { %v6960_v30 = vadd.f32 %v2266_v32, %v2262_v54 }
 0x368   : > { %4550 = vmatmul.mubr.msk.f32.vlgmr.msra.gmra.mrb[4].mxu1 %vm1757_vm11, %v6960_v30  ;;  %2272 = vst.msk [vmem:[%s6964_s24] sm:$0x3] %vm2270_vm14, %v6960_v30 }
 0x369   : > { %4407 = vmatpush3.bf16.msra.mxu1 %v5474_v26  ;;  %v5483_v26 = vld [vmem:[%s7658_s3 + $0x7c] sm:$0xff]  }
 0x36a   : > { %4408 = vmatprep.subr.bf16.mxu1 %v5475_v63  ;;  %v5484_v63 = vld [vmem:[%s7658_s3 + $0x3c] sm:$0xff]  }
 0x36d   : > { %4409 = vmatpush3.bf16.msra.mxu1 %v5476_v27 }
 0x36e   : > { %4410 = vmatprep.subr.bf16.mxu1 %v5477_v14 }
 0x371   : > { %4411 = vmatpush3.bf16.msra.mxu1 %v5478_v11 }
 0x372   : > { %4412 = vmatprep.subr.bf16.mxu1 %v5479_v12 }
 0x375   : > { %4413 = vmatpush3.bf16.msra.mxu1 %v5480_v50 }
 0x376   : > { %4414 = vmatprep.subr.bf16.mxu1 %v5481_v48 }
 0x379   : > { %4415 = vmatpush3.bf16.msra.mxu1 %v5482_v46 }
 0x37a   : > { %4416 = vmatprep.subr.bf16.mxu1 %v5483_v26 }
 0x37d   : > { %4417 = vmatpush3.bf16.msra.mxu1 %v5484_v63 }
 0x37e   : > { %4418 = vmatprep.subr.bf16.mxu1 %v5485_v55 }
 0x381   : > { %4419 = vmatpush3.bf16.msra.mxu1 %v5486_v33 }
 0x43b   : > { %v2365_v59 = vpop.f32.mrb[4].mxu1 }
 0x43c   : > { %v7007_v47 = vadd.f32 %v2365_v59, %v2295_v51  ;;  %v4551_v57 = vpop.f32.mrb[5].mxu1 }
 0x43e   : > { %v2372_v8 = vrot.slane %v7007_v47, %v6930_v0 }
 0x440   : > { %v2373_v10 = vmul.f32 %v2372_v8, %v2273_v5  ;;  %v2374_v4 = vmul.f32 %v2372_v8, %v2277_v17  ;;  %v2375_v37 = vmul.f32 %v2372_v8, %v2274_v52  ;;  %v2376_v16 = vmul.f32 %v2372_v8, %v2278_v45 }
 0x442   : > { %v2381_v24 = vrot.slane %v2373_v10, 7  ;;  %v2382_v22 = vrot.slane %v2374_v4, 7  ;;  %v2383_v23 = vrot.slane %v2375_v37, 7  ;;  %v2384_v62 = vrot.slane %v2376_v16, 7 }
 0x444   : > { %v2389_v61 = vsel %vm418_vm0, 0.0, %v2381_v24  ;;  %v2390_v1 = vsel %vm418_vm0, 0.0, %v2382_v22  ;;  %v2391_v38 = vsel %vm418_vm0, 0.0, %v2383_v23  ;;  %v2392_v20 = vsel %vm418_vm0, 0.0, %v2384_v62 }
 0x445   : > { %v7040_v21 = vsel %vm2393_vm15, %v2389_v61, 0.0  ;;  %v7043_v13 = vsel %vm2393_vm15, %v2390_v1, 0.0  ;;  %v7046_v31 = vsel %vm2393_vm15, %v2391_v38, 0.0  ;;  %v7049_v28 = vsel %vm2393_vm15, %v2392_v20, 0.0 }
 0x446   : > { %v7053_v15 = vcombine.low %v7043_v13, %v7046_v31  ;;  %v2494_v29 = vcombine.low %v7049_v28, %v6994_v7  ;;  %v2404_v34 = vcombine.high %v7040_v21, %v7040_v21  ;;  %v2405_v36 = vcombine.high %v7043_v13, %v7043_v13 }
 0x447   : > { %v2406_v40 = vcombine.high %v7046_v31, %v7046_v31  ;;  %v4313_v35 = vrot.slane %v7040_v21, 10  ;;  %v4314_v49 = vrot.slane %v7043_v13, 10  ;;  %v4315_v53 = vrot.slane %v7046_v31, 10 }
 0x448   : > { %v5365_v58 = vpack.i.bf16 %v2494_v29, %v7053_v15  ;;  %v2434_v32 = vrot.slane %v2404_v34, 6  ;;  %v2438_v54 = vrot.slane %v2405_v36, 6  ;;  %v2445_v25 = vcombine.high %v7049_v28, %v7049_v28 }
 0x449   : > { %v2442_v27 = vrot.slane %v2406_v40, 6  ;;  %v4317_v14 = vrot.slane %v7049_v28, 10  ;;  %v4309_v11 = vrot.slane %v7040_v21, 9  ;;  %v2416_v12 = vrot.slane %v2404_v34, 5 }
 0x44a   : > { %5366 = vrot.lane.b32.xlu0 %v5365_v58, %s7675_s10  ;;  %v2435_v50 = vsel %vm7018_vm7, %v4313_v35, %v2434_v32  ;;  %v2439_v5 = vsel %vm7018_vm7, %v4314_v49, %v2438_v54  ;;  %v2452_v52 = vrot.slane %v2445_v25, 6  ;;  %v4310_v51 = vrot.slane %v7043_v13, 9 }
 0x44b   : > { %v2443_v59 = vsel %vm7018_vm7, %v4315_v53, %v2442_v27  ;;  %v2486_v9 = vcombine.low %v2435_v50, %v2439_v5  ;;  %v2417_v17 = vsel %vm7025_vm8, %v4309_v11, %v2416_v12  ;;  %v2420_v45 = vrot.slane %v2405_v36, 5 }
 0x44c   : > { %v2453_v57 = vsel %vm7018_vm7, %v4317_v14, %v2452_v52  ;;  %v4311_v48 = vrot.slane %v7046_v31, 9  ;;  %v2424_v46 = vrot.slane %v2406_v40, 5  ;;  %v2458_v8 = vcombine.low %v7031_v44, %v2417_v17 }
 0x44d   : > { %v2487_v18 = vcombine.low %v2443_v59, %v2453_v57  ;;  %v2421_v42 = vsel %vm7025_vm8, %v4310_v51, %v2420_v45  ;;  %v4316_v56 = vrot.slane %v7049_v28, 9  ;;  %v2448_v10 = vrot.slane %v2445_v25, 5 }
 0x44e   : > { %v2425_v4 = vsel %vm7025_vm8, %v4311_v48, %v2424_v46  ;;  %v2466_v37 = vcombine.low %v2431_v41, %v2435_v50  ;;  %v2467_v16 = vcombine.low %v2439_v5, %v2443_v59  ;;  %v2508_v24 = vcombine.low %v2453_v57, %v2431_v41  ;;  %v5487_v41 = vld [vmem:[%s7658_s3 + $0x8c] sm:$0xff]  }
 0x44f   : > { %v5370_v22 = vpack.i.bf16 %v2487_v18, %v2486_v9  ;;  %v2459_v23 = vcombine.low %v2421_v42, %v2425_v4  ;;  %v2449_v62 = vsel %vm7025_vm8, %v4316_v56, %v2448_v10  ;;  %v2482_v34 = vcombine.low %v2417_v17, %v2421_v42  ;;  %4420 = vmatprep.subr.bf16.mxu1 %v5487_v41 }
 0x450   : > { %v2501_v61 = vcombine.low %v2449_v62, %v7031_v44  ;;  %v7105_v1 = vpack.c.bf16 %v2508_v24, %v2467_v16  ;;  %v5380_v38 = vpack.i.bf16 %v2467_v16, %v2466_v37  ;;  %v2483_v29 = vcombine.low %v2425_v4, %v2449_v62  ;;  %4421 = vmatpush3.bf16.msra.mxu1 %v5488_v6  ;;  %v2757_v37 = vld [vmem:[%s7660_s5 + $0x70] sm:$0xff]  ;;  %v2758_v16 = vld [vmem:[%s7660_s5 + $0x78] sm:$0xff]  ;;  %v5491_v6 = vld [vmem:[%s7658_s3 + $0x124] sm:$0xff]  }
 0x451   : > { %5371 = vrot.lane.b32.xlu0 %v5370_v22, %s7688_s12  ;;  %v5375_v20 = vpack.i.bf16 %v2459_v23, %v2458_v8  ;;  %v2474_v36 = vcombine.low %v7040_v21, %v7043_v13  ;;  %v2475_v40 = vcombine.low %v7046_v31, %v7049_v28  ;;  %4552 = vmatprep.subr.bf16.mxu1 %v7683_v39  ;;  %v2282_v13 = vld [vmem:[%s7133_s22 + $0x8] sm:$0xff]  ;;  %v2281_v31 = vld [vmem:[%s7133_s22] sm:$0xff] }
 0x452   : > { %v5385_v44 = vpack.i.bf16 %v2501_v61, %v2459_v23  ;;  %v7124_v35 = vrot.slane %v6960_v30, %v6930_v0  ;;  %v2454_v48 = vcombine.low %v6994_v7, %v7040_v21  ;;  %v5489_v7 = vld [vmem:[%s7658_s3 + $0x94] sm:$0xff]   ;;  %v4635_v24 = vpack.c.bf16 %v2758_v16, %v2757_v37  ;;  %v2759_v22 = vld [vmem:[%s7660_s5 + $0x80] sm:$0xff]  ;;  %v2760_v23 = vld [vmem:[%s7660_s5 + $0x88] sm:$0xff] }
 0x453   : > { %5376 = vrot.lane.b32.xlu1 %v5375_v20, %s7688_s12  ;;  %v5390_v49 = vpack.i.bf16 %v2475_v40, %v2474_v36  ;;  %v4638_v62 = vpack.c.bf16 %v2760_v23, %v2759_v22  ;;  %v3049_v61 = vld [vmem:[%s7660_s5 + $0x30] sm:$0xff]  ;;  %v5493_v36 = vld [vmem:[%s7658_s3 + $0xe4] sm:$0xff]  }
 0x454   : > { %v5494_v40 = vld [vmem:[%s7658_s3 + $0xa4] sm:$0xff]   ;;  %4441 = vmatprep.subr.bf16.mxu0 %v5493_v36  ;;  %v4338_v16 = vld [vmem:[%s7660_s5 + $0xb1] ss:$0 sm:$0xff] }
 0x455   : > { %5386 = vrot.lane.b32.xlu0 %v5385_v44, %s7673_s13  ;;  %v5492_v44 = vld [vmem:[%s7658_s3 + $0x12c] sm:$0xff]   ;;  %4442 = vmatpush3.bf16.msra.mxu0 %v5494_v40 }
 0x457   : > { %5381 = vrot.lane.b32.xlu1 %v5380_v38, %s7675_s10  ;;  %v3050_v38 = vld [vmem:[%s7660_s5 + $0x38] sm:$0xff] }
 0x458   : > { %v4641_v20 = vpack.c.bf16 %v3050_v38, %v3049_v61 }
 0x459   : > { %3058 = vrot.lane.b32.xlu0 %v7124_v35, %s7673_s13 }
 0x45b   : > { %5391 = vrot.lane.b32.xlu1 %v5390_v49, %s7673_s13  ;;  %v5495_v49 = vld [vmem:[%s7658_s3 + $0xec] sm:$0xff]   ;;  %s7580_s13 = scalar_lea.hbm %s7662_s7, %s4380_s25 }
 0x45c   : > { %4443 = vmatprep.subr.bf16.mxu0 %v5495_v49 }
 0x45d   : > { %2849 = vperm.xlu0 %5396, %v2282_v13   ;;  %v5496_v13 = vld [vmem:[%s7658_s3 + $0xac] sm:$0xff]  }
 0x45e   : > { %4444 = vmatpush3.bf16.msra.mxu0 %v5496_v13 }
 0x45f   : > { %2844 = vperm.xlu1 %5395, %v2281_v31   ;;  %v5497_v31 = vld [vmem:[%s7658_s3 + $0xf4] sm:$0xff]  }
 0x460   : > { %4445 = vmatprep.subr.bf16.mxu0 %v5497_v31 }
 0x4bc   : > { %v5367_v30 = vpop.permute.xlu0 %5366 }
 0x4bd   : > { %v5369_v26 = vunpack.i.h.bf16 %v5367_v30  ;;  %v5368_v63 = vunpack.i.l.bf16 %v5367_v30 }
 0x4c3   : > { %v5372_v28 = vpop.permute.xlu0 %5371 }
 0x4c4   : > { %v5374_v53 = vunpack.i.h.bf16 %v5372_v28  ;;  %v5373_v58 = vunpack.i.l.bf16 %v5372_v28 }
 0x4c5   : > { %v5377_v32 = vpop.permute.xlu1 %5376 }
 0x4c6   : > { %v2520_v54 = vsel %vm1757_vm11, %v2483_v29, %v5374_v53  ;;  %v2519_v25 = vsel %vm1757_vm11, %v2482_v34, %v5373_v58  ;;  %v5379_v52 = vunpack.i.h.bf16 %v5377_v32  ;;  %v5378_v51 = vunpack.i.l.bf16 %v5377_v32  ;;  %v3051_v29 = vld [vmem:[%s7660_s5 + $0x40] sm:$0xff]  ;;  %v3052_v34 = vld [vmem:[%s7660_s5 + $0x48] sm:$0xff]  ;;  %v5498_v32 = vld [vmem:[%s7658_s3 + $0xb4] sm:$0xff]  }
 0x4c7   : > { %v5387_v27 = vpop.permute.xlu0 %5386  ;;  %v2521_v50 = vsel %vm2513_vm3, %v2519_v25, %v5368_v63  ;;  %v2522_v5 = vsel %vm2513_vm3, %v2520_v54, %v5369_v26  ;;  %v4644_v41 = vpack.c.bf16 %v3052_v34, %v3051_v29  ;;  %v5499_v25 = vld [vmem:[%s7658_s3 + $0xfc] sm:$0xff]   ;;  %4446 = vmatpush3.bf16.msra.mxu0 %v5498_v32 }
 0x4c8   : > { %v5389_v14 = vunpack.i.h.bf16 %v5387_v27  ;;  %v5388_v11 = vunpack.i.l.bf16 %v5387_v27  ;;  %v2512_v8 = vsel %vm1757_vm11, %v7053_v15, %v5379_v52  ;;  %v2511_v55 = vsel %vm1757_vm11, %v2454_v48, %v5378_v51  ;;  %v5490_v15 = vld [vmem:[%s7658_s3 + $0x9c] sm:$0xff]   ;;  %4447 = vmatprep.subr.bf16.mxu0 %v5499_v25  ;;  %v5501_v27 = vld [vmem:[%s7658_s3 + $0x104] sm:$0xff]  }
 0x4c9   : > { %v5382_v12 = vpop.permute.xlu1 %5381  ;;  %v5500_v63 = vld [vmem:[%s7658_s3 + $0xbc] sm:$0xff]  }
 0x4ca   : > { %v2523_v59 = vsel %vm2516_vm9, %v2521_v50, %v5388_v11  ;;  %v2524_v9 = vsel %vm2516_vm9, %v2522_v5, %v5389_v14  ;;  %v5384_v17 = vunpack.i.h.bf16 %v5382_v12  ;;  %v5383_v45 = vunpack.i.l.bf16 %v5382_v12  ;;  %v5502_v5 = vld [vmem:[%s7658_s3 + $0xc4] sm:$0xff]  }
 0x4cb   : > { %v2562_v57 = vpack.c.bf16 %v2524_v9, %v2523_v59  ;;  %4448 = vmatpush3.bf16.msra.mxu0 %v5500_v63  ;;  %v5503_v59 = vld [vmem:[%s7658_s3 + $0x10c] sm:$0xff]  }
 0x4cc   : > { %v2514_v42 = vsel %vm2513_vm3, %v2511_v55, %v5383_v45  ;;  %v2515_v56 = vsel %vm2513_vm3, %v2512_v8, %v5384_v17  ;;  %4449 = vmatprep.subr.bf16.mxu0 %v5501_v27  ;;  %v5504_v9 = vld [vmem:[%s7658_s3 + $0xcc] sm:$0xff]   ;;  %v3053_v8 = vld [vmem:[%s7660_s5 + $0xb4] sm:$0x1] }
 0x4cd   : > { %v5392_v46 = vpop.permute.xlu1 %5391  ;;  %2707 = vmatprep.mubr.bf16.mxu1 %v2562_v57 }
 0x4ce   : > { %v5394_v33 = vunpack.i.h.bf16 %v5392_v46  ;;  %v5393_v18 = vunpack.i.l.bf16 %v5392_v46 }
 0x4cf   : > { %4450 = vmatpush3.bf16.msra.mxu0 %v5502_v5 }
 0x4d0   : > { %v2517_v10 = vsel %vm2516_vm9, %v2514_v42, %v5393_v18  ;;  %v2518_v4 = vsel %vm2516_vm9, %v2515_v56, %v5394_v33  ;;  %4451 = vmatprep.subr.bf16.mxu0 %v5503_v59  ;;  %v5626_v18 = vmov 1983009808  }
 0x4d1   : > { %v2561_v21 = vpack.c.bf16 %v2518_v4, %v2517_v10  ;;  %v3139_v42 = vunpack.c.l.s4 %v5626_v18 }
 0x4d3   : > { %2708 = vmatmul.mubr.bf16.vlgmr.msra.gmra.mrb[8].mxu1 %v2561_v21  ;;  %4452 = vmatpush3.bf16.msra.mxu0 %v5504_v9  ;;  %v3140_v37 = vunpack.c.0.s8 %v3139_v42 }
 0x4d4   : > { %4553 = vmatpush3.bf16.msra.mxu1 %v5489_v7  ;;  %4556 = vmatprep.mubr.msk.bf16.mxu1 %vm5622_vm13, %v7683_v39 }
 0x4d5   : > { %4554 = vmatprep.subr.bf16.mxu1 %v7683_v39  ;;  %v7254_v38 = vsub.s32 %v3140_v37, %v6927_v19 }
 0x4d8   : > { %4555 = vmatpush3.bf16.msra.mxu1 %v5490_v15 }
 0x4d9   : > { %4634 = vmatprep.subr.bf16.mxu1 %v5621_v43 }
 0x4db   : > { %4557 = vmatmul.mubr.msk.bf16.vlgmr.msra.gmra.mrb[12].mxu1 %vm1757_vm11, %v7105_v1  ;;  %v2761_v1 = vmul.f32 %v7007_v47, %v7007_v47  ;;  %v3059_v47 = vpop.permute.xlu0 %3058 }
 0x4dc   : > { %4636 = vmatpush3.bf16.msra.mxu1 %v4635_v24  ;;  %4568 = vmatprep.mubr.msk.f32.mxu1 %vm5622_vm13, %v7683_v39 }
 0x4dd   : > { %4637 = vmatprep.subr.bf16.mxu1 %v5621_v43 }
 0x4de   : > { %v2845_v4 = vpop.permute.xlu1 %2844 }
 0x4df   : > { %v2850_v10 = vpop.permute.xlu0 %2849 }
 0x4e0   : > { %4639 = vmatpush3.bf16.msra.mxu1 %v4638_v62 }
 0x4e1   : > { %4640 = vmatprep.subr.bf16.mxu1 %v5621_v43 }
 0x4e3   : > { %4569 = vmatmul.mubr.msk.f32.vlgmr.msra.gmra.mrb[6].mxu1 %vm1757_vm11, %v2761_v1 }
 0x4e4   : > { %4642 = vmatpush3.bf16.msra.mxu1 %v4641_v20  ;;  %4579 = vmatprep.mubr.msk.f32.mxu1 %vm5622_vm13, %v7683_v39 }
 0x4e5   : > { %4643 = vmatprep.subr.bf16.mxu1 %v5621_v43 }
 0x4e8   : > { %4645 = vmatpush3.bf16.msra.mxu1 %v4644_v41 }
 0x4e9   : > { %4582 = vmatprep.subr.bf16.mxu1 %v5491_v6 }
 0x4eb   : > { %4580 = vmatmul.mubr.msk.f32.vlgmr.msra.gmra.mrb[16].mxu1 %vm1757_vm11, %v3059_v47 }
 0x4ec   : > { %4583 = vmatpush3.bf16.msra.mxu1 %v5491_v6 }
 0x4ed   : > { %4584 = vmatprep.subr.bf16.mxu1 %v5492_v44 }
 0x4f0   : > { %4585 = vmatpush3.bf16.msra.mxu1 %v5492_v44 }
 0x4f1   : > { %4646 = vmatprep.subr.bf16.mxu1 %v5621_v43 }
 0x5a6   : > { %v4422_v30 = vpop.f32.mrb[8].mxu1 }
 0x5a7   : > { %v4423_v28 = vpop.f32.mrb[9].mxu1 }
 0x5a8   : > { %v4424_v53 = vadd.f32 %v4423_v28, %v4422_v30  ;;  %v4425_v58 = vpop.f32.mrb[10].mxu1 }
 0x5a9   : > { %v4426_v54 = vpop.f32.mrb[11].mxu1 }
 0x5aa   : > { %v4427_v26 = vadd.f32 %v4426_v54, %v4425_v58 }
 0x5ae   : > { %v2750_v14 = vpop.f32.mrb[12].mxu1 }
 0x5af   : > { %v2751_v11 = vadd.f32 %v4424_v53, %v2750_v14  ;;  %v4558_v12 = vpop.f32.mrb[13].mxu1 }
 0x5b0   : > { %v2753_v50 = vpop.f32.mrb[14].mxu1 }
 0x5b1   : > { %v2754_v52 = vadd.f32 %v4427_v26, %v2753_v50  ;;  %v4559_v51 = vpop.f32.mrb[15].mxu1 }
 0x5b6   : > { %v2831_v17 = vpop.f32.mrb[6].mxu1 }
 0x5b7   : > { %v2832_v45 = vadd.f32 1e-08, %v2831_v17  ;;  %v4570_v57 = vpop.f32.mrb[7].mxu1 }
 0x5b9   : > { %5511 = vrsqrt.f32 %v2832_v45 }
 0x5be   : > { %v3128_v48 = vpop.f32.mrb[16].mxu1 }
 0x5bf   : > { %v4581_v46 = vpop.f32.mrb[17].mxu1  ;;  %v7245_v33 = vadd.f32 %v3128_v48, %v3053_v8 }
 0x5c1   : > { %v3135_v15 = vrot.slane %v7245_v33, %v6930_v0 }
 0x5c3   : > { %v5512_v55 = vpop.eup %5511  ;;  %v3137_v61 = vcombine.high %v3135_v15, %v3135_v15  ;;  %v7257_v6 = vrot.slane %v3135_v15, %v7254_v38 }
 0x5c4   : > { %v2839_v56 = vrot.slane %v5512_v55, %v6930_v0 }
 0x5c5   : > { %v7260_v44 = vrot.slane %v3137_v61, %v7254_v38  ;;  %v3152_v53 = vcombine.high %v7257_v6, %v7257_v6 }
 0x5c6   : > { %v2841_v7 = vmul.f32 %v2839_v56, %v2754_v52  ;;  %v2840_v21 = vmul.f32 %v2839_v56, %v2751_v11 }
 0x5c7   : > { %v3153_v58 = vcombine.high %v7260_v44, %v7260_v44 }
 0x5c8   : > { %v2853_v24 = vadd.f32 %v2850_v10, %v2841_v7  ;;  %v2852_v22 = vadd.f32 %v2845_v4, %v2840_v21 }
 0x5ca   : > { %v2860_v23 = vadd.f32 %v4338_v16, %v2853_v24  ;;  %v2859_v62 = vadd.f32 %v4338_v16, %v2852_v22 }
 0x5cc   : > { %vm2862_vm10 = vcmp.ge.f32.partialorder %v2860_v23, 0.0  ;;  %v2864_v20 = vmul.f32 0.2, %v2860_v23  ;;  %vm2861_vm12 = vcmp.ge.f32.partialorder %v2859_v62, 0.0  ;;  %v2863_v1 = vmul.f32 0.2, %v2859_v62 }
 0x5ce   : > { %v2866_v29 = vsel %vm2862_vm10, %v2860_v23, %v2864_v20  ;;  %v2865_v34 = vsel %vm2861_vm12, %v2859_v62, %v2863_v1 }
 0x5cf   : > { %v2868_v41 = vmul.f32 1.4142135, %v2866_v29  ;;  %v2867_v47 = vmul.f32 1.4142135, %v2865_v34 }
 0x5d1   : > { %v2872_v36 = vcombine.high %v2868_v41, %v2868_v41  ;;  %v2927_v40 = vrot.slane %v2868_v41, %v6943_v60  ;;  %v2871_v49 = vcombine.high %v2867_v47, %v2867_v47  ;;  %v2879_v19 = vrot.slane %v2867_v47, %v6943_v60 }
 0x5d3   : > { %v2928_v13 = vcombine.high %v2927_v40, %v2927_v40  ;;  %v2935_v31 = vrot.slane %v2927_v40, %v6943_v60  ;;  %v2951_v30 = vrot.slane %v2872_v36, %v6943_v60  ;;  %v2880_v28 = vcombine.high %v2879_v19, %v2879_v19 }
 0x5d4   : > { %v2887_v32 = vrot.slane %v2879_v19, %v6943_v60  ;;  %v2903_v54 = vrot.slane %v2871_v49, %v6943_v60 }
 0x5d5   : > { %v2942_v25 = vrot.slane %v2928_v13, %v6943_v60  ;;  %v2943_v26 = vcombine.high %v2935_v31, %v2935_v31  ;;  %v2952_v63 = vcombine.high %v2951_v30, %v2951_v30  ;;  %v2959_v27 = vrot.slane %v2951_v30, %v6943_v60 }
 0x5d6   : > { %v3004_v14 = vrot.slane %v2935_v31, %v6930_v0  ;;  %v2894_v11 = vrot.slane %v2880_v28, %v6943_v60  ;;  %v2895_v12 = vcombine.high %v2887_v32, %v2887_v32  ;;  %v2904_v50 = vcombine.high %v2903_v54, %v2903_v54 }
 0x5d7   : > { %v2944_v5 = vcombine.high %v2942_v25, %v2942_v25  ;;  %v2966_v52 = vrot.slane %v2952_v63, %v6943_v60  ;;  %v2967_v51 = vcombine.high %v2959_v27, %v2959_v27  ;;  %v3008_v59 = vrot.slane %v2942_v25, %v6930_v0 }
 0x5d8   : > { %v3012_v9 = vrot.slane %v2943_v26, %v6930_v0  ;;  %v3020_v17 = vrot.slane %v2959_v27, %v6930_v0  ;;  %v3166_v45 = vmul.f32 %v7257_v6, %v3004_v14  ;;  %v2896_v57 = vcombine.high %v2894_v11, %v2894_v11 }
 0x5d9   : > { %v2968_v48 = vcombine.high %v2966_v52, %v2966_v52  ;;  %v3016_v46 = vrot.slane %v2944_v5, %v6930_v0  ;;  %v3024_v8 = vrot.slane %v2966_v52, %v6930_v0  ;;  %v3028_v55 = vrot.slane %v2967_v51, %v6930_v0 }
 0x5da   : > { %v3167_v18 = vmul.f32 %v3152_v53, %v3008_v59  ;;  %v3168_v42 = vmul.f32 %v7260_v44, %v3012_v9  ;;  %v3170_v56 = vmul.f32 %v7257_v6, %v3020_v17  ;;  %v2911_v10 = vrot.slane %v2903_v54, %v6943_v60 }
 0x5db   : > { %v3032_v4 = vrot.slane %v2968_v48, %v6930_v0  ;;  %v3169_v7 = vmul.f32 %v3153_v58, %v3016_v46  ;;  %v3171_v21 = vmul.f32 %v3152_v53, %v3024_v8  ;;  %v3172_v15 = vmul.f32 %v7260_v44, %v3028_v55  ;;  %v3738_v48 = vld [vmem:[%s7660_s5 + $0x98] sm:$0xff] }
 0x5dc   : > { %v3224_v37 = vcombine.low %v3166_v45, %v3167_v18  ;;  %v2918_v16 = vrot.slane %v2904_v50, %v6943_v60  ;;  %v2919_v24 = vcombine.high %v2911_v10, %v2911_v10  ;;  %v2972_v22 = vrot.slane %v2887_v32, %v6930_v0 }
 0x5dd   : > { %v3173_v23 = vmul.f32 %v3153_v58, %v3032_v4  ;;  %v3225_v62 = vcombine.low %v3168_v42, %v3169_v7  ;;  %v3241_v61 = vcombine.low %v3170_v56, %v3171_v21  ;;  %v2976_v20 = vrot.slane %v2894_v11, %v6930_v0 }
 0x5de   : > { %v2920_v1 = vcombine.high %v2918_v16, %v2918_v16  ;;  %v2980_v29 = vrot.slane %v2895_v12, %v6930_v0  ;;  %v2984_v34 = vrot.slane %v2896_v57, %v6930_v0  ;;  %v3232_v41 = vrot.slane %v3224_v37, %v7254_v38 }
 0x5df   : > { %v3239_v47 = vrot.slane %v3225_v62, %v7254_v38  ;;  %v3242_v36 = vcombine.low %v3172_v15, %v3173_v23  ;;  %v2988_v60 = vrot.slane %v2911_v10, %v6930_v0  ;;  %v2992_v40 = vrot.slane %v2918_v16, %v6930_v0 }
 0x5e0   : > { %v2996_v49 = vrot.slane %v2919_v24, %v6930_v0  ;;  %v3000_v19 = vrot.slane %v2920_v1, %v6930_v0  ;;  %v3158_v13 = vmul.f32 %v7257_v6, %v2972_v22  ;;  %v3159_v30 = vmul.f32 %v3152_v53, %v2976_v20 }
 0x5e1   : > { %v3240_v31 = vcombine.low %v3232_v41, %v3239_v47  ;;  %v3160_v28 = vmul.f32 %v7260_v44, %v2980_v29  ;;  %v3161_v32 = vmul.f32 %v3153_v58, %v2984_v34  ;;  %v3162_v54 = vmul.f32 %v7257_v6, %v2988_v60 }
 0x5e2   : > { %v3163_v25 = vmul.f32 %v3152_v53, %v2992_v40  ;;  %v3164_v26 = vmul.f32 %v7260_v44, %v2996_v49  ;;  %v3165_v63 = vmul.f32 %v3153_v58, %v3000_v19  ;;  %v3190_v14 = vcombine.low %v3158_v13, %v3159_v30  ;;  %v5505_v44 = vld [vmem:[%s7658_s3 + $0x114] sm:$0xff]   ;;  %v5507_v19 = vld [vmem:[%s7658_s3 + $0x11c] sm:$0xff]  }
 0x5e3   : > { %v3260_v27 = vrot.slane %v3240_v31, 7  ;;  %v3191_v11 = vcombine.low %v3160_v28, %v3161_v32  ;;  %v3256_v12 = vrot.slane %v3242_v36, %v7254_v38  ;;  %v3249_v52 = vrot.slane %v3241_v61, %v7254_v38  ;;  %v5506_v53 = vld [vmem:[%s7658_s3 + $0xd4] sm:$0xff]   ;;  %4453 = vmatprep.subr.bf16.mxu0 %v5505_v44  ;;  %v5508_v13 = vld [vmem:[%s7658_s3 + $0xdc] sm:$0xff]  }
 0x5e4   : > { %v3207_v50 = vcombine.low %v3162_v54, %v3163_v25  ;;  %v3208_v5 = vcombine.low %v3164_v26, %v3165_v63  ;;  %v3198_v51 = vrot.slane %v3190_v14, %v7254_v38  ;;  %v7689_v55 = vrot.slane %v5733_v3, 1  ;;  %4454 = vmatpush3.bf16.msra.mxu0 %v5506_v53 }
 0x5e5   : > { %v3205_v59 = vrot.slane %v3191_v11, %v7254_v38  ;;  %v7317_v58 = vsel %vm418_vm0, 0.0, %v3260_v27  ;;  %v7320_v45 = vsel %vm418_vm0, %v3260_v27, 0.0  ;;  %v3257_v57 = vcombine.low %v3249_v52, %v3256_v12  ;;  %4455 = vmatprep.subr.bf16.mxu0 %v5507_v19  ;;  %v3739_v11 = vld [vmem:[%s7660_s5 + $0xa0] sm:$0xff]  ;;  %v3740_v12 = vld [vmem:[%s7660_s5 + $0xa8] sm:$0xff] }
 0x5e6   : > { %v3215_v9 = vrot.slane %v3207_v50, %v7254_v38  ;;  %v3222_v6 = vrot.slane %v3208_v5, %v7254_v38  ;;  %v3737_v38 = vld [vmem:[%s7660_s5 + $0x90] sm:$0xff]  ;;  %v7690_v18 = vrot.slane %v5729_v2, 1  ;;  %v7691_v56 = vrot.slane %v5733_v3, 2 }
 0x5e7   : > { %v3206_v17 = vcombine.low %v3198_v51, %v3205_v59  ;;  %v7692_v10 = vrot.slane %v5729_v2, 2  ;;  %v3261_v7 = vrot.slane %v3257_v57, 7  ;;  %v3302_v15 = vrot.slane %v7317_v58, 2 }
 0x5e8   : > { %v3223_v46 = vcombine.low %v3215_v9, %v3222_v6  ;;  %v7333_v42 = vsel %vm584_vm2, %v7690_v18, %v7689_v55  ;;  %v3303_v37 = vrot.slane %v7320_v45, 2  ;;  %v4647_v16 = vpack.c.bf16 %v3738_v48, %v3737_v38  ;;  %4456 = vmatpush3.bf16.msra.mxu0 %v5508_v13  ;;  %v3921_v38 = vld [vmem:[%s7660_s5 + $0x50] sm:$0xff]  ;;  %v3922_v48 = vld [vmem:[%s7660_s5 + $0x58] sm:$0xff] }
 0x5e9   : > { %v3258_v8 = vrot.slane %v3206_v17, 7  ;;  %v7340_v4 = vsel %vm665_vm1, %v7692_v10, %v7691_v56  ;;  %v7349_v3 = vsel %vm418_vm0, 0.0, %v3261_v7  ;;  %v7352_v23 = vsel %vm418_vm0, %v3261_v7, 0.0  ;;  %v3924_v7 = vld [vmem:[%s7660_s5 + $0x68] sm:$0xff] }
 0x5ea   : > { %v3259_v21 = vrot.slane %v3223_v46, 7  ;;  %v3304_v28 = vsel %vm665_vm1, %v3302_v15, %v3303_v37  ;;  %v3305_v32 = vrot.slane %v7349_v3, 2  ;;  %v3306_v14 = vrot.slane %v7352_v23, 2 }
 0x5eb   : > { %v7345_v24 = vsel %vm418_vm0, 0.0, %v3258_v8  ;;  %v3270_v22 = vsel %vm418_vm0, %v3258_v8, 0.0  ;;  %v3289_v51 = vrot.slane %v7317_v58, 1  ;;  %v3290_v59 = vrot.slane %v7320_v45, 1 }
 0x5ec   : > { %v7355_v62 = vsel %vm418_vm0, 0.0, %v3259_v21  ;;  %v3296_v61 = vrot.slane %v7345_v24, 2  ;;  %v3297_v20 = vrot.slane %v3270_v22, 2  ;;  %v3271_v1 = vsel %vm418_vm0, %v3259_v21, 0.0 }
 0x5ed   : > { %v5397_v29 = vpack.i.bf16 %v7355_v62, %v7345_v24  ;;  %v3299_v34 = vrot.slane %v7355_v62, 2  ;;  %v3300_v41 = vrot.slane %v3271_v1, 2  ;;  %v3283_v47 = vrot.slane %v7345_v24, 1 }
 0x5ee   : > { %v3298_v36 = vsel %vm665_vm1, %v3296_v61, %v3297_v20  ;;  %v3284_v60 = vrot.slane %v3270_v22, 1  ;;  %v3286_v40 = vrot.slane %v7355_v62, 1  ;;  %v3287_v49 = vrot.slane %v3271_v1, 1  ;;  %v2287_v22 = vld [vmem:[%s7133_s22 + $0x30] sm:$0xff]  ;;  %v2288_v61 = vld [vmem:[%s7133_s22 + $0x38] sm:$0xff]  ;;  %v2286_v20 = vld [vmem:[%s7133_s22 + $0x28] sm:$0xff] }
 0x5ef   : > { %5398 = vrot.lane.b32.xlu0 %v5397_v29, %s7693_s17  ;;  %v5402_v31 = vpack.i.bf16 %v7333_v42, %v3298_v36  ;;  %v3301_v30 = vsel %vm665_vm1, %v3299_v34, %v3300_v41  ;;  %v5407_v50 = vpack.i.bf16 %v3298_v36, %v7340_v4  ;;  %v3307_v5 = vsel %vm665_vm1, %v3305_v32, %v3306_v14  ;;  %v2290_v1 = vld [vmem:[%s7133_s22 + $0x48] sm:$0xff] }
 0x5f0   : > { %v3477_v54 = vpack.c.bf16 %v3301_v30, %v3298_v36  ;;  %v3480_v25 = vpack.c.bf16 %v3304_v28, %v3301_v30  ;;  %v7377_v26 = vsel %vm584_vm2, %v3283_v47, %v3284_v60  ;;  %v7380_v63 = vsel %vm584_vm2, %v3286_v40, %v3287_v49 }
 0x5f1   : > { %5403 = vrot.lane.b32.xlu1 %v5402_v31, %s7688_s12  ;;  %v5417_v27 = vpack.i.bf16 %v7380_v63, %v7377_v26  ;;  %v3483_v52 = vpack.c.bf16 %v3307_v5, %v3304_v28  ;;  %v4650_v9 = vpack.c.bf16 %v3740_v12, %v3739_v11  ;;  %v5427_v6 = vpack.i.bf16 %v3304_v28, %v7380_v63 }
 0x5f2   : > { %4586 = vmatprep.mubr.msk.bf16.mxu1 %vm1757_vm11, %v3477_v54  ;;  %v5412_v44 = vpack.i.bf16 %v3301_v30, %v7377_v26  ;;  %v7406_v53 = vsel %vm584_vm2, %v3289_v51, %v3290_v59  ;;  %v3486_v17 = vpack.c.bf16 %v7340_v4, %v3307_v5  ;;  %v5437_v57 = vpack.i.bf16 %v3304_v28, %v7349_v3  ;;  %v3923_v4 = vld [vmem:[%s7660_s5 + $0x60] sm:$0xff] }
 0x5f3   : > { %4587 = vmatmul.mubr.msk.bf16.vlgmr.msra.gmra.mrb[20].mxu1 %vm1757_vm11, %v3480_v25  ;;  %5418 = vrot.lane.b32.xlu0 %v5417_v27, %s7694_s0  ;;  %v5422_v45 = vpack.i.bf16 %v7406_v53, %v7345_v24  ;;  %v3292_v46 = vrot.slane %v7349_v3, 1  ;;  %v3293_v8 = vrot.slane %v7352_v23, 1  ;;  %v5432_v55 = vpack.i.bf16 %v3301_v30, %v7317_v58  ;;  %v2289_v23 = vld [vmem:[%s7133_s22 + $0x40] sm:$0xff] }
 0x5f4   : > { %4648 = vmatpush3.bf16.msra.mxu1 %v4647_v16  ;;  %4590 = vmatprep.mubr.msk.bf16.mxu1 %vm1757_vm11, %v3483_v52  ;;  %v4653_v18 = vpack.c.bf16 %v3922_v48, %v3921_v38  ;;  %v3741_v56 = vmul.f32 %v7245_v33, %v7245_v33  ;;  %v5442_v33 = vpack.i.bf16 %v3307_v5, %v7406_v53  ;;  %v2283_v16 = vld [vmem:[%s7133_s22 + $0x10] sm:$0xff] }
 0x5f5   : > { %5408 = vrot.lane.b32.xlu1 %v5407_v50, %s7693_s17  ;;  %4649 = vmatprep.subr.bf16.mxu1 %v5621_v43  ;;  %v7434_v10 = vsel %vm584_vm2, %v3292_v46, %v3293_v8  ;;  %v4656_v21 = vpack.c.bf16 %v3924_v7, %v3923_v4  ;;  %v5457_v15 = vpack.i.bf16 %v7349_v3, %v7333_v42  ;;  %v2284_v42 = vld [vmem:[%s7133_s22 + $0x18] sm:$0xff] }
 0x5f6   : > { %v5447_v37 = vpack.i.bf16 %v7317_v58, %v7434_v10 }
 0x5f7   : > { %5428 = vrot.lane.b32.xlu0 %v5427_v6, %s7688_s12 }
 0x5f8   : > { %4651 = vmatpush3.bf16.msra.mxu1 %v4650_v9 }
 0x5f9   : > { %5413 = vrot.lane.b32.xlu1 %v5412_v44, %s7688_s12  ;;  %4652 = vmatprep.subr.bf16.mxu1 %v5621_v43 }
 0x5fb   : > { %4591 = vmatmul.mubr.msk.bf16.gmra.mrb[24].mxu1 %vm1757_vm11, %v3486_v17  ;;  %3349 = vrot.lane.b32.xlu0 %v7355_v62, %s7694_s0 }
 0x5fc   : > { %4602 = vmatprep.mubr.msk.f32.mxu1 %vm5622_vm13, %v7683_v39 }
 0x5fd   : > { %5423 = vrot.lane.b32.xlu1 %v5422_v45, %s7694_s0 }
 0x5ff   : > { %5438 = vrot.lane.b32.xlu0 %v5437_v57, %s7693_s17 }
 0x601   : > { %5433 = vrot.lane.b32.xlu1 %v5432_v55, %s7693_s17 }
 0x603   : > { %4603 = vmatmul.mubr.msk.f32.vlgmr.msra.gmra.mrb[18].mxu1 %vm1757_vm11, %v3741_v56  ;;  %3325 = vrot.lane.b32.xlu0 %v7434_v10, %s7688_s12 }
 0x604   : > { %4654 = vmatpush3.bf16.msra.mxu1 %v4653_v18  ;;  %4613 = vmatprep.mubr.msk.f32.mxu1 %vm5622_vm13, %v7683_v39  ;;  %v5452_v39 = vpack.i.bf16 %v3307_v5, %v5729_v2 }
 0x605   : > { %5443 = vrot.lane.b32.xlu1 %v5442_v33, %s7688_s12  ;;  %4655 = vmatprep.subr.bf16.mxu1 %v5621_v43  ;;  %v2285_v43 = vld [vmem:[%s7133_s22 + $0x20] sm:$0xff]  ;;  %s4138_s12 = sshll.u32 %s6964_s24, 4  ;;  %s4119_s22 = scalar_lea.sflag [#allocation3], %s6952_s26  ;;  %s4139_s12 = int_to_ptr.vmem [resolvable:$true] %s4138_s12 }
 0x607   : > { %5458 = vrot.lane.b32.xlu0 %v5457_v15, %s7694_s0 }
 0x608   : > { %4657 = vmatpush3.bf16.msra.mxu1 %v4656_v21 }
 0x609   : > { %5448 = vrot.lane.b32.xlu1 %v5447_v37, %s7694_s0  ;;  %s5627_s0 = smov [#allocation2]  }
 0x60a   : > { %s5519_s10 = sshll.u32 %s5627_s0, 4  ;;  %s5520_s10 = int_to_ptr.vmem [resolvable:$false] %s5519_s10 }
 0x60b   : > { %3830 = vperm.xlu0 %5396, %v2283_v16   ;;  %s5521_s18 = scalar_lea.vmem %s5520_s10, 64  ;;  %p5522_p0 = scmp.lt.s32.totalorder %s4139_s12, %s5520_s10 }
 0x60d   : > { %5453 = vrot.lane.b32.xlu1 %v5452_v39, %s7693_s17 }
 0x60f   : > { %3850 = vperm.xlu0 %5396, %v2287_v22  }
 0x611   : > { %3926 = vrot.lane.b32.xlu1 %v7124_v35, %s7693_s17  ;;  %s5515_s17 = scalar_lea.vmem %s4139_s12, 32 }
 0x612   : > { %p5516_p11 = scmp.ne.s32.totalorder %s4139_s12, %s5515_s17  ;;  %p5523_p1 = scmp.lt.s32.totalorder %s5521_s18, %s5515_s17 }
 0x613   : > { %3840 = vperm.xlu0 %5396, %v2285_v43  }
 0x614   : > { %p5517_p12 = pnand %p5516_p11, %p5713_p5  ;;  %p5524_p2 = por %p5523_p1, %p5522_p0 }
 0x615   : > { %3835 = vperm.xlu1 %5395, %v2284_v42  }
 0x616   : > { %p5518_p13 = pneg %p5517_p12 }
 0x617   : > { %3860 = vperm.xlu0 %5396, %v2289_v23  }
 0x618   : > { %p5525_p3 = pnand %p5524_p2, %p5518_p13 }
 0x619   : > { %3855 = vperm.xlu1 %5395, %v2288_v61  }
 0x61d   : > { %3845 = vperm.xlu1 %5395, %v2286_v20  }
 0x621   : > { %3865 = vperm.xlu1 %5395, %v2290_v1  }
 0x661   : > { %v5399_v29 = vpop.permute.xlu0 %5398 }
 0x662   : > { %v5401_v47 = vunpack.i.h.bf16 %v5399_v29  ;;  %v5400_v36 = vunpack.i.l.bf16 %v5399_v29 }
 0x663   : > { %v5404_v34 = vpop.permute.xlu1 %5403 }
 0x664   : > { %v5405_v41 = vunpack.i.l.bf16 %v5404_v34  ;;  %v5406_v27 = vunpack.i.h.bf16 %v5404_v34 }
 0x665   : > { %v5419_v60 = vpop.permute.xlu0 %5418 }
 0x666   : > { %v3419_v35 = vsel %vm1757_vm11, %v7377_v26, %v5405_v41  ;;  %v5421_v40 = vunpack.i.h.bf16 %v5419_v60  ;;  %v5420_v49 = vunpack.i.l.bf16 %v5419_v60  ;;  %v3401_v51 = vsel %vm1757_vm11, %v5729_v2, %v5406_v27 }
 0x667   : > { %v5409_v19 = vpop.permute.xlu1 %5408  ;;  %v3423_v13 = vsel %vm2513_vm3, %v3419_v35, %v5400_v36  ;;  %v3424_v31 = vsel %vm2513_vm3, %v3419_v35, %v5401_v47 }
 0x668   : > { %v3431_v30 = vsel %vm2516_vm9, %v3423_v13, %v5420_v49  ;;  %v3432_v28 = vsel %vm2516_vm9, %v3424_v31, %v5421_v40  ;;  %v5410_v11 = vunpack.i.l.bf16 %v5409_v19  ;;  %v5411_v5 = vunpack.i.h.bf16 %v5409_v19 }
 0x669   : > { %v5429_v32 = vpop.permute.xlu0 %5428  ;;  %v3476_v54 = vpack.c.bf16 %v3432_v28, %v3431_v30 }
 0x66a   : > { %v3406_v9 = vsel %vm2513_vm3, %v3401_v51, %v5410_v11  ;;  %v5430_v6 = vunpack.i.l.bf16 %v5429_v32  ;;  %v5431_v56 = vunpack.i.h.bf16 %v5429_v32 }
 0x66b   : > { %v5414_v25 = vpop.permute.xlu1 %5413  ;;  %3639 = vmatprep.mubr.bf16.mxu0 %v3476_v54 }
 0x66c   : > { %v5415_v14 = vunpack.i.l.bf16 %v5414_v25  ;;  %v5416_v12 = vunpack.i.h.bf16 %v5414_v25  ;;  %v3403_v55 = vsel %vm1757_vm11, %v7355_v62, %v5430_v6  ;;  %v3421_v62 = vsel %vm1757_vm11, %v7406_v53, %v5431_v56 }
 0x66d   : > { %v3350_v26 = vpop.permute.xlu0 %3349 }
 0x66e   : > { %v3402_v50 = vsel %vm1757_vm11, %v7345_v24, %v5415_v14  ;;  %v3420_v44 = vsel %vm1757_vm11, %v7380_v63, %v5416_v12 }
 0x66f   : > { %v5424_v52 = vpop.permute.xlu1 %5423  ;;  %v3407_v17 = vsel %vm2513_vm3, %v3402_v50, %v5411_v5  ;;  %v3425_v2 = vsel %vm2513_vm3, %v3420_v44, %v5401_v47 }
 0x670   : > { %v5425_v59 = vunpack.i.l.bf16 %v5424_v52  ;;  %v5426_v18 = vunpack.i.h.bf16 %v5424_v52  ;;  %v3433_v33 = vsel %vm2516_vm9, %v3425_v2, %v5421_v40  ;;  %v3413_v43 = vsel %vm2516_vm9, %v3407_v17, %v3350_v26 }
 0x671   : > { %v5439_v38 = vpop.permute.xlu0 %5438 }
 0x672   : > { %v3411_v45 = vsel %vm2516_vm9, %v3406_v9, %v5425_v59  ;;  %v3412_v57 = vsel %vm2516_vm9, %v3407_v17, %v5425_v59  ;;  %v5440_v22 = vunpack.i.l.bf16 %v5439_v38  ;;  %v5441_v41 = vunpack.i.h.bf16 %v5439_v38 }
 0x673   : > { %v3475_v24 = vpack.c.bf16 %v3412_v57, %v3411_v45  ;;  %v5434_v48 = vpop.permute.xlu1 %5433 }
 0x674   : > { %v5436_v46 = vunpack.i.h.bf16 %v5434_v48  ;;  %v5435_v8 = vunpack.i.l.bf16 %v5434_v48  ;;  %v3428_v47 = vsel %vm2513_vm3, %v3421_v62, %v5440_v22  ;;  %v5509_v48 = vld [vmem:[%s7659_s4 + $0x8] ss:$12 sps:$4 sm:$0xff]  }
 0x675   : > { %3640 = vmatmul.mubr.bf16.vlgmr.msra.gmra.mrb[32].mxu0 %v3475_v24  ;;  %v3326_v15 = vpop.permute.xlu0 %3325  ;;  %4616 = vmatprep.subr.bf16.mxu0 %v5509_v48 }
 0x676   : > { %v3408_v63 = vsel %vm2513_vm3, %v3403_v55, %v5436_v46  ;;  %v3426_v4 = vsel %vm2513_vm3, %v3420_v44, %v5435_v8  ;;  %v3427_v42 = vsel %vm2513_vm3, %v3421_v62, %v5435_v8  ;;  %v3405_v11 = vsel %vm1757_vm11, %v7349_v3, %v3326_v15  ;;  %4658 = vmatprep.subr.bf16.mxu1 %v5509_v48  ;;  %v5510_v46 = vld [vmem:[%s7659_s4 + $0x20] ss:$12 sps:$4 sm:$0xff]  }
 0x677   : > { %v5444_v7 = vpop.permute.xlu1 %5443  ;;  %v3434_v21 = vsel %vm2516_vm9, %v3426_v4, %v5426_v18  ;;  %v3414_v39 = vsel %vm2516_vm9, %v3408_v63, %v3350_v26  ;;  %v3435_v53 = vsel %vm2516_vm9, %v3427_v42, %v5426_v18  ;;  %4617 = vmatpush3.bf16.msra.mxu0 %v5509_v48 }
 0x678   : > { %v5445_v37 = vunpack.i.l.bf16 %v5444_v7  ;;  %v3479_v16 = vpack.c.bf16 %v3434_v21, %v3433_v33  ;;  %v5446_v23 = vunpack.i.h.bf16 %v5444_v7  ;;  %v3478_v20 = vpack.c.bf16 %v3414_v39, %v3413_v43  ;;  %4618 = vmatprep.subr.bf16.mxu0 %v5510_v46 }
 0x679   : > { %v5459_v36 = vpop.permute.xlu0 %5458 }
 0x67a   : > { %3647 = vmatprep.mubr.bf16.mxu0 %v3479_v16  ;;  %v3404_v1 = vsel %vm1757_vm11, %v7317_v58, %v5445_v37  ;;  %v3422_v35 = vsel %vm1757_vm11, %v7434_v10, %v5446_v23  ;;  %v5460_v30 = vunpack.i.l.bf16 %v5459_v36  ;;  %v5461_v50 = vunpack.i.h.bf16 %v5459_v36 }
 0x67b   : > { %v5449_v61 = vpop.permute.xlu1 %5448  ;;  %v3409_v19 = vsel %vm2513_vm3, %v3404_v1, %v5441_v41  ;;  %v3429_v54 = vsel %vm2513_vm3, %v3422_v35, %v5440_v22  ;;  %4619 = vmatpush3.bf16.msra.mxu0 %v5510_v46  ;;  %v7537_v22 = vld [vmem:[%s7660_s5 + $0xb2] ss:$0 sm:$0xff] }
 0x67c   : > { %v5451_v29 = vunpack.i.h.bf16 %v5449_v61  ;;  %v5450_v34 = vunpack.i.l.bf16 %v5449_v61  ;;  %v3417_v52 = vsel %vm2516_vm9, %v3409_v19, %v5461_v50 }
 0x67d   : > { %3648 = vmatmul.mubr.bf16.gmra.mrb[36].mxu0 %v3478_v20 }
 0x67e   : > { %v3436_v60 = vsel %vm2516_vm9, %v3428_v47, %v5450_v34  ;;  %v3415_v58 = vsel %vm2516_vm9, %v3408_v63, %v5451_v29  ;;  %v3416_v31 = vsel %vm2516_vm9, %v3409_v19, %v5451_v29  ;;  %v3437_v10 = vsel %vm2516_vm9, %v3429_v54, %v5450_v34 }
 0x67f   : > { %v5454_v40 = vpop.permute.xlu1 %5453  ;;  %v3482_v49 = vpack.c.bf16 %v3436_v60, %v3435_v53  ;;  %v3481_v27 = vpack.c.bf16 %v3416_v31, %v3415_v58 }
 0x680   : > { %v5455_v13 = vunpack.i.l.bf16 %v5454_v40  ;;  %v5456_v28 = vunpack.i.h.bf16 %v5454_v40  ;;  %v3925_v40 = vld [vmem:[%s7660_s5 + $0xb5] sm:$0x1] }
 0x681   : > { %3655 = vmatprep.mubr.bf16.mxu0 %v3482_v49 }
 0x682   : > { %v3430_v32 = vsel %vm2513_vm3, %v3422_v35, %v5455_v13  ;;  %v3410_v26 = vsel %vm2513_vm3, %v3405_v11, %v5456_v28 }
 0x683   : > { %v3927_v25 = vpop.permute.xlu1 %3926  ;;  %v3438_v14 = vsel %vm2516_vm9, %v3430_v32, %v5460_v30  ;;  %v3418_v5 = vsel %vm2516_vm9, %v3410_v26, %v5461_v50 }
 0x684   : > { %4614 = vmatmul.mubr.msk.f32.vlgmr.msra.gmra.mrb[28].mxu1 %vm1757_vm11, %v3927_v25  ;;  %v3485_v12 = vpack.c.bf16 %v3438_v14, %v3437_v10  ;;  %v3484_v51 = vpack.c.bf16 %v3418_v5, %v3417_v52 }
 0x685   : > { %3656 = vmatmul.mubr.bf16.gmra.mrb[40].mxu0 %v3481_v27  ;;  %4660 = vmatpush3.bf16.msra.mxu1 %v5509_v48 }
 0x686   : > { %3663 = vmatprep.mubr.bf16.mxu0 %v3485_v12  ;;  %4659 = vmatprep.subr.bf16.mxu1 %v5510_v46 }
 0x689   : > { %4661 = vmatpush3.bf16.msra.mxu1 %v5510_v46 }
 0x68a   : > { %v3831_v4 = vpop.permute.xlu0 %3830 }
 0x68d   : > { %3664 = vmatmul.mubr.bf16.gmra.mrb[44].mxu0 %v3484_v51 }
 0x68e   : > { %v3851_v23 = vpop.permute.xlu0 %3850 }
 0x692   : > { %v3841_v13 = vpop.permute.xlu0 %3840 }
 0x694   : > { %v3836_v37 = vpop.permute.xlu1 %3835 }
 0x698   : > { %v3856_v47 = vpop.permute.xlu1 %3855 }
 0x69c   : > { %v3846_v12 = vpop.permute.xlu1 %3845 }
 0x6c6   : > { %v4588_v59 = vpop.f32.mrb[20].mxu1 }
 0x6c7   : > { %v3706_v9 = vpop.f32.mrb[21].mxu1 }
 0x6c8   : > { %v4589_v6 = vpop.f32.mrb[22].mxu1 }
 0x6c9   : > { %v3709_v44 = vpop.f32.mrb[23].mxu1 }
 0x6ce   : > { %v7516_v17 = vpop.f32.mrb[24].mxu1 }
 0x6cf   : > { %v7518_v3 = vpop.f32.mrb[25].mxu1 }
 0x6d0   : > { %v7520_v45 = vpop.f32.mrb[26].mxu1 }
 0x6d1   : > { %v7522_v57 = vpop.f32.mrb[27].mxu1 }
 0x6d6   : > { %v3811_v38 = vpop.f32.mrb[18].mxu1 }
 0x6d7   : > { %v4604_v24 = vpop.f32.mrb[19].mxu1  ;;  %v3812_v8 = vadd.f32 1e-08, %v3811_v38 }
 0x6d9   : > { %5513 = vrsqrt.f32 %v3812_v8 }
 0x6e3   : > { %v5514_v55 = vpop.eup %5513 }
 0x6e4   : > { %v7531_v33 = vrot.slane %v5514_v55, %v6930_v0 }
 0x748   : > { %v4457_v2 = vpop.f32.mrb[32].mxu0 }
 0x749   : > { %v4458_v18 = vpop.f32.mrb[33].mxu0 }
 0x74a   : > { %v4459_v56 = vadd.f32 %v4458_v18, %v4457_v2  ;;  %v4460_v63 = vpop.f32.mrb[34].mxu0 }
 0x74b   : > { %v4461_v7 = vpop.f32.mrb[35].mxu0 }
 0x74c   : > { %v3707_v21 = vadd.f32 %v4459_v56, %v3706_v9  ;;  %v4462_v15 = vadd.f32 %v4461_v7, %v4460_v63 }
 0x74e   : > { %v3820_v16 = vmul.f32 %v7531_v33, %v3707_v21  ;;  %v3710_v39 = vadd.f32 %v4462_v15, %v3709_v44 }
 0x750   : > { %v3868_v62 = vadd.f32 %v3831_v4, %v3820_v16  ;;  %v3821_v43 = vmul.f32 %v7531_v33, %v3710_v39  ;;  %v4463_v42 = vpop.f32.mrb[36].mxu0 }
 0x751   : > { %v4464_v61 = vpop.f32.mrb[37].mxu0 }
 0x752   : > { %v3881_v20 = vadd.f32 %v7537_v22, %v3868_v62  ;;  %v3869_v1 = vadd.f32 %v3836_v37, %v3821_v43  ;;  %v4465_v29 = vadd.f32 %v4464_v61, %v4463_v42  ;;  %v4466_v34 = vpop.f32.mrb[38].mxu0 }
 0x753   : > { %v4467_v41 = vpop.f32.mrb[39].mxu0 }
 0x754   : > { %v3897_v36 = vmul.f32 0.2, %v3881_v20  ;;  %v3882_v53 = vadd.f32 %v7537_v22, %v3869_v1  ;;  %v3715_v60 = vadd.f32 %v4588_v59, %v4465_v29  ;;  %vm3889_vm0 = vcmp.ge.f32.partialorder %v3881_v20, 0.0 }
 0x755   : > { %v4468_v35 = vadd.f32 %v4467_v41, %v4466_v34 }
 0x756   : > { %vm3890_vm1 = vcmp.ge.f32.partialorder %v3882_v53, 0.0  ;;  %v3898_v49 = vmul.f32 0.2, %v3882_v53  ;;  %v3822_v19 = vmul.f32 %v7531_v33, %v3715_v60  ;;  %v3905_v25 = vsel %vm3889_vm0, %v3881_v20, %v3897_v36  ;;  %v3861_v36 = vpop.permute.xlu0 %3860 }
 0x757   : > { %v3718_v58 = vadd.f32 %v4589_v6, %v4468_v35  ;;  %v3996_v31 = vpop.f32.mrb[28].mxu1  ;;  %v3913_v9 = vmul.f32 1.4142135, %v3905_v25 }
 0x758   : > { %v3870_v30 = vadd.f32 %v3841_v13, %v3822_v19  ;;  %v3997_v28 = vadd.f32 %v3996_v31, %v3925_v40  ;;  %v4469_v32 = vpop.f32.mrb[40].mxu0  ;;  %v4615_v54 = vpop.f32.mrb[29].mxu1  ;;  %v3906_v27 = vsel %vm3890_vm1, %v3882_v53, %v3898_v49 }
 0x759   : > { %v3823_v10 = vmul.f32 %v7531_v33, %v3718_v58  ;;  %v4470_v14 = vpop.f32.mrb[41].mxu0  ;;  %v3914_v11 = vmul.f32 1.4142135, %v3906_v27  ;;  %v3866_v13 = vpop.permute.xlu1 %3865 }
 0x75a   : > { %v3883_v26 = vadd.f32 %v7537_v22, %v3870_v30  ;;  %v7549_v50 = vrot.slane %v3997_v28, %v6930_v0  ;;  %v4471_v5 = vadd.f32 %v4470_v14, %v4469_v32  ;;  %v4472_v52 = vpop.f32.mrb[42].mxu0 }
 0x75b   : > { %v3871_v51 = vadd.f32 %v3846_v12, %v3823_v10  ;;  %v4473_v59 = vpop.f32.mrb[43].mxu0 }
 0x75c   : > { %vm3891_vm2 = vcmp.ge.f32.partialorder %v3883_v26, 0.0  ;;  %v3899_v6 = vmul.f32 0.2, %v3883_v26  ;;  %v3723_v44 = vadd.f32 %v4471_v5, %v7518_v3  ;;  %v4474_v38 = vadd.f32 %v4473_v59, %v4472_v52 }
 0x75d   : > { %v3884_v24 = vadd.f32 %v7537_v22, %v3871_v51  ;;  %v4008_v48 = vmul.f32 %v7549_v50, %v3913_v9  ;;  %v4009_v46 = vmul.f32 %v7549_v50, %v3914_v11 }
 0x75e   : > { %v3907_v8 = vsel %vm3891_vm2, %v3883_v26, %v3899_v6  ;;  %v3824_v0 = vmul.f32 %v7531_v33, %v3723_v44  ;;  %v3726_v2 = vadd.f32 %v4474_v38, %v7522_v57 }
 0x75f   : > { %v3915_v55 = vmul.f32 1.4142135, %v3907_v8  ;;  %vm3892_vm13 = vcmp.ge.f32.partialorder %v3884_v24, 0.0  ;;  %v3900_v18 = vmul.f32 0.2, %v3884_v24  ;;  %v4016_v56 = vpack.c.bf16 %v4009_v46, %v4008_v48 }
 0x760   : > { %v3872_v63 = vadd.f32 %v3851_v23, %v3824_v0  ;;  %v3825_v4 = vmul.f32 %v7531_v33, %v3726_v2  ;;  %v4475_v3 = vpop.f32.mrb[44].mxu0 }
 0x761   : > { %v3908_v7 = vsel %vm3892_vm13, %v3884_v24, %v3900_v18  ;;  %4620 = vmatprep.mubr.msk.bf16.mxu0 %vm1757_vm11, %v4016_v56  ;;  %v4476_v21 = vpop.f32.mrb[45].mxu0  ;;  %v4010_v15 = vmul.f32 %v7549_v50, %v3915_v55 }
 0x762   : > { %v3916_v37 = vmul.f32 1.4142135, %v3908_v7  ;;  %v3885_v16 = vadd.f32 %v7537_v22, %v3872_v63  ;;  %v3873_v39 = vadd.f32 %v3856_v47, %v3825_v4  ;;  %v4477_v62 = vadd.f32 %v4476_v21, %v4475_v3  ;;  %v4478_v57 = vpop.f32.mrb[46].mxu0 }
 0x763   : > { %v4479_v43 = vpop.f32.mrb[47].mxu0 }
 0x764   : > { %vm3893_vm14 = vcmp.ge.f32.partialorder %v3885_v16, 0.0  ;;  %v3901_v42 = vmul.f32 0.2, %v3885_v16  ;;  %v3886_v23 = vadd.f32 %v7537_v22, %v3873_v39  ;;  %v3731_v61 = vadd.f32 %v7516_v17, %v4477_v62 }
 0x765   : > { %v4480_v20 = vadd.f32 %v4479_v43, %v4478_v57  ;;  %v4011_v1 = vmul.f32 %v7549_v50, %v3916_v37 }
 0x766   : > { %vm3894_vm15 = vcmp.ge.f32.partialorder %v3886_v23, 0.0  ;;  %v3902_v29 = vmul.f32 0.2, %v3886_v23  ;;  %v3826_v34 = vmul.f32 %v7531_v33, %v3731_v61  ;;  %v3909_v41 = vsel %vm3893_vm14, %v3885_v16, %v3901_v42 }
 0x767   : > { %v3734_v47 = vadd.f32 %v7520_v45, %v4480_v20  ;;  %v4017_v53 = vpack.c.bf16 %v4011_v1, %v4010_v15  ;;  %v3917_v60 = vmul.f32 1.4142135, %v3909_v41 }
 0x768   : > { %v3874_v35 = vadd.f32 %v3861_v36, %v3826_v34  ;;  %v3910_v40 = vsel %vm3894_vm15, %v3886_v23, %v3902_v29 }
 0x769   : > { %v3827_v49 = vmul.f32 %v7531_v33, %v3734_v47  ;;  %4621 = vmatmul.mubr.msk.bf16.vlgmr.msra.gmra.mrb[48].mxu0 %vm1757_vm11, %v4017_v53  ;;  %v3918_v17 = vmul.f32 1.4142135, %v3910_v40  ;;  %v4012_v19 = vmul.f32 %v7549_v50, %v3917_v60 }
 0x76a   : > { %v3887_v58 = vadd.f32 %v7537_v22, %v3874_v35 }
 0x76b   : > { %v3875_v31 = vadd.f32 %v3866_v13, %v3827_v49  ;;  %v4013_v30 = vmul.f32 %v7549_v50, %v3918_v17 }
 0x76c   : > { %vm3895_vm4 = vcmp.ge.f32.partialorder %v3887_v58, 0.0  ;;  %v3903_v45 = vmul.f32 0.2, %v3887_v58 }
 0x76d   : > { %v3888_v28 = vadd.f32 %v7537_v22, %v3875_v31  ;;  %v4018_v32 = vpack.c.bf16 %v4013_v30, %v4012_v19 }
 0x76e   : > { %v3911_v33 = vsel %vm3895_vm4, %v3887_v58, %v3903_v45 }
 0x76f   : > { %v3919_v54 = vmul.f32 1.4142135, %v3911_v33  ;;  %vm3896_vm5 = vcmp.ge.f32.partialorder %v3888_v28, 0.0  ;;  %v3904_v25 = vmul.f32 0.2, %v3888_v28  ;;  %4624 = vmatprep.mubr.msk.bf16.mxu1 %vm1757_vm11, %v4018_v32 }
 0x771   : > { %v3912_v27 = vsel %vm3896_vm5, %v3888_v28, %v3904_v25  ;;  %v4014_v10 = vmul.f32 %v7549_v50, %v3919_v54 }
 0x772   : > { %v3920_v14 = vmul.f32 1.4142135, %v3912_v27 }
 0x774   : > { %v4015_v11 = vmul.f32 %v7549_v50, %v3920_v14 }
 0x776   : > { %v4019_v12 = vpack.c.bf16 %v4015_v11, %v4014_v10 }
 0x778   : > { %4625 = vmatmul.mubr.msk.bf16.vlgmr.msra.gmra.mrb[32].mxu1 %vm1757_vm11, %v4019_v12 }
 0x779   : > { %5528 = shalt.err (!%p5525_p3)
}
 0x77a   : > { %s5529_s24 = scalar_lea.hbm %s7580_s13, 32  ;;  %s5533_s25 = scalar_lea.hbm %s7662_s7, 64 }
 0x77b   : > { %p5530_p4 = scmp.ne.s32.totalorder %s7580_s13, %s5529_s24  ;;  %p5534_p9 = scmp.lt.u32.totalorder %s7580_s13, %s7662_s7 }
 0x77c   : > { %p5535_p10 = scmp.lt.u32.totalorder %s5533_s25, %s5529_s24  ;;  %p5537_p12 = scmp.lt.u32.totalorder %s5529_s24, %s7580_s13 }
 0x77d   : > { %p5531_p7 = pnand %p5530_p4, %p5713_p5 }
 0x77e   : > { %p5536_p11 = por %p5535_p10, %p5534_p9 }
 0x77f   : > { %p5532_p8 = pneg %p5531_p7 }
 0x780   : > { %p5538_p13 = por %p5537_p12, %p5536_p11 }
 0x782   : > { %p5539_p0 = pnand %p5538_p13, %p5532_p8 }
 0x784   : > { %5542 = shalt.err (!%p5539_p0)
}
 0x785   : > { %4664 = dma.vmem_to_hbm [thread:$0]  (%p5713_p5), %s4139_s12, 32, %s7580_s13, %s4119_s22   ;;  %v4020_v22 = vld [vmem:[%s7661_s6 + $0x4] ss:$0 sm:$0xff] }
 0x786   : > { %s4274_s17 = sshll.u32 %s6952_s26, 6  ;;  %s4381_s13 = sshll.u32 %s5696_s9, 10 }
 0x787   : > { %s337_s18 = scalar_lea.vmem [#allocation4], %s4274_s17  ;;  %s7609_s19 = scalar_lea.hbm %s7663_s8, %s4381_s13 }
 0x788   : > { %s4151_s12 = sshll.u32 %s337_s18, 4  ;;  %s4124_s9 = scalar_lea.sflag [#allocation5], %s6952_s26  ;;  %s7611_s12 = int_to_ptr.vmem [resolvable:$true] %s4151_s12 }
 0x789   : > { %s5543_s20 = scalar_lea.vmem %s7611_s12, 1024  ;;  %s5628_s25 = smov [#allocation4]  }
 0x78a   : > { %p5544_p1 = scmp.ne.s32.totalorder %s7611_s12, %s5543_s20  ;;  %s5547_s21 = sshll.u32 %s5628_s25, 4  ;;  %s5548_s21 = int_to_ptr.vmem [resolvable:$false] %s5547_s21 }
 0x78b   : > { %s5549_s23 = scalar_lea.vmem %s5548_s21, 2048  ;;  %p5550_p4 = scmp.lt.s32.totalorder %s7611_s12, %s5548_s21 }
 0x78c   : > { %p5545_p2 = pnand %p5544_p1, %p5713_p5  ;;  %p5551_p7 = scmp.lt.s32.totalorder %s5549_s23, %s5543_s20 }
 0x78e   : > { %p5546_p3 = pneg %p5545_p2  ;;  %p5552_p8 = por %p5551_p7, %p5550_p4 }
 0x790   : > { %p5553_p9 = pnand %p5552_p8, %p5546_p3 }
 0x83c   : > { %v4622_v26 = vpop.f32.mrb[48].mxu0 }
 0x83d   : > { %v4088_v50 = vadd.f32 %v4622_v26, %v4020_v22  ;;  %v4079_v5 = vpop.f32.mrb[49].mxu0 }
 0x83e   : > { %v4080_v52 = vadd.f32 %v4079_v5, %v4020_v22  ;;  %v4623_v51 = vpop.f32.mrb[50].mxu0 }
 0x83f   : > { %4112 = vst [vmem:[%s337_s18 + $0x10] sm:$0xff] %v4088_v50  ;;  %v4091_v59 = vadd.f32 %v4623_v51, %v4020_v22  ;;  %v4082_v9 = vpop.f32.mrb[51].mxu0 }
 0x840   : > { %4110 = vst [vmem:[%s337_s18] sm:$0xff] %v4080_v52  ;;  %v4083_v6 = vadd.f32 %v4082_v9, %v4020_v22 }
 0x841   : > { %4113 = vst [vmem:[%s337_s18 + $0x18] sm:$0xff] %v4091_v59 }
 0x842   : > { %4111 = vst [vmem:[%s337_s18 + $0x8] sm:$0xff] %v4083_v6 }
 0x84b   : > { %v4626_v44 = vpop.f32.mrb[32].mxu1 }
 0x84c   : > { %v4104_v38 = vadd.f32 %v4626_v44, %v4020_v22  ;;  %v4095_v24 = vpop.f32.mrb[33].mxu1 }
 0x84d   : > { %v4096_v48 = vadd.f32 %v4095_v24, %v4020_v22  ;;  %v4627_v46 = vpop.f32.mrb[34].mxu1 }
 0x84e   : > { %4116 = vst [vmem:[%s337_s18 + $0x30] sm:$0xff] %v4104_v38  ;;  %v4107_v8 = vadd.f32 %v4627_v46, %v4020_v22  ;;  %v4098_v0 = vpop.f32.mrb[35].mxu1 }
 0x84f   : > { %4114 = vst [vmem:[%s337_s18 + $0x20] sm:$0xff] %v4096_v48  ;;  %v4099_v2 = vadd.f32 %v4098_v0, %v4020_v22 }
 0x850   : > { %4117 = vst [vmem:[%s337_s18 + $0x38] sm:$0xff] %v4107_v8 }
 0x851   : > { %4115 = vst [vmem:[%s337_s18 + $0x28] sm:$0xff] %v4099_v2 }
 0x852   : > { %5556 = shalt.err (!%p5553_p9)
}
 0x853   : > { %s5557_s17 = scalar_lea.hbm %s7609_s19, 1024  ;;  %s5561_s18 = scalar_lea.hbm %s7663_s8, 2048 }
 0x854   : > { %p5558_p10 = scmp.ne.s32.totalorder %s7609_s19, %s5557_s17  ;;  %p5562_p13 = scmp.lt.u32.totalorder %s7609_s19, %s7663_s8 }
 0x855   : > { %p5563_p0 = scmp.lt.u32.totalorder %s5561_s18, %s5557_s17  ;;  %p5565_p2 = scmp.lt.u32.totalorder %s5557_s17, %s7609_s19 }
 0x856   : > { %p5559_p11 = pnand %p5558_p10, %p5713_p5 }
 0x857   : > { %p5564_p1 = por %p5563_p0, %p5562_p13 }
 0x858   : > { %p5560_p12 = pneg %p5559_p11 }
 0x859   : > { %p5566_p3 = por %p5565_p2, %p5564_p1 }
 0x85b   : > { %p5567_p4 = pnand %p5566_p3, %p5560_p12 }
 0x85d   : > { %5570 = shalt.err (!%p5567_p4)
}
 0x85e   : > { %s5629_s24 = smov 128   ;;  %s7695_s20 = smov 8  }
 0x85f   : > { %4665 = dma.vmem_to_hbm [thread:$0]  (%p5713_p5), %s7611_s12, 1024, %s7609_s19, %s4124_s9, %s5629_s24, %s5629_s24, %s7695_s20  }
 0x860 PF: > { %p4675_p7 = scmp.ge.s32.totalorder %s5609_s30, 2  ;;  %s4166_s25 = sand.u32 1, %s5597_s27  }
 0x861   : > { %s4167_s21 = scalar_lea.sflag [#allocation3], %s4166_s25 }
 0x862   : > { %p4669_p8 = pnand %p4675_p7, %p5717_p6 }
 0x864   : > { %5588 = dma.done.wait (!%p4669_p8), %s4167_s21, 32  }
 0x865   : > { %5590 = vsyncadd (!%p4669_p8), %s4167_s21, 4294967264  ;;  %s4176_s23 = scalar_lea.sflag [#allocation5], %s4166_s25 }
 0x866   : > { %5592 = dma.done.wait (!%p4669_p8), %s4176_s23, 1024  }
 0x867   : > { %5594 = vsyncadd (!%p4669_p8), %s4176_s23, 4294966272  ;;  %p22_p5 = scmp.ge.s32.totalorder %s5700_s11, 4   ;;  %s7696_s27 = smov %s5601_s28 }
 0x868   : > { %s7697_s28 = smov %s5605_s29  ;;  %s7698_s29 = smov %s5711_s14 }
 0x869   : > { %s7699_s30 = smov %s5700_s11  ;;  %24 = sbr.rel (!%p22_p5) target bundleno = 7 (0x7), region = 109 }
 0x870   :  { %4181 = vsyncpa [#allocation3], 1 }
 0x871   :  { %4183 = vsyncpa [#allocation3 + $0x1], 1 }
 0x872   :  { %4184 = vsyncpa [#allocation5], 1 }
 0x873   :  { %4186 = vsyncpa [#allocation5 + $0x1], 1 }

</bundles_post_ra>
